<compile_context>
chip_gen: v6e
topology: v6e:2x2x1
jax: 0.10.0
libtpu: 0.0.40
codegen_flags: <defaults>
</compile_context>

<pallas_src>
import functools

import jax
import jax.numpy as jnp
from jax.experimental import pallas as pl
from jax.experimental.pallas import tpu as pltpu


# --------------------------------------------------------------------------
# Kernel
# --------------------------------------------------------------------------

def _block_c_kernel(x_ref, halo_ref, w0_ref, p0_ref, w1e_ref, wmid_ref,
                    p1_ref, p2_ref, p3_ref, o_ref, y_ext_ref, *, include_skip):
    """One (batch, row-tile) per grid step.

    x_ref    : (1, TH, W, 128) f32   input rows (also the skip path)
    halo_ref : (1, 2, W, 128)  f32   x rows just above / below this tile
    w0_ref   : (128, 64)  bf16       1x1 reduce conv weight
    p0_ref   : (3, 64)    f32        [conv_bias, bn_scale, bn_bias] of conv0
    w1e_ref  : (2, 64, 128) bf16     [w1_tap0, w1_tap2]  ((3,1) conv edge taps)
    wmid_ref : (64, 640)  bf16       [w1_tap1 | w2_tap0 | w2_tap1 | w2_tap2 | w3]
    p1/2/3   : (3, 128)   f32        per-branch [conv_bias, bn_scale, bn_bias]
    o_ref    : (1, TH, W, 512|384)   concat([skip?, x1, x2, x3], channel axis)
    y_ext_ref: (TH+2, W, 64) bf16    VMEM scratch in spatial order
                                     [row above | tile rows | row below]
    """
    TH, W = x_ref.shape[1], x_ref.shape[2]
    HW = TH * W
    h = pl.program_id(1)
    n_h = pl.num_programs(1)
    out_dtype = o_ref.dtype
    co = 128 if include_skip else 0            # channel offset of branch outputs

    x = x_ref[0]                               # (TH, W, 128) f32
    if include_skip:
        o_ref[0, :, :, 0:128] = x.astype(out_dtype)

    # ---- conv0: 1x1 reduce 128->64 + ReLU + BN.  Two dots (tile rows, halo
    # rows) so the f32 tile is never concatenated/copied; bf16 MXU operands
    # with f32 accumulation, all elementwise math in f32.
    y = jnp.dot(x.reshape(HW, 128).astype(jnp.bfloat16), w0_ref[...],
                preferred_element_type=jnp.float32)
    y = jnp.maximum(y + p0_ref[0], 0.0) * p0_ref[1] + p0_ref[2]
    y_bf = y.astype(jnp.bfloat16)              # (HW, 64)
    y_ext_ref[1:TH + 1] = y_bf.reshape(TH, W, 64)

    xh = halo_ref[0]                           # (2, W, 128) f32
    yh = jnp.dot(xh.reshape(2 * W, 128).astype(jnp.bfloat16), w0_ref[...],
                 preferred_element_type=jnp.float32)
    yh = jnp.maximum(yh + p0_ref[0], 0.0) * p0_ref[1] + p0_ref[2]
    # conv1 'same'-pads y (post ReLU/BN) with zeros, so a halo row that lies
    # outside the image must contribute exactly zero.
    v_top = jnp.where(h > 0, 1.0, 0.0)
    v_bot = jnp.where(h < n_h - 1, 1.0, 0.0)
    y_ext_ref[0] = (yh[:W] * v_top).astype(jnp.bfloat16)
    y_ext_ref[TH + 1] = (yh[W:] * v_bot).astype(jnp.bfloat16)

    # ---- one wide dot: conv1 centre tap + conv2 (3 taps) + conv3 -----------
    z = jnp.dot(y_bf, wmid_ref[...], preferred_element_type=jnp.float32)  # (HW, 640)

    # ---- conv1: (3,1) along H — shifted windows are static slices of the
    # spatially ordered scratch (no concatenated copies, no wasted halo MACs).
    x1 = z[:, 0:128]
    x1 = x1 + jnp.dot(y_ext_ref[0:TH].reshape(HW, 64), w1e_ref[0],
                      preferred_element_type=jnp.float32)
    x1 = x1 + jnp.dot(y_ext_ref[2:TH + 2].reshape(HW, 64), w1e_ref[1],
                      preferred_element_type=jnp.float32)

    # ---- conv2: ZeroPad2d((1,1,0,0)) + (1,3) along W — shift the OUTPUT taps
    # by +-1 pixel with an XLU rotate, zeroing the image-border columns (this
    # also masks the row-to-row wraparound of the flattened rotate).
    col = jax.lax.broadcasted_iota(jnp.int32, (TH, W, 128), 1).reshape(HW, 128)
    tap_r = jnp.where(col == 0, 0.0, pltpu.roll(z[:, 128:256], 1, axis=0))
    tap_l = jnp.where(col == W - 1, 0.0,
                      pltpu.roll(z[:, 384:512], HW - 1, axis=0))
    x2 = z[:, 256:384] + tap_r + tap_l

    # ---- conv3: 1x1 ---------------------------------------------------------
    x3 = z[:, 512:640]

    # ---- conv bias -> ReLU -> BN (inference), f32 elementwise ---------------
    o_ref[0, :, :, co:co + 128] = (
        jnp.maximum(x1 + p1_ref[0], 0.0) * p1_ref[1] + p1_ref[2]
    ).reshape(TH, W, 128).astype(out_dtype)
    o_ref[0, :, :, co + 128:co + 256] = (
        jnp.maximum(x2 + p2_ref[0], 0.0) * p2_ref[1] + p2_ref[2]
    ).reshape(TH, W, 128).astype(out_dtype)
    o_ref[0, :, :, co + 256:co + 384] = (
        jnp.maximum(x3 + p3_ref[0], 0.0) * p3_ref[1] + p3_ref[2]
    ).reshape(TH, W, 128).astype(out_dtype)


# --------------------------------------------------------------------------
# Tiling / wrapper helpers
# --------------------------------------------------------------------------

def _pick_tile_rows(N, H, W, tile_pixels):
    """Row-tile height: a divisor of H, >= 8 whenever H allows it, close to
    tile_pixels/W rows, and giving >= 2 grid steps (v7x megacore) when cheap."""
    target = min(H, max(8, tile_pixels // max(W, 1)))
    divs = [d for d in range(1, H + 1) if H % d == 0]
    good = [d for d in divs if d >= min(8, H)]
    cands = good if good else divs
    below = [d for d in cands if d <= target]
    th = max(below) if below else min(cands)
    if N * (H // th) < 2:         # give both v7x TensorCores something to do
        alt = [d for d in divs
               if d < th and N * (H // d) >= 2 and (d >= 8 or H < 16)]
        if alt:
            th = max(alt)
    return th


def _build_halo(x, TH):
    """x rows just above/below each row tile: (N*nH, 2, W, C), zero rows at the
    true image border.  Built from strided slices (no materialized pad of x)."""
    N, H, W, C = x.shape
    nH = H // TH
    zero = jnp.zeros((N, 1, W, C), x.dtype)
    top = jnp.concatenate([zero, x[:, TH - 1:H - 1:TH]], axis=1)    # row above
    bot = jnp.concatenate([x[:, TH:H:TH], zero], axis=1)            # row below
    return jnp.stack([top, bot], axis=2).reshape(N * nH, 2, W, C)


def fuse_params(w0, p0, w1, p1, w2, p2, w3, p3):
    """Fold the per-branch conv weights into the fused kernel operands."""
    w1e = jnp.stack([w1[0], w1[2]], axis=0)                             # (2, 64, 128)
    wmid = jnp.concatenate([w1[1], w2[0], w2[1], w2[2], w3], axis=1)    # (64, 640)
    return (w0.astype(jnp.bfloat16), p0, w1e.astype(jnp.bfloat16),
            wmid.astype(jnp.bfloat16), p1, p2, p3)


def block_c_forward_nhwc(x, w0_bf16, p0, w1e_bf16, wmid_bf16, p1, p2, p3, *,
                         tile_pixels=2048, include_skip=True,
                         branch_dtype=jnp.float32):
    """NHWC core: (N, H, W, 128) f32 -> (N, H, W, 512|384), no transposes.

    include_skip=False drops the identity channels (downstream reads x
    directly / concatenates lazily); branch_dtype=bf16 halves branch output
    bytes.  Both are pure HBM-bandwidth optimizations — the default
    (include_skip=True, float32) reproduces the torch module exactly.
    """
    N, H, W, C = x.shape
    assert C == 128, "Block C expects 128 input channels"
    TH = _pick_tile_rows(N, H, W, tile_pixels)
    nH = H // TH
    c_out = 512 if include_skip else 384
    out_isize = jnp.dtype(branch_dtype).itemsize

    halo = _build_halo(x, TH)

    kernel = functools.partial(_block_c_kernel, include_skip=include_skip)

    flops = 2 * N * H * W * 64 * (128 + 896) + 2 * N * nH * 2 * W * 128 * 64
    bytes_accessed = (N * H * W * 128 * 4 + N * nH * 2 * W * 128 * 4
                      + N * H * W * c_out * out_isize)

    # NOTE: if a v5e profile shows exposed output DMA, add
    # pipeline_mode=pl.Buffered(3) on the in/out BlockSpecs below.
    return pl.pallas_call(
        kernel,
        out_shape=jax.ShapeDtypeStruct((N, H, W, c_out), branch_dtype),
        grid=(N, nH),
        in_specs=[
            pl.BlockSpec((1, TH, W, 128), lambda n, h: (n, h, 0, 0)),
            pl.BlockSpec((1, 2, W, 128),
                         lambda n, h, _g=nH: (n * _g + h, 0, 0, 0)),
            pl.BlockSpec((128, 64), lambda n, h: (0, 0)),
            pl.BlockSpec((3, 64), lambda n, h: (0, 0)),
            pl.BlockSpec((2, 64, 128), lambda n, h: (0, 0, 0)),
            pl.BlockSpec((64, 640), lambda n, h: (0, 0)),
            pl.BlockSpec((3, 128), lambda n, h: (0, 0)),
            pl.BlockSpec((3, 128), lambda n, h: (0, 0)),
            pl.BlockSpec((3, 128), lambda n, h: (0, 0)),
        ],
        out_specs=pl.BlockSpec((1, TH, W, c_out), lambda n, h: (n, h, 0, 0)),
        scratch_shapes=[pltpu.VMEM((TH + 2, W, 64), jnp.bfloat16)],
        compiler_params=pltpu.CompilerParams(
            dimension_semantics=("parallel", "parallel"),
            vmem_limit_bytes=48 * 1024 * 1024),
        cost_estimate=pl.CostEstimate(
            flops=flops, transcendentals=0, bytes_accessed=bytes_accessed),
    )(x, halo, w0_bf16, p0, w1e_bf16, wmid_bf16, p1, p2, p3)


@functools.partial(jax.jit, static_argnames=("tile_pixels",))
def block_c_forward(x_nchw, w0, p0, w1, p1, w2, p2, w3, p3, *,
                    tile_pixels=2048):
    """NCHW shim matching the torch module: (N,128,H,W) -> (N,512,H,W) f32.

    Prefer block_c_forward_nhwc in a channels-last model: the two transposes
    here move more HBM bytes than the kernel itself and exist only to keep
    the original module's NCHW interface.
    """
    kp = fuse_params(w0, p0, w1, p1, w2, p2, w3, p3)
    x = jnp.transpose(x_nchw, (0, 2, 3, 1))
    out = block_c_forward_nhwc(x, *kp, tile_pixels=tile_pixels)
    return jnp.transpose(out, (0, 3, 1, 2))


# ------------------------- parameter construction -------------------------

def _fold_bn(key, c_out, scale=0.05):
    """Deterministic conv bias + inference-mode BN folded to scale/bias."""
    k1, k2, k3, k4, k5 = jax.random.split(key, 5)
    conv_b = scale * jax.random.normal(k1, (c_out,), jnp.float32)
    gamma = 1.0 + 0.1 * jax.random.normal(k2, (c_out,), jnp.float32)
    beta = 0.1 * jax.random.normal(k3, (c_out,), jnp.float32)
    r_mean = 0.1 * jax.random.normal(k4, (c_out,), jnp.float32)
    r_var = jnp.abs(1.0 + 0.1 * jax.random.normal(k5, (c_out,), jnp.float32))
    eps = 1e-5
    bn_scale = gamma / jnp.sqrt(r_var + eps)
    bn_bias = beta - r_mean * bn_scale
    return jnp.stack([conv_b, bn_scale, bn_bias], axis=0)   # (3, c_out)


def make_params(key):
    ks = jax.random.split(key, 8)
    s = 0.05
    # 1x1 conv 128->64: torch weight (64,128,1,1) -> stored as (in,out)=(128,64)
    w0 = s * jax.random.normal(ks[0], (128, 64), jnp.float32)
    p0 = _fold_bn(ks[1], 64)
    # (3,1) conv 64->128: torch weight (128,64,3,1) -> (tap=3, in=64, out=128)
    w1 = s * jax.random.normal(ks[2], (3, 64, 128), jnp.float32)
    p1 = _fold_bn(ks[3], 128)
    # (1,3) conv 64->128: torch weight (128,64,1,3) -> (tap=3, in=64, out=128)
    w2 = s * jax.random.normal(ks[4], (3, 64, 128), jnp.float32)
    p2 = _fold_bn(ks[5], 128)
    # 1x1 conv 64->128
    w3 = s * jax.random.normal(ks[6], (64, 128), jnp.float32)
    p3 = _fold_bn(ks[7], 128)
    return w0, p0, w1, p1, w2, p2, w3, p3


# ---------------------------- pure-JAX reference ---------------------------

def ref_forward(x_nchw, w0, p0, w1, p1, w2, p2, w3, p3):
    x = jnp.transpose(x_nchw, (0, 2, 3, 1)).astype(jnp.float32)  # NHWC
    N, H, W, _ = x.shape

    y = jnp.einsum('nhwc,co->nhwo', x, w0)
    y = jnp.maximum(y + p0[0], 0.0) * p0[1] + p0[2]              # (N,H,W,64)

    x3 = jnp.einsum('nhwc,co->nhwo', y, w3)
    x3 = jnp.maximum(x3 + p3[0], 0.0) * p3[1] + p3[2]

    yp = jnp.pad(y, ((0, 0), (1, 1), (0, 0), (0, 0)))
    x1 = sum(jnp.einsum('nhwc,co->nhwo', yp[:, d:d + H], w1[d])
             for d in range(3))
    x1 = jnp.maximum(x1 + p1[0], 0.0) * p1[1] + p1[2]

    yq = jnp.pad(y, ((0, 0), (0, 0), (1, 1), (0, 0)))
    x2 = sum(jnp.einsum('nhwc,co->nhwo', yq[:, :, d:d + W], w2[d])
             for d in range(3))
    x2 = jnp.maximum(x2 + p2[0], 0.0) * p2[1] + p2[2]

    out = jnp.concatenate([x, x1, x2, x3], axis=-1)
    return jnp.transpose(out, (0, 3, 1, 2))


if __name__ == "__main__":
    key = jax.random.PRNGKey(0)
    kx, kp = jax.random.split(key)

    N, C, H, W = 2, 128, 16, 16
    x = jax.random.normal(kx, (N, C, H, W), jnp.float32)
    params = make_params(kp)

    ref = ref_forward(x, *params)

    # 1) Default tiling (TH=16, one row tile per image).
    out = jax.block_until_ready(block_c_forward(x, *params))
    assert out.shape == (N, 512, H, W), out.shape
    err = float(jnp.max(jnp.abs(out - ref)))
    assert err < 5e-2, f"max abs err (single tile) {err}"

    # 2) Force multiple row tiles (TH=8 -> 2 tiles/image): exercises the
    #    cross-tile halo path of the (3,1) conv.
    out2 = jax.block_until_ready(block_c_forward(x, *params, tile_pixels=128))
    err2 = float(jnp.max(jnp.abs(out2 - ref)))
    assert err2 < 5e-2, f"max abs err (row-tiled) {err2}"

    # 3) Tiny image (N=1, H=2) -> TH=1, 2 grid steps: exercises the TH=1 path
    #    and the megacore split in _pick_tile_rows.
    x_s = jax.random.normal(jax.random.PRNGKey(1), (1, 128, 2, 16), jnp.float32)
    ref_s = ref_forward(x_s, *params)
    out_s = jax.block_until_ready(block_c_forward(x_s, *params))
    err_s = float(jnp.max(jnp.abs(out_s - ref_s)))
    assert err_s < 5e-2, f"max abs err (TH=1) {err_s}"

    # 4) Bandwidth-optimized NHWC path: branches only (no skip write), bf16.
    kp_fused = fuse_params(*params)
    x_nhwc = jnp.transpose(x, (0, 2, 3, 1))
    br = jax.block_until_ready(block_c_forward_nhwc(
        x_nhwc, *kp_fused, include_skip=False, branch_dtype=jnp.bfloat16))
    assert br.shape == (N, H, W, 384), br.shape
    ref_br = jnp.transpose(ref, (0, 2, 3, 1))[..., 128:]
    err_b = float(jnp.max(jnp.abs(br.astype(jnp.float32) - ref_br)))
    assert err_b < 1e-1, f"max abs err (branches-only bf16) {err_b}"

    print("KERNEL_OK")
</pallas_src>

<mosaic_0001>
module attributes {stable_mosaic.version = 11 : i64} {
  func.func @_block_c_kernel(%arg0: i32, %arg1: i32, %arg2: memref<1x16x16x128xf32, #tpu.memory_space<vmem>>, %arg3: memref<1x2x16x128xf32, #tpu.memory_space<vmem>>, %arg4: memref<128x64xbf16, #tpu.memory_space<vmem>>, %arg5: memref<3x64xf32, #tpu.memory_space<vmem>>, %arg6: memref<2x64x128xbf16, #tpu.memory_space<vmem>>, %arg7: memref<64x640xbf16, #tpu.memory_space<vmem>>, %arg8: memref<3x128xf32, #tpu.memory_space<vmem>>, %arg9: memref<3x128xf32, #tpu.memory_space<vmem>>, %arg10: memref<3x128xf32, #tpu.memory_space<vmem>>, %arg11: memref<1x16x16x512xf32, #tpu.memory_space<vmem>>, %arg12: memref<18x16x64xbf16, #tpu.memory_space<vmem>>) attributes {dimension_semantics = [#tpu.dimension_semantics<parallel>, #tpu.dimension_semantics<parallel>], iteration_bounds = array<i64: 2, 1>, scalar_prefetch = 0 : i64, scratch_operands = 1 : i64, tpu.core_type = #tpu.core_type<tc>, window_params = [{transform_indices = @transform_0, window_bounds = array<i64: 1, 16, 16, 128>}, {transform_indices = @transform_1, window_bounds = array<i64: 1, 2, 16, 128>}, {pipeline_mode = #tpu.pipeline_mode<synchronous>, transform_indices = @transform_2, window_bounds = array<i64: 128, 64>}, {pipeline_mode = #tpu.pipeline_mode<synchronous>, transform_indices = @transform_3, window_bounds = array<i64: 3, 64>}, {pipeline_mode = #tpu.pipeline_mode<synchronous>, transform_indices = @transform_4, window_bounds = array<i64: 2, 64, 128>}, {pipeline_mode = #tpu.pipeline_mode<synchronous>, transform_indices = @transform_5, window_bounds = array<i64: 64, 640>}, {pipeline_mode = #tpu.pipeline_mode<synchronous>, transform_indices = @transform_6, window_bounds = array<i64: 3, 128>}, {pipeline_mode = #tpu.pipeline_mode<synchronous>, transform_indices = @transform_7, window_bounds = array<i64: 3, 128>}, {pipeline_mode = #tpu.pipeline_mode<synchronous>, transform_indices = @transform_8, window_bounds = array<i64: 3, 128>}, {transform_indices = @transform_9, window_bounds = array<i64: 1, 16, 16, 512>}]} {
    %c0 = arith.constant 0 : index
    %c0_0 = arith.constant 0 : index
    %c0_1 = arith.constant 0 : index
    %c0_2 = arith.constant 0 : index
    %0 = vector.load %arg2[%c0, %c0_0, %c0_1, %c0_2] : memref<1x16x16x128xf32, #tpu.memory_space<vmem>>, vector<1x16x16x128xf32>
    %1 = vector.shape_cast %0 : vector<1x16x16x128xf32> to vector<16x16x128xf32>
    %c0_3 = arith.constant 0 : index
    %c0_4 = arith.constant 0 : index
    %c0_5 = arith.constant 0 : index
    %c0_6 = arith.constant 0 : index
    %2 = vector.load %arg11[%c0_3, %c0_4, %c0_5, %c0_6] : memref<1x16x16x512xf32, #tpu.memory_space<vmem>>, vector<1x16x16x128xf32>
    %3 = vector.shape_cast %2 : vector<1x16x16x128xf32> to vector<16x16x128xf32>
    %4 = vector.shape_cast %1 : vector<16x16x128xf32> to vector<1x16x16x128xf32>
    tpu.vector_store %arg11[%c0_3, %c0_4, %c0_5, %c0_6], %4 {strides = array<i32>} : memref<1x16x16x512xf32, #tpu.memory_space<vmem>>, vector<1x16x16x128xf32>,
    %5 = vector.shape_cast %1 : vector<16x16x128xf32> to vector<256x128xf32>
    %6 = arith.truncf %5 : vector<256x128xf32> to vector<256x128xbf16>
    %c0_7 = arith.constant 0 : index
    %c0_8 = arith.constant 0 : index
    %7 = vector.load %arg4[%c0_7, %c0_8] : memref<128x64xbf16, #tpu.memory_space<vmem>>, vector<128x64xbf16>
    %cst = arith.constant dense<0.000000e+00> : vector<256x64xf32>
    %8 = tpu.matmul %6, %7, %cst {dimension_numbers = #tpu.dot_dimension_numbers<[1], [0], [0], [1], [0, 0, 1, 1], [], []>} : vector<256x128xbf16>, vector<128x64xbf16>, vector<256x64xf32> -> vector<256x64xf32>
    %c0_9 = arith.constant 0 : index
    %c0_10 = arith.constant 0 : index
    %9 = vector.load %arg5[%c0_9, %c0_10] : memref<3x64xf32, #tpu.memory_space<vmem>>, vector<1x64xf32>
    %10 = vector.shape_cast %9 : vector<1x64xf32> to vector<64xf32>
    %11 = vector.shape_cast %10 : vector<64xf32> to vector<1x64xf32>
    %12 = vector.broadcast %11 : vector<1x64xf32> to vector<256x64xf32>
    %13 = arith.addf %8, %12 : vector<256x64xf32>
    %cst_11 = arith.constant 0.000000e+00 : f32
    %14 = vector.broadcast %cst_11 : f32 to vector<256x64xf32>
    %15 = arith.maximumf %13, %14 : vector<256x64xf32>
    %c1 = arith.constant 1 : index
    %c0_12 = arith.constant 0 : index
    %16 = vector.load %arg5[%c1, %c0_12] : memref<3x64xf32, #tpu.memory_space<vmem>>, vector<1x64xf32>
    %17 = vector.shape_cast %16 : vector<1x64xf32> to vector<64xf32>
    %18 = vector.shape_cast %17 : vector<64xf32> to vector<1x64xf32>
    %19 = vector.broadcast %18 : vector<1x64xf32> to vector<256x64xf32>
    %20 = arith.mulf %15, %19 : vector<256x64xf32>
    %c2 = arith.constant 2 : index
    %c0_13 = arith.constant 0 : index
    %21 = vector.load %arg5[%c2, %c0_13] : memref<3x64xf32, #tpu.memory_space<vmem>>, vector<1x64xf32>
    %22 = vector.shape_cast %21 : vector<1x64xf32> to vector<64xf32>
    %23 = vector.shape_cast %22 : vector<64xf32> to vector<1x64xf32>
    %24 = vector.broadcast %23 : vector<1x64xf32> to vector<256x64xf32>
    %25 = arith.addf %20, %24 : vector<256x64xf32>
    %26 = arith.truncf %25 : vector<256x64xf32> to vector<256x64xbf16>
    %27 = vector.shape_cast %26 : vector<256x64xbf16> to vector<16x16x64xbf16>
    %c1_14 = arith.constant 1 : index
    %c0_15 = arith.constant 0 : index
    %c0_16 = arith.constant 0 : index
    %28 = vector.load %arg12[%c1_14, %c0_15, %c0_16] : memref<18x16x64xbf16, #tpu.memory_space<vmem>>, vector<16x16x64xbf16>
    tpu.vector_store %arg12[%c1_14, %c0_15, %c0_16], %27 {strides = array<i32>} : memref<18x16x64xbf16, #tpu.memory_space<vmem>>, vector<16x16x64xbf16>,
    %c0_17 = arith.constant 0 : index
    %c0_18 = arith.constant 0 : index
    %c0_19 = arith.constant 0 : index
    %c0_20 = arith.constant 0 : index
    %29 = vector.load %arg3[%c0_17, %c0_18, %c0_19, %c0_20] : memref<1x2x16x128xf32, #tpu.memory_space<vmem>>, vector<1x2x16x128xf32>
    %30 = vector.shape_cast %29 : vector<1x2x16x128xf32> to vector<2x16x128xf32>
    %31 = vector.shape_cast %30 : vector<2x16x128xf32> to vector<32x128xf32>
    %32 = arith.truncf %31 : vector<32x128xf32> to vector<32x128xbf16>
    %c0_21 = arith.constant 0 : index
    %c0_22 = arith.constant 0 : index
    %33 = vector.load %arg4[%c0_21, %c0_22] : memref<128x64xbf16, #tpu.memory_space<vmem>>, vector<128x64xbf16>
    %cst_23 = arith.constant dense<0.000000e+00> : vector<32x64xf32>
    %34 = tpu.matmul %32, %33, %cst_23 {dimension_numbers = #tpu.dot_dimension_numbers<[1], [0], [0], [1], [0, 0, 1, 1], [], []>} : vector<32x128xbf16>, vector<128x64xbf16>, vector<32x64xf32> -> vector<32x64xf32>
    %c0_24 = arith.constant 0 : index
    %c0_25 = arith.constant 0 : index
    %35 = vector.load %arg5[%c0_24, %c0_25] : memref<3x64xf32, #tpu.memory_space<vmem>>, vector<1x64xf32>
    %36 = vector.shape_cast %35 : vector<1x64xf32> to vector<64xf32>
    %37 = vector.shape_cast %36 : vector<64xf32> to vector<1x64xf32>
    %38 = vector.broadcast %37 : vector<1x64xf32> to vector<32x64xf32>
    %39 = arith.addf %34, %38 : vector<32x64xf32>
    %cst_26 = arith.constant 0.000000e+00 : f32
    %40 = vector.broadcast %cst_26 : f32 to vector<32x64xf32>
    %41 = arith.maximumf %39, %40 : vector<32x64xf32>
    %c1_27 = arith.constant 1 : index
    %c0_28 = arith.constant 0 : index
    %42 = vector.load %arg5[%c1_27, %c0_28] : memref<3x64xf32, #tpu.memory_space<vmem>>, vector<1x64xf32>
    %43 = vector.shape_cast %42 : vector<1x64xf32> to vector<64xf32>
    %44 = vector.shape_cast %43 : vector<64xf32> to vector<1x64xf32>
    %45 = vector.broadcast %44 : vector<1x64xf32> to vector<32x64xf32>
    %46 = arith.mulf %41, %45 : vector<32x64xf32>
    %c2_29 = arith.constant 2 : index
    %c0_30 = arith.constant 0 : index
    %47 = vector.load %arg5[%c2_29, %c0_30] : memref<3x64xf32, #tpu.memory_space<vmem>>, vector<1x64xf32>
    %48 = vector.shape_cast %47 : vector<1x64xf32> to vector<64xf32>
    %49 = vector.shape_cast %48 : vector<64xf32> to vector<1x64xf32>
    %50 = vector.broadcast %49 : vector<1x64xf32> to vector<32x64xf32>
    %51 = arith.addf %46, %50 : vector<32x64xf32>
    %c0_i32 = arith.constant 0 : i32
    %52 = arith.cmpi sgt, %arg1, %c0_i32 : i32
    %cst_31 = arith.constant 1.000000e+00 : f32
    %cst_32 = arith.constant 0.000000e+00 : f32
    %53 = arith.select %52, %cst_31, %cst_32 : f32
    %c0_i32_33 = arith.constant 0 : i32
    %54 = arith.cmpi slt, %arg1, %c0_i32_33 : i32
    %cst_34 = arith.constant 1.000000e+00 : f32
    %cst_35 = arith.constant 0.000000e+00 : f32
    %55 = arith.select %54, %cst_34, %cst_35 : f32
    %56 = vector.extract_strided_slice %51 {offsets = [0, 0], sizes = [16, 64], strides = [1, 1]} : vector<32x64xf32> to vector<16x64xf32>
    %57 = vector.broadcast %53 : f32 to vector<16x64xf32>
    %58 = arith.mulf %56, %57 : vector<16x64xf32>
    %59 = arith.truncf %58 : vector<16x64xf32> to vector<16x64xbf16>
    %c0_36 = arith.constant 0 : index
    %c0_37 = arith.constant 0 : index
    %c0_38 = arith.constant 0 : index
    %60 = vector.load %arg12[%c0_36, %c0_37, %c0_38] : memref<18x16x64xbf16, #tpu.memory_space<vmem>>, vector<1x16x64xbf16>
    %61 = vector.shape_cast %60 : vector<1x16x64xbf16> to vector<16x64xbf16>
    %62 = vector.shape_cast %59 : vector<16x64xbf16> to vector<1x16x64xbf16>
    tpu.vector_store %arg12[%c0_36, %c0_37, %c0_38], %62 {strides = array<i32>} : memref<18x16x64xbf16, #tpu.memory_space<vmem>>, vector<1x16x64xbf16>,
    %63 = vector.extract_strided_slice %51 {offsets = [16, 0], sizes = [16, 64], strides = [1, 1]} : vector<32x64xf32> to vector<16x64xf32>
    %64 = vector.broadcast %55 : f32 to vector<16x64xf32>
    %65 = arith.mulf %63, %64 : vector<16x64xf32>
    %66 = arith.truncf %65 : vector<16x64xf32> to vector<16x64xbf16>
    %c17 = arith.constant 17 : index
    %c0_39 = arith.constant 0 : index
    %c0_40 = arith.constant 0 : index
    %67 = vector.load %arg12[%c17, %c0_39, %c0_40] : memref<18x16x64xbf16, #tpu.memory_space<vmem>>, vector<1x16x64xbf16>
    %68 = vector.shape_cast %67 : vector<1x16x64xbf16> to vector<16x64xbf16>
    %69 = vector.shape_cast %66 : vector<16x64xbf16> to vector<1x16x64xbf16>
    tpu.vector_store %arg12[%c17, %c0_39, %c0_40], %69 {strides = array<i32>} : memref<18x16x64xbf16, #tpu.memory_space<vmem>>, vector<1x16x64xbf16>,
    %c0_41 = arith.constant 0 : index
    %c0_42 = arith.constant 0 : index
    %70 = vector.load %arg7[%c0_41, %c0_42] : memref<64x640xbf16, #tpu.memory_space<vmem>>, vector<64x640xbf16>
    %cst_43 = arith.constant dense<0.000000e+00> : vector<256x640xf32>
    %71 = tpu.matmul %26, %70, %cst_43 {dimension_numbers = #tpu.dot_dimension_numbers<[1], [0], [0], [1], [0, 0, 1, 1], [], []>} : vector<256x64xbf16>, vector<64x640xbf16>, vector<256x640xf32> -> vector<256x640xf32>
    %72 = vector.extract_strided_slice %71 {offsets = [0, 0], sizes = [256, 128], strides = [1, 1]} : vector<256x640xf32> to vector<256x128xf32>
    %c0_44 = arith.constant 0 : index
    %c0_45 = arith.constant 0 : index
    %c0_46 = arith.constant 0 : index
    %73 = vector.load %arg12[%c0_44, %c0_45, %c0_46] : memref<18x16x64xbf16, #tpu.memory_space<vmem>>, vector<16x16x64xbf16>
    %74 = vector.shape_cast %73 : vector<16x16x64xbf16> to vector<256x64xbf16>
    %c0_47 = arith.constant 0 : index
    %c0_48 = arith.constant 0 : index
    %c0_49 = arith.constant 0 : index
    %75 = vector.load %arg6[%c0_47, %c0_48, %c0_49] : memref<2x64x128xbf16, #tpu.memory_space<vmem>>, vector<1x64x128xbf16>
    %76 = vector.shape_cast %75 : vector<1x64x128xbf16> to vector<64x128xbf16>
    %cst_50 = arith.constant dense<0.000000e+00> : vector<256x128xf32>
    %77 = tpu.matmul %74, %76, %cst_50 {dimension_numbers = #tpu.dot_dimension_numbers<[1], [0], [0], [1], [0, 0, 1, 1], [], []>} : vector<256x64xbf16>, vector<64x128xbf16>, vector<256x128xf32> -> vector<256x128xf32>
    %78 = arith.addf %72, %77 : vector<256x128xf32>
    %c2_51 = arith.constant 2 : index
    %c0_52 = arith.constant 0 : index
    %c0_53 = arith.constant 0 : index
    %79 = vector.load %arg12[%c2_51, %c0_52, %c0_53] : memref<18x16x64xbf16, #tpu.memory_space<vmem>>, vector<16x16x64xbf16>
    %80 = vector.shape_cast %79 : vector<16x16x64xbf16> to vector<256x64xbf16>
    %c1_54 = arith.constant 1 : index
    %c0_55 = arith.constant 0 : index
    %c0_56 = arith.constant 0 : index
    %81 = vector.load %arg6[%c1_54, %c0_55, %c0_56] : memref<2x64x128xbf16, #tpu.memory_space<vmem>>, vector<1x64x128xbf16>
    %82 = vector.shape_cast %81 : vector<1x64x128xbf16> to vector<64x128xbf16>
    %cst_57 = arith.constant dense<0.000000e+00> : vector<256x128xf32>
    %83 = tpu.matmul %80, %82, %cst_57 {dimension_numbers = #tpu.dot_dimension_numbers<[1], [0], [0], [1], [0, 0, 1, 1], [], []>} : vector<256x64xbf16>, vector<64x128xbf16>, vector<256x128xf32> -> vector<256x128xf32>
    %84 = arith.addf %78, %83 : vector<256x128xf32>
    %85 = tpu.iota {dimensions = array<i32: 1>} : vector<16x16x128xi32>
    %86 = vector.shape_cast %85 : vector<16x16x128xi32> to vector<256x128xi32>
    %c0_i32_58 = arith.constant 0 : i32
    %87 = vector.broadcast %c0_i32_58 : i32 to vector<256x128xi32>
    %88 = arith.cmpi eq, %86, %87 : vector<256x128xi32>
    %89 = vector.extract_strided_slice %71 {offsets = [0, 128], sizes = [256, 128], strides = [1, 1]} : vector<256x640xf32> to vector<256x128xf32>
    %c1_i32 = arith.constant 1 : i32
    %90 = tpu.dynamic_rotate %89 by %c1_i32 dim 0 : vector<256x128xf32>, i32 -> vector<256x128xf32>
    %cst_59 = arith.constant 0.000000e+00 : f32
    %91 = vector.broadcast %cst_59 : f32 to vector<256x128xf32>
    %92 = arith.select %88, %91, %90 : vector<256x128xi1>, vector<256x128xf32>
    %c15_i32 = arith.constant 15 : i32
    %93 = vector.broadcast %c15_i32 : i32 to vector<256x128xi32>
    %94 = arith.cmpi eq, %86, %93 : vector<256x128xi32>
    %95 = vector.extract_strided_slice %71 {offsets = [0, 384], sizes = [256, 128], strides = [1, 1]} : vector<256x640xf32> to vector<256x128xf32>
    %c255_i32 = arith.constant 255 : i32
    %96 = tpu.dynamic_rotate %95 by %c255_i32 dim 0 : vector<256x128xf32>, i32 -> vector<256x128xf32>
    %cst_60 = arith.constant 0.000000e+00 : f32
    %97 = vector.broadcast %cst_60 : f32 to vector<256x128xf32>
    %98 = arith.select %94, %97, %96 : vector<256x128xi1>, vector<256x128xf32>
    %99 = vector.extract_strided_slice %71 {offsets = [0, 256], sizes = [256, 128], strides = [1, 1]} : vector<256x640xf32> to vector<256x128xf32>
    %100 = arith.addf %99, %92 : vector<256x128xf32>
    %101 = arith.addf %100, %98 : vector<256x128xf32>
    %102 = vector.extract_strided_slice %71 {offsets = [0, 512], sizes = [256, 128], strides = [1, 1]} : vector<256x640xf32> to vector<256x128xf32>
    %c0_61 = arith.constant 0 : index
    %c0_62 = arith.constant 0 : index
    %103 = vector.load %arg8[%c0_61, %c0_62] : memref<3x128xf32, #tpu.memory_space<vmem>>, vector<1x128xf32>
    %104 = vector.shape_cast %103 : vector<1x128xf32> to vector<128xf32>
    %105 = vector.shape_cast %104 : vector<128xf32> to vector<1x128xf32>
    %106 = vector.broadcast %105 : vector<1x128xf32> to vector<256x128xf32>
    %107 = arith.addf %84, %106 : vector<256x128xf32>
    %cst_63 = arith.constant 0.000000e+00 : f32
    %108 = vector.broadcast %cst_63 : f32 to vector<256x128xf32>
    %109 = arith.maximumf %107, %108 : vector<256x128xf32>
    %c1_64 = arith.constant 1 : index
    %c0_65 = arith.constant 0 : index
    %110 = vector.load %arg8[%c1_64, %c0_65] : memref<3x128xf32, #tpu.memory_space<vmem>>, vector<1x128xf32>
    %111 = vector.shape_cast %110 : vector<1x128xf32> to vector<128xf32>
    %112 = vector.shape_cast %111 : vector<128xf32> to vector<1x128xf32>
    %113 = vector.broadcast %112 : vector<1x128xf32> to vector<256x128xf32>
    %114 = arith.mulf %109, %113 : vector<256x128xf32>
    %c2_66 = arith.constant 2 : index
    %c0_67 = arith.constant 0 : index
    %115 = vector.load %arg8[%c2_66, %c0_67] : memref<3x128xf32, #tpu.memory_space<vmem>>, vector<1x128xf32>
    %116 = vector.shape_cast %115 : vector<1x128xf32> to vector<128xf32>
    %117 = vector.shape_cast %116 : vector<128xf32> to vector<1x128xf32>
    %118 = vector.broadcast %117 : vector<1x128xf32> to vector<256x128xf32>
    %119 = arith.addf %114, %118 : vector<256x128xf32>
    %120 = vector.shape_cast %119 : vector<256x128xf32> to vector<16x16x128xf32>
    %c0_68 = arith.constant 0 : index
    %c0_69 = arith.constant 0 : index
    %c0_70 = arith.constant 0 : index
    %c128 = arith.constant 128 : index
    %121 = vector.load %arg11[%c0_68, %c0_69, %c0_70, %c128] : memref<1x16x16x512xf32, #tpu.memory_space<vmem>>, vector<1x16x16x128xf32>
    %122 = vector.shape_cast %121 : vector<1x16x16x128xf32> to vector<16x16x128xf32>
    %123 = vector.shape_cast %120 : vector<16x16x128xf32> to vector<1x16x16x128xf32>
    tpu.vector_store %arg11[%c0_68, %c0_69, %c0_70, %c128], %123 {strides = array<i32>} : memref<1x16x16x512xf32, #tpu.memory_space<vmem>>, vector<1x16x16x128xf32>,
    %c0_71 = arith.constant 0 : index
    %c0_72 = arith.constant 0 : index
    %124 = vector.load %arg9[%c0_71, %c0_72] : memref<3x128xf32, #tpu.memory_space<vmem>>, vector<1x128xf32>
    %125 = vector.shape_cast %124 : vector<1x128xf32> to vector<128xf32>
    %126 = vector.shape_cast %125 : vector<128xf32> to vector<1x128xf32>
    %127 = vector.broadcast %126 : vector<1x128xf32> to vector<256x128xf32>
    %128 = arith.addf %101, %127 : vector<256x128xf32>
    %cst_73 = arith.constant 0.000000e+00 : f32
    %129 = vector.broadcast %cst_73 : f32 to vector<256x128xf32>
    %130 = arith.maximumf %128, %129 : vector<256x128xf32>
    %c1_74 = arith.constant 1 : index
    %c0_75 = arith.constant 0 : index
    %131 = vector.load %arg9[%c1_74, %c0_75] : memref<3x128xf32, #tpu.memory_space<vmem>>, vector<1x128xf32>
    %132 = vector.shape_cast %131 : vector<1x128xf32> to vector<128xf32>
    %133 = vector.shape_cast %132 : vector<128xf32> to vector<1x128xf32>
    %134 = vector.broadcast %133 : vector<1x128xf32> to vector<256x128xf32>
    %135 = arith.mulf %130, %134 : vector<256x128xf32>
    %c2_76 = arith.constant 2 : index
    %c0_77 = arith.constant 0 : index
    %136 = vector.load %arg9[%c2_76, %c0_77] : memref<3x128xf32, #tpu.memory_space<vmem>>, vector<1x128xf32>
    %137 = vector.shape_cast %136 : vector<1x128xf32> to vector<128xf32>
    %138 = vector.shape_cast %137 : vector<128xf32> to vector<1x128xf32>
    %139 = vector.broadcast %138 : vector<1x128xf32> to vector<256x128xf32>
    %140 = arith.addf %135, %139 : vector<256x128xf32>
    %141 = vector.shape_cast %140 : vector<256x128xf32> to vector<16x16x128xf32>
    %c0_78 = arith.constant 0 : index
    %c0_79 = arith.constant 0 : index
    %c0_80 = arith.constant 0 : index
    %c256 = arith.constant 256 : index
    %142 = vector.load %arg11[%c0_78, %c0_79, %c0_80, %c256] : memref<1x16x16x512xf32, #tpu.memory_space<vmem>>, vector<1x16x16x128xf32>
    %143 = vector.shape_cast %142 : vector<1x16x16x128xf32> to vector<16x16x128xf32>
    %144 = vector.shape_cast %141 : vector<16x16x128xf32> to vector<1x16x16x128xf32>
    tpu.vector_store %arg11[%c0_78, %c0_79, %c0_80, %c256], %144 {strides = array<i32>} : memref<1x16x16x512xf32, #tpu.memory_space<vmem>>, vector<1x16x16x128xf32>,
    %c0_81 = arith.constant 0 : index
    %c0_82 = arith.constant 0 : index
    %145 = vector.load %arg10[%c0_81, %c0_82] : memref<3x128xf32, #tpu.memory_space<vmem>>, vector<1x128xf32>
    %146 = vector.shape_cast %145 : vector<1x128xf32> to vector<128xf32>
    %147 = vector.shape_cast %146 : vector<128xf32> to vector<1x128xf32>
    %148 = vector.broadcast %147 : vector<1x128xf32> to vector<256x128xf32>
    %149 = arith.addf %102, %148 : vector<256x128xf32>
    %cst_83 = arith.constant 0.000000e+00 : f32
    %150 = vector.broadcast %cst_83 : f32 to vector<256x128xf32>
    %151 = arith.maximumf %149, %150 : vector<256x128xf32>
    %c1_84 = arith.constant 1 : index
    %c0_85 = arith.constant 0 : index
    %152 = vector.load %arg10[%c1_84, %c0_85] : memref<3x128xf32, #tpu.memory_space<vmem>>, vector<1x128xf32>
    %153 = vector.shape_cast %152 : vector<1x128xf32> to vector<128xf32>
    %154 = vector.shape_cast %153 : vector<128xf32> to vector<1x128xf32>
    %155 = vector.broadcast %154 : vector<1x128xf32> to vector<256x128xf32>
    %156 = arith.mulf %151, %155 : vector<256x128xf32>
    %c2_86 = arith.constant 2 : index
    %c0_87 = arith.constant 0 : index
    %157 = vector.load %arg10[%c2_86, %c0_87] : memref<3x128xf32, #tpu.memory_space<vmem>>, vector<1x128xf32>
    %158 = vector.shape_cast %157 : vector<1x128xf32> to vector<128xf32>
    %159 = vector.shape_cast %158 : vector<128xf32> to vector<1x128xf32>
    %160 = vector.broadcast %159 : vector<1x128xf32> to vector<256x128xf32>
    %161 = arith.addf %156, %160 : vector<256x128xf32>
    %162 = vector.shape_cast %161 : vector<256x128xf32> to vector<16x16x128xf32>
    %c0_88 = arith.constant 0 : index
    %c0_89 = arith.constant 0 : index
    %c0_90 = arith.constant 0 : index
    %c384 = arith.constant 384 : index
    %163 = vector.load %arg11[%c0_88, %c0_89, %c0_90, %c384] : memref<1x16x16x512xf32, #tpu.memory_space<vmem>>, vector<1x16x16x128xf32>
    %164 = vector.shape_cast %163 : vector<1x16x16x128xf32> to vector<16x16x128xf32>
    %165 = vector.shape_cast %162 : vector<16x16x128xf32> to vector<1x16x16x128xf32>
    tpu.vector_store %arg11[%c0_88, %c0_89, %c0_90, %c384], %165 {strides = array<i32>} : memref<1x16x16x512xf32, #tpu.memory_space<vmem>>, vector<1x16x16x128xf32>,
    return
  }
  func.func @transform_0(%arg0: i32, %arg1: i32) -> (i32, i32, i32, i32) {
    %c0_i32 = arith.constant 0 : i32
    %c0_i32_0 = arith.constant 0 : i32
    %c0_i32_1 = arith.constant 0 : i32
    return %arg0, %arg1, %c0_i32, %c0_i32_0 : i32, i32, i32, i32
  }
  func.func @transform_1(%arg0: i32, %arg1: i32) -> (i32, i32, i32, i32) {
    %c1_i32 = arith.constant 1 : i32
    %0 = arith.muli %arg0, %c1_i32 : i32
    %1 = arith.addi %0, %arg1 : i32
    %c0_i32 = arith.constant 0 : i32
    %c0_i32_0 = arith.constant 0 : i32
    %c0_i32_1 = arith.constant 0 : i32
    %c0_i32_2 = arith.constant 0 : i32
    return %1, %c0_i32, %c0_i32_0, %c0_i32_1 : i32, i32, i32, i32
  }
  func.func @transform_2(%arg0: i32, %arg1: i32) -> (i32, i32) {
    %c0_i32 = arith.constant 0 : i32
    %c0_i32_0 = arith.constant 0 : i32
    %c0_i32_1 = arith.constant 0 : i32
    return %c0_i32, %c0_i32_0 : i32, i32
  }
  func.func @transform_3(%arg0: i32, %arg1: i32) -> (i32, i32) {
    %c0_i32 = arith.constant 0 : i32
    %c0_i32_0 = arith.constant 0 : i32
    %c0_i32_1 = arith.constant 0 : i32
    return %c0_i32, %c0_i32_0 : i32, i32
  }
  func.func @transform_4(%arg0: i32, %arg1: i32) -> (i32, i32, i32) {
    %c0_i32 = arith.constant 0 : i32
    %c0_i32_0 = arith.constant 0 : i32
    %c0_i32_1 = arith.constant 0 : i32
    %c0_i32_2 = arith.constant 0 : i32
    return %c0_i32, %c0_i32_0, %c0_i32_1 : i32, i32, i32
  }
  func.func @transform_5(%arg0: i32, %arg1: i32) -> (i32, i32) {
    %c0_i32 = arith.constant 0 : i32
    %c0_i32_0 = arith.constant 0 : i32
    %c0_i32_1 = arith.constant 0 : i32
    return %c0_i32, %c0_i32_0 : i32, i32
  }
  func.func @transform_6(%arg0: i32, %arg1: i32) -> (i32, i32) {
    %c0_i32 = arith.constant 0 : i32
    %c0_i32_0 = arith.constant 0 : i32
    %c0_i32_1 = arith.constant 0 : i32
    return %c0_i32, %c0_i32_0 : i32, i32
  }
  func.func @transform_7(%arg0: i32, %arg1: i32) -> (i32, i32) {
    %c0_i32 = arith.constant 0 : i32
    %c0_i32_0 = arith.constant 0 : i32
    %c0_i32_1 = arith.constant 0 : i32
    return %c0_i32, %c0_i32_0 : i32, i32
  }
  func.func @transform_8(%arg0: i32, %arg1: i32) -> (i32, i32) {
    %c0_i32 = arith.constant 0 : i32
    %c0_i32_0 = arith.constant 0 : i32
    %c0_i32_1 = arith.constant 0 : i32
    return %c0_i32, %c0_i32_0 : i32, i32
  }
  func.func @transform_9(%arg0: i32, %arg1: i32) -> (i32, i32, i32, i32) {
    %c0_i32 = arith.constant 0 : i32
    %c0_i32_0 = arith.constant 0 : i32
    %c0_i32_1 = arith.constant 0 : i32
    return %arg0, %arg1, %c0_i32, %c0_i32_0 : i32, i32, i32, i32
  }
}

</mosaic_0001>

<bundles_post_ra>
// kernel: block_c_forward.1
= control target key start
LH: loop header
LB: loop body
LE: loop exit
PB: predicated region body
PF: predicated region fallthrough
CT: control target
= control target key end

     0   :  { %14 = vsyncpa [#allocation4], 0  ;;  %s6148_s0 = inlined_call_operand.vmem [shape: f32[2,16,16,128], index: 0, kind: input, shape index: {}]   ;;  %s6149_s1 = inlined_call_operand.vmem [shape: f32[2,2,16,128], index: 1, kind: input, shape index: {}]   ;;  %s6150_s2 = inlined_call_operand.vmem [shape: bf16[128,64], index: 2, kind: input, shape index: {}]   ;;  %s6151_s3 = inlined_call_operand.vmem [shape: f32[3,64], index: 3, kind: input, shape index: {}]   ;;  %s6152_s4 = inlined_call_operand.vmem [shape: bf16[2,64,128], index: 4, kind: input, shape index: {}]   ;;  %s6153_s5 = inlined_call_operand.vmem [shape: bf16[64,640], index: 5, kind: input, shape index: {}]   ;;  %s6154_s6 = inlined_call_operand.vmem [shape: f32[3,128], index: 6, kind: input, shape index: {}]   ;;  %s6155_s7 = inlined_call_operand.vmem [shape: f32[3,128], index: 7, kind: input, shape index: {}]   ;;  %s6156_s8 = inlined_call_operand.vmem [shape: f32[3,128], index: 8, kind: input, shape index: {}]   ;;  %s6157_s9 = inlined_call_operand.hbm [shape: f32[2,16,16,512], index: 9, kind: output, shape index: {}]  }
   0x1   :  { %16 = vsyncpa [#allocation4 + $0x1], 0  ;;  %s4379_s30 = smov 0   ;;  %s4381_s10 = smov 0  }
   0x2   :  { %s4383_s11 = smov 0   ;;  %s4385_s12 = smov 0  }
   0x3   :  { %s4387_s13 = smov 0   ;;  %s4389_s14 = smov 0  }
   0x4 LB: > { %s3545_s15 = sadd.s32 4294967295, %s4323_s14   ;;  %s3546_s16 = sadd.s32 4294967294, %s4323_s14   ;;  %s4323_s14 = sphi %s4389_s14, %s22_s14   ;;  %s4319_s13 = sphi %s4387_s13, %s6203_s13   ;;  %s4315_s12 = sphi %s4385_s12, %s6202_s12   ;;  %s4311_s11 = sphi %s4383_s11, %s6201_s11   ;;  %s4307_s10 = sphi %s4381_s10, %s6200_s10   ;;  %s4303_s30 = sphi %s4379_s30, %s6199_s30  }
   0x5   : > { %s34_s17 = sadd.s32 1, %s4319_s13  ;;  %s246_s18 = sadd.s32 1, %s4311_s11 }
   0x6   : > { %p36_p0 = scmp.ge.s32.totalorder %s34_s17, 2  ;;  %p256_p1 = scmp.ne.s32.totalorder %s4311_s11, %s4307_s10 }
   0x7   : > { %p257_p2 = scmp.eq.s32.totalorder %s3545_s15, 1  ;;  %p262_p3 = scmp.ne.s32.totalorder %s4307_s10, %s4303_s30 }
   0x8   : > { %s6205_s17 = smov (%p36_p0, %s34_s17), 0  ;;  %p263_p5 = scmp.eq.s32.totalorder %s3546_s16, 1 }
   0x9   : > { %6161 = sst [smem:[#allocation6_spill]] %s6205_s17  ;;  %p4419_p4 = por %p257_p2, %p256_p1 }
   0xa   : > { %s241_s20 = ssub.s32 %s4319_s13, %s6205_s17  ;;  %p3549_p6 = scmp.ge.s32.totalorder %s4323_s14, 1 }
   0xb   : > { %p244_p7 = scmp.eq.s32.totalorder %s241_s20, 0  ;;  %p4426_p8 = por %p263_p5, %p262_p3 }
   0xc   : > { %p326_p9 = scmp.lt.s32.totalorder %s4323_s14, 3 }
   0xd   : > { %s4432_s22 = scalar_select %p244_p7, %s4311_s11, %s246_s18  }
   0xe   : > { %p327_p10 = pnand %p3549_p6, %p326_p9 }
  0x10   : > { %330 = sbr.rel (%p327_p10) target bundleno = 726 (0x2d6), region = 56 }
  0x15   : > { %v4162_v0 = vld [vmem:[%s6150_s2 + $0x38] sm:$0xff]   ;;  %v4163_v1 = vld [vmem:[%s6150_s2 + $0x30] sm:$0xff]   ;;  %s6159_s27 = sand.u32 1, %s4307_s10   ;;  %p374_p11 = scmp.lt.s32.totalorder %s4315_s12, 1  ;;  %v4164_v2 = vld [vmem:[%s6150_s2 + $0x28] sm:$0xff]   ;;  %vm938_vm0 = vcmask 519168  }
  0x16   : > { %3908 = vmatprep.subr.bf16.mxu0 %v4162_v0  ;;  %s3550_s16 = sshll.u32 %s6159_s27, 10  ;;  %v4165_v3 = vld [vmem:[%s6150_s2 + $0x20] sm:$0xff]   ;;  %v4170_v4 = vld [vmem:[%s6150_s2 + $0x38] sm:$0xff]   ;;  %v4167_v22 = vld [vmem:[%s6150_s2 + $0x10] sm:$0xff]   ;;  %vm1276_vm1 = vcmask 523264   ;;  %s3813_s27 = sshll.u32 %s4315_s12, 14 }
  0x17   : > { %3909 = vmatpush3.bf16.msra.mxu0 %v4162_v0  ;;  %s4446_s15 = scalar_select %p374_p11, %s4315_s12, 1  ;;  %v4166_v8 = vld [vmem:[%s6150_s2 + $0x18] sm:$0xff]   ;;  %3956 = vmatprep.subr.bf16.mxu1 %v4170_v4  ;;  %v4171_v32 = vld [vmem:[%s6150_s2 + $0x30] sm:$0xff]   ;;  %v4168_v33 = vld [vmem:[%s6150_s2 + $0x8] sm:$0xff]  }
  0x18   : > { %3910 = vmatprep.subr.bf16.mxu0 %v4163_v1  ;;  %s4470_s20 = scalar_lea.vmem [#allocation3], %s3550_s16  ;;  %3957 = vmatpush3.bf16.msra.mxu1 %v4170_v4  ;;  %v4172_v38 = vld [vmem:[%s6150_s2 + $0x28] sm:$0xff]   ;;  %v4173_v39 = vld [vmem:[%s6150_s2 + $0x20] sm:$0xff]   ;;  %v4174_v45 = vld [vmem:[%s6150_s2 + $0x18] sm:$0xff]   ;;  %s6197_s12 = sand.u32 1, %s4307_s10  }
  0x19   : > { %s3775_s23 = sshll.u32 %s4446_s15, 8  ;;  %3958 = vmatprep.subr.bf16.mxu1 %v4171_v32  ;;  %s3776_s17 = sshll.u32 %s4446_s15, 5  ;;  %v4169_v40 = vld [vmem:[%s6150_s2] sm:$0xff]   ;;  %v4175_v47 = vld [vmem:[%s6150_s2 + $0x10] sm:$0xff]   ;;  %v4176_v52 = vld [vmem:[%s6150_s2 + $0x8] sm:$0xff]  }
  0x1a   : > { %s4457_s26 = scalar_lea.vmem %s6148_s0, %s3775_s23  ;;  %s4627_s29 = scalar_lea.vmem %s6149_s1, %s3776_s17  ;;  %v4177_v53 = vld [vmem:[%s6150_s2] sm:$0xff]  }
  0x1b   : > { %3911 = vmatpush3.bf16.msra.mxu0 %v4163_v1  ;;  %v393_v5 = vld [vmem:[%s4457_s26] sm:$0xff]  ;;  %v394_v6 = vld [vmem:[%s4457_s26 + $0x8] sm:$0xff]  ;;  %v4465_v7 = vld [vmem:[%s4457_s26 + $0x10] sm:$0xff]  ;;  %s3451_s17 = sshll.u32 %s4470_s20, 4  ;;  %s6094_s23 = scalar_lea.hbm %s6157_s9, %s3813_s27  ;;  %s6096_s17 = int_to_ptr.vmem [resolvable:$true] %s3451_s17 }
  0x1c   : > { %3912 = vmatprep.subr.bf16.mxu0 %v4164_v2  ;;  %425 = vst [vmem:[%s4470_s20] sm:$0xff] %v393_v5  ;;  %426 = vst [vmem:[%s4470_s20 + $0x20] sm:$0xff] %v394_v6  ;;  %v457_v9 = vpack.c.bf16 %v394_v6, %v393_v5  ;;  %v4475_v10 = vld [vmem:[%s4457_s26 + $0x18] sm:$0xff]  ;;  %v4480_v11 = vld [vmem:[%s4457_s26 + $0x20] sm:$0xff]  ;;  %3959 = vmatpush3.bf16.msra.mxu1 %v4171_v32  ;;  %s6103_s24 = scalar_lea.sflag [#allocation4], %s6197_s12  ;;  %s4247_s25 = scalar_lea.vmem %s6096_s17, 16384 }
  0x1d   : > { %427 = vst [vmem:[%s4470_s20 + $0x40] sm:$0xff] %v4465_v7  ;;  %v4483_v12 = vld [vmem:[%s4457_s26 + $0x28] sm:$0xff]  ;;  %428 = vst [vmem:[%s4470_s20 + $0x60] sm:$0xff] %v4475_v10  ;;  %v4492_v13 = vld [vmem:[%s4457_s26 + $0x30] sm:$0xff]  ;;  %3960 = vmatprep.subr.bf16.mxu1 %v4172_v38  ;;  %v458_v50 = vpack.c.bf16 %v4475_v10, %v4465_v7  ;;  %p4248_p12 = scmp.ne.s32.totalorder %s6096_s17, %s4247_s25  ;;  %s4326_s28 = smov [#allocation3]  }
  0x1e   : > { %429 = vst [vmem:[%s4470_s20 + $0x80] sm:$0xff] %v4480_v11  ;;  %430 = vst [vmem:[%s4470_s20 + $0xa0] sm:$0xff] %v4483_v12  ;;  %v4495_v14 = vld [vmem:[%s4457_s26 + $0x38] sm:$0xff]  ;;  %v4498_v15 = vld [vmem:[%s4457_s26 + $0x40] sm:$0xff]  ;;  %3924 = vmatprep.mubr.bf16.mxu0 %v457_v9  ;;  %v459_v51 = vpack.c.bf16 %v4483_v12, %v4480_v11 }
  0x1f   : > { %3913 = vmatpush3.bf16.msra.mxu0 %v4164_v2  ;;  %431 = vst [vmem:[%s4470_s20 + $0xc0] sm:$0xff] %v4492_v13  ;;  %432 = vst [vmem:[%s4470_s20 + $0xe0] sm:$0xff] %v4495_v14  ;;  %v4505_v16 = vld [vmem:[%s4457_s26 + $0x48] sm:$0xff]  ;;  %v4510_v17 = vld [vmem:[%s4457_s26 + $0x50] sm:$0xff]  ;;  %v460_v54 = vpack.c.bf16 %v4495_v14, %v4492_v13  ;;  %p4249_p13 = pnand %p4248_p12, %p4419_p4 }
  0x20   : > { %3914 = vmatprep.subr.bf16.mxu0 %v4165_v3  ;;  %433 = vst [vmem:[%s4470_s20 + $0x100] sm:$0xff] %v4498_v15  ;;  %v4513_v18 = vld [vmem:[%s4457_s26 + $0x58] sm:$0xff]  ;;  %434 = vst [vmem:[%s4470_s20 + $0x120] sm:$0xff] %v4505_v16  ;;  %v4522_v19 = vld [vmem:[%s4457_s26 + $0x60] sm:$0xff]  ;;  %3961 = vmatpush3.bf16.msra.mxu1 %v4172_v38  ;;  %v461_v57 = vpack.c.bf16 %v4505_v16, %v4498_v15 }
  0x21   : > { %435 = vst [vmem:[%s4470_s20 + $0x140] sm:$0xff] %v4510_v17  ;;  %436 = vst [vmem:[%s4470_s20 + $0x160] sm:$0xff] %v4513_v18  ;;  %v4525_v20 = vld [vmem:[%s4457_s26 + $0x68] sm:$0xff]  ;;  %v4528_v21 = vld [vmem:[%s4457_s26 + $0x70] sm:$0xff]  ;;  %3962 = vmatprep.subr.bf16.mxu1 %v4173_v39  ;;  %v462_v59 = vpack.c.bf16 %v4513_v18, %v4510_v17  ;;  %p4250_p0 = pneg %p4249_p13 }
  0x22   : > { %437 = vst [vmem:[%s4470_s20 + $0x180] sm:$0xff] %v4522_v19  ;;  %438 = vst [vmem:[%s4470_s20 + $0x1a0] sm:$0xff] %v4525_v20  ;;  %v4538_v23 = vld [vmem:[%s4457_s26 + $0x78] sm:$0xff]  ;;  %v4543_v24 = vld [vmem:[%s4457_s26 + $0x80] sm:$0xff]  ;;  %v463_v60 = vpack.c.bf16 %v4525_v20, %v4522_v19 }
  0x23   : > { %439 = vst [vmem:[%s4470_s20 + $0x1c0] sm:$0xff] %v4528_v21  ;;  %v4546_v25 = vld [vmem:[%s4457_s26 + $0x88] sm:$0xff]  ;;  %3915 = vmatpush3.bf16.msra.mxu0 %v4165_v3  ;;  %440 = vst [vmem:[%s4470_s20 + $0x1e0] sm:$0xff] %v4538_v23  ;;  %v4555_v26 = vld [vmem:[%s4457_s26 + $0x90] sm:$0xff]  ;;  %v464_v61 = vpack.c.bf16 %v4538_v23, %v4528_v21 }
  0x24   : > { %441 = vst [vmem:[%s4470_s20 + $0x200] sm:$0xff] %v4543_v24  ;;  %442 = vst [vmem:[%s4470_s20 + $0x220] sm:$0xff] %v4546_v25  ;;  %v4558_v27 = vld [vmem:[%s4457_s26 + $0x98] sm:$0xff]  ;;  %v4561_v28 = vld [vmem:[%s4457_s26 + $0xa0] sm:$0xff]  ;;  %3916 = vmatprep.subr.bf16.mxu0 %v4166_v8  ;;  %3963 = vmatpush3.bf16.msra.mxu1 %v4173_v39  ;;  %v465_v62 = vpack.c.bf16 %v4546_v25, %v4543_v24 }
  0x25   : > { %443 = vst [vmem:[%s4470_s20 + $0x240] sm:$0xff] %v4555_v26  ;;  %444 = vst [vmem:[%s4470_s20 + $0x260] sm:$0xff] %v4558_v27  ;;  %v4568_v29 = vld [vmem:[%s4457_s26 + $0xa8] sm:$0xff]  ;;  %v4573_v30 = vld [vmem:[%s4457_s26 + $0xb0] sm:$0xff]  ;;  %3964 = vmatprep.subr.bf16.mxu1 %v4174_v45  ;;  %v466_v63 = vpack.c.bf16 %v4558_v27, %v4555_v26 }
  0x26   : > { %445 = vst [vmem:[%s4470_s20 + $0x280] sm:$0xff] %v4561_v28  ;;  %v4576_v31 = vld [vmem:[%s4457_s26 + $0xb8] sm:$0xff]  ;;  %446 = vst [vmem:[%s4470_s20 + $0x2a0] sm:$0xff] %v4568_v29  ;;  %v4591_v34 = vld [vmem:[%s4457_s26 + $0xc0] sm:$0xff]  ;;  %v467_v0 = vpack.c.bf16 %v4568_v29, %v4561_v28 }
  0x27   : > { %447 = vst [vmem:[%s4470_s20 + $0x2c0] sm:$0xff] %v4573_v30  ;;  %448 = vst [vmem:[%s4470_s20 + $0x2e0] sm:$0xff] %v4576_v31  ;;  %v4594_v35 = vld [vmem:[%s4457_s26 + $0xc8] sm:$0xff]  ;;  %v4597_v36 = vld [vmem:[%s4457_s26 + $0xd0] sm:$0xff]  ;;  %3917 = vmatpush3.bf16.msra.mxu0 %v4166_v8  ;;  %v468_v1 = vpack.c.bf16 %v4576_v31, %v4573_v30 }
  0x28   : > { %449 = vst [vmem:[%s4470_s20 + $0x300] sm:$0xff] %v4591_v34  ;;  %450 = vst [vmem:[%s4470_s20 + $0x320] sm:$0xff] %v4594_v35  ;;  %v4604_v37 = vld [vmem:[%s4457_s26 + $0xd8] sm:$0xff]  ;;  %3918 = vmatprep.subr.bf16.mxu0 %v4167_v22  ;;  %v4621_v41 = vld [vmem:[%s4457_s26 + $0xe0] sm:$0xff]  ;;  %3965 = vmatpush3.bf16.msra.mxu1 %v4174_v45  ;;  %v469_v2 = vpack.c.bf16 %v4594_v35, %v4591_v34 }
  0x29   : > { %451 = vst [vmem:[%s4470_s20 + $0x340] sm:$0xff] %v4597_v36  ;;  %452 = vst [vmem:[%s4470_s20 + $0x360] sm:$0xff] %v4604_v37  ;;  %v422_v42 = vld [vmem:[%s4457_s26 + $0xe8] sm:$0xff]  ;;  %v423_v43 = vld [vmem:[%s4457_s26 + $0xf0] sm:$0xff]  ;;  %3966 = vmatprep.subr.bf16.mxu1 %v4175_v47  ;;  %v470_v3 = vpack.c.bf16 %v4604_v37, %v4597_v36 }
  0x2a   : > { %453 = vst [vmem:[%s4470_s20 + $0x380] sm:$0xff] %v4621_v41  ;;  %454 = vst [vmem:[%s4470_s20 + $0x3a0] sm:$0xff] %v422_v42  ;;  %v424_v44 = vld [vmem:[%s4457_s26 + $0xf8] sm:$0xff]  ;;  %v971_v46 = vld [vmem:[%s4627_s29] sm:$0xff]  ;;  %v471_v4 = vpack.c.bf16 %v422_v42, %v4621_v41 }
  0x2b   : > { %3919 = vmatpush3.bf16.msra.mxu0 %v4167_v22  ;;  %455 = vst [vmem:[%s4470_s20 + $0x3c0] sm:$0xff] %v423_v43  ;;  %456 = vst [vmem:[%s4470_s20 + $0x3e0] sm:$0xff] %v424_v44  ;;  %v972_v48 = vld [vmem:[%s4627_s29 + $0x8] sm:$0xff]  ;;  %v973_v55 = vld [vmem:[%s4627_s29 + $0x10] sm:$0xff]  ;;  %v472_v5 = vpack.c.bf16 %v424_v44, %v423_v43  ;;  %v4325_v22 = vmov 0  }
  0x2c   : > { %3920 = vmatprep.subr.bf16.mxu0 %v4168_v33  ;;  %v975_v49 = vpack.c.bf16 %v972_v48, %v971_v46  ;;  %3967 = vmatpush3.bf16.msra.mxu1 %v4175_v47  ;;  %v974_v56 = vld [vmem:[%s4627_s29 + $0x18] sm:$0xff]  ;;  %v4181_v9 = vld [vmem:[%s6153_s5 + $0x80] ss:$20 sps:$4 sm:$0xff]   ;;  %v4184_v12 = vld [vmem:[%s6153_s5 + $0x50] ss:$20 sps:$4 sm:$0xff]   ;;  %s4251_s29 = sshll.u32 %s4326_s28, 4  ;;  %s4252_s29 = int_to_ptr.vmem [resolvable:$false] %s4251_s29 }
  0x2d   : > { %3968 = vmatprep.subr.bf16.mxu1 %v4176_v52  ;;  %v976_v58 = vpack.c.bf16 %v974_v56, %v973_v55  ;;  %v4180_v6 = vld [vmem:[%s6153_s5 + $0x7c] ss:$20 sps:$4 sm:$0xff]   ;;  %v4183_v7 = vld [vmem:[%s6153_s5 + $0x84] ss:$20 sps:$4 sm:$0xff]   ;;  %v4186_v10 = vld [vmem:[%s6153_s5 + $0x54] ss:$20 sps:$4 sm:$0xff]   ;;  %p4254_p1 = scmp.lt.s32.totalorder %s6096_s17, %s4252_s29 }
  0x2e   : > { %3972 = vmatprep.mubr.bf16.mxu1 %v975_v49  ;;  %v4178_v8 = vld [vmem:[%s6153_s5 + $0x78] ss:$20 sps:$4 sm:$0xff]   ;;  %v4189_v11 = vld [vmem:[%s6153_s5 + $0x5c] ss:$20 sps:$4 sm:$0xff]   ;;  %v4195_v15 = vld [vmem:[%s6153_s5 + $0x34] ss:$20 sps:$4 sm:$0xff]  }
  0x2f   : > { %3921 = vmatpush3.bf16.msra.mxu0 %v4168_v33  ;;  %v4187_v13 = vld [vmem:[%s6153_s5 + $0x58] ss:$20 sps:$4 sm:$0xff]   ;;  %v4190_v16 = vld [vmem:[%s6153_s5 + $0x28] ss:$20 sps:$4 sm:$0xff]   ;;  %v4193_v17 = vld [vmem:[%s6153_s5 + $0x30] ss:$20 sps:$4 sm:$0xff]  }
  0x30   : > { %3922 = vmatprep.subr.bf16.mxu0 %v4169_v40  ;;  %3969 = vmatpush3.bf16.msra.mxu1 %v4176_v52  ;;  %v4192_v14 = vld [vmem:[%s6153_s5 + $0x2c] ss:$20 sps:$4 sm:$0xff]   ;;  %v4198_v18 = vld [vmem:[%s6153_s5 + $0x4] ss:$20 sps:$4 sm:$0xff]   ;;  %v4199_v21 = vld [vmem:[%s6153_s5 + $0x8] ss:$20 sps:$4 sm:$0xff]  }
  0x31   : > { %3970 = vmatprep.subr.bf16.mxu1 %v4177_v53  ;;  %v4201_v19 = vld [vmem:[%s6153_s5 + $0xc] ss:$20 sps:$4 sm:$0xff]   ;;  %v4732_v23 = vld [vmem:[%s6153_s5 + $0x88] ss:$20 sps:$4 sm:$0xff]   ;;  %s4253_s15 = scalar_lea.vmem %s4252_s29, 32768 }
  0x32   : > { %v4196_v20 = vld [vmem:[%s6153_s5] ss:$20 sps:$4 sm:$0xff]   ;;  %v4738_v24 = vld [vmem:[%s6152_s4 + $0x18] sm:$0xff]   ;;  %p4255_p2 = scmp.lt.s32.totalorder %s4253_s15, %s4247_s25 }
  0x33   : > { %3923 = vmatpush3.bf16.msra.mxu0 %v4169_v40  ;;  %v4744_v25 = vld [vmem:[%s6151_s3] ss:$0 sm:$0xff]  ;;  %v4750_v28 = vld [vmem:[%s6151_s3 + $0x1] ss:$0 sm:$0xff]  ;;  %v4756_v32 = vld [vmem:[%s6151_s3 + $0x2] ss:$0 sm:$0xff] }
  0x34   : > { %3971 = vmatpush3.bf16.msra.mxu1 %v4177_v53  ;;  %1526 = vmatprep.subr.bf16.mxu0 %v4183_v7  ;;  %p4256_p3 = por %p4255_p2, %p4254_p1 }
  0x35   : > { %1333 = vmatprep.subr.bf16.mxu1 %v4180_v6 }
  0x36   : > { %3925 = vmatmul.mubr.bf16.vlgmr.msra.gmra.mxu0 %v458_v50  ;;  %p4257_p5 = pnand %p4256_p3, %p4250_p0 }
  0x37   : > { %3928 = vmatprep.mubr.bf16.mxu0 %v459_v51  ;;  %3973 = vmatmul.mubr.bf16.vlgmr.msra.gmra.mxu1 %v976_v58 }
  0x38   : > { %1334 = vmatpush1.bf16.msra.mxu1 %v4178_v8  ;;  %1527 = vmatpush1.bf16.msra.mxu0 %v4181_v9 }
  0x39   : > { %1335 = vmatprep.subr.bf16.mxu1 %v4186_v10  ;;  %1528 = vmatprep.subr.bf16.mxu0 %v4189_v11 }
  0x3a   : > { %1357 = vmatprep.mubr.bf16.mxu1 %v4325_v22 }
  0x3c   : > { %1336 = vmatpush1.bf16.msra.mxu1 %v4184_v12  ;;  %1529 = vmatpush1.bf16.msra.mxu0 %v4187_v13  ;;  %v4206_v13 = vld [vmem:[%s6152_s4 + $0x10] sm:$0xff]  }
  0x3d   : > { %1337 = vmatprep.subr.bf16.mxu1 %v4192_v14  ;;  %1530 = vmatprep.subr.bf16.mxu0 %v4195_v15 }
  0x3e   : > { %3929 = vmatmul.mubr.bf16.gmra.mxu0 %v460_v54 }
  0x3f   : > { %3932 = vmatprep.mubr.bf16.mxu0 %v461_v57 }
  0x40   : > { %1338 = vmatpush1.bf16.msra.mxu1 %v4190_v16  ;;  %1531 = vmatpush1.bf16.msra.mxu0 %v4193_v17 }
  0x41   : > { %1339 = vmatprep.subr.bf16.mxu1 %v4198_v18  ;;  %1532 = vmatprep.subr.bf16.mxu0 %v4201_v19 }
  0x44   : > { %1340 = vmatpush1.bf16.msra.mxu1 %v4196_v20  ;;  %1533 = vmatpush1.bf16.msra.mxu0 %v4199_v21 }
  0x45   : > { %3976 = vmatprep.subr.bf16.mxu1 %v4732_v23  ;;  %4016 = vmatprep.subr.bf16.mxu0 %v4738_v24 }
  0x46   : > { %3933 = vmatmul.mubr.bf16.gmra.mxu0 %v462_v59 }
  0x47   : > { %3936 = vmatprep.mubr.bf16.mxu0 %v463_v60 }
  0x4e   : > { %3937 = vmatmul.mubr.bf16.gmra.mxu0 %v464_v61 }
  0x4f   : > { %3940 = vmatprep.mubr.bf16.mxu0 %v465_v62 }
  0x56   : > { %3941 = vmatmul.mubr.bf16.gmra.mxu0 %v466_v63 }
  0x57   : > { %3944 = vmatprep.mubr.bf16.mxu0 %v467_v0 }
  0x5e   : > { %3945 = vmatmul.mubr.bf16.gmra.mxu0 %v468_v1 }
  0x5f   : > { %3948 = vmatprep.mubr.bf16.mxu0 %v469_v2 }
  0x66   : > { %3949 = vmatmul.mubr.bf16.gmra.mxu0 %v470_v3  ;;  %v4203_v3 = vld [vmem:[%s6153_s5 + $0x60] ss:$20 sps:$4 sm:$0xff]  }
  0x67   : > { %3952 = vmatprep.mubr.bf16.mxu0 %v471_v4 }
  0x6e   : > { %3953 = vmatmul.mubr.bf16.gmra.mxu0 %v472_v5 }
  0x6f   : > { %1550 = vmatprep.mubr.bf16.mxu0 %v4325_v22 }
  0xf6   : > { %v3926_v26 = vpop.f32.mrf.mxu0 }
  0xf7   : > { %v585_v27 = vadd.f32 %v3926_v26, %v4744_v25  ;;  %v3974_v58 = vpop.f32.mrf.mxu1 }
  0xf8   : > { %v576_v29 = vpop.f32.mrf.mxu0  ;;  %v1089_v62 = vadd.f32 %v3974_v58, %v4744_v25 }
  0xf9   : > { %v705_v30 = vmax.f32 %v585_v27, 0.0  ;;  %v577_v31 = vadd.f32 %v4744_v25, %v576_v29  ;;  %v1080_v4 = vpop.f32.mrf.mxu1 }
  0xfa   : > { %v3927_v33 = vpop.f32.mrf.mxu0  ;;  %v1097_v8 = vmax.f32 %v1089_v62, 0.0  ;;  %v1081_v9 = vadd.f32 %v4744_v25, %v1080_v4 }
  0xfb   : > { %v742_v34 = vmul.f32 %v4750_v28, %v705_v30  ;;  %v703_v35 = vmax.f32 %v577_v31, 0.0  ;;  %v588_v36 = vadd.f32 %v3927_v33, %v4744_v25  ;;  %v3975_v27 = vpop.f32.mrf.mxu1 }
  0xfc   : > { %v579_v37 = vpop.f32.mrf.mxu0  ;;  %v1106_v17 = vmul.f32 %v4750_v28, %v1097_v8  ;;  %v1095_v18 = vmax.f32 %v1081_v9, 0.0 }
  0xfd   : > { %v4761_v38 = vadd.f32 %v4756_v32, %v742_v34  ;;  %v740_v39 = vmul.f32 %v4750_v28, %v703_v35  ;;  %v706_v40 = vmax.f32 %v588_v36, 0.0  ;;  %v580_v41 = vadd.f32 %v4744_v25, %v579_v37 }
  0xfe   : > { %v3930_v42 = vpop.f32.mrf.mxu0  ;;  %v1115_v31 = vadd.f32 %v4756_v32, %v1106_v17  ;;  %v1104_v33 = vmul.f32 %v4750_v28, %v1095_v18  ;;  %v1092_v34 = vadd.f32 %v3975_v27, %v4744_v25 }
  0xff   : > { %v3779_v43 = vpack.c.bf16 %v4761_v38, %v4761_v38  ;;  %v777_v44 = vadd.f32 %v4756_v32, %v740_v39  ;;  %v743_v45 = vmul.f32 %v4750_v28, %v706_v40  ;;  %v704_v46 = vmax.f32 %v580_v41, 0.0 }
 0x100   : > { %v601_v47 = vadd.f32 %v3930_v42, %v4744_v25  ;;  %v592_v48 = vpop.f32.mrf.mxu0  ;;  %v1135_v42 = vmul.f32 0.0, %v1115_v31 }
 0x101   : > { %941 = vst.msk [vmem:[#allocation2 + $0x10] sm:$0xf] %vm938_vm0, %v3779_v43  ;;  %v3777_v49 = vpack.c.bf16 %v777_v44, %v777_v44  ;;  %v780_v50 = vadd.f32 %v4756_v32, %v743_v45  ;;  %v741_v51 = vmul.f32 %v4750_v28, %v704_v46  ;;  %v593_v52 = vadd.f32 %v4744_v25, %v592_v48 }
 0x102   : > { %v709_v53 = vmax.f32 %v601_v47, 0.0  ;;  %v3931_v54 = vpop.f32.mrf.mxu0  ;;  %v1113_v43 = vadd.f32 %v4756_v32, %v1104_v33 }
 0x103   : > { %939 = vst.msk [vmem:[#allocation2 + $0x8] sm:$0xf] %vm938_vm0, %v3777_v49  ;;  %v3780_v55 = vpack.c.bf16 %v780_v50, %v780_v50  ;;  %v778_v56 = vadd.f32 %v4756_v32, %v741_v51  ;;  %v707_v57 = vmax.f32 %v593_v52, 0.0  ;;  %v604_v60 = vadd.f32 %v3931_v54, %v4744_v25 }
 0x104   : > { %v746_v59 = vmul.f32 %v4750_v28, %v709_v53  ;;  %v595_v61 = vpop.f32.mrf.mxu0  ;;  %v4832_v40 = vpack.c.bf16 %v780_v50, %v4761_v38  ;;  %v1083_v38 = vpop.f32.mrf.mxu1  ;;  %v4207_v50 = vld [vmem:[%s6153_s5 + $0x10] ss:$20 sps:$4 sm:$0xff]   ;;  %v3811_v51 = vpack.c.bf16 %v1135_v42, %v1135_v42  ;;  %v1122_v52 = vmul.f32 0.0, %v1113_v43  ;;  %v4208_v53 = vld [vmem:[%s6152_s4 + $0x8] sm:$0xff]  }
 0x105   : > { %942 = vst.msk [vmem:[#allocation2 + $0x14] sm:$0xf] %vm938_vm0, %v3780_v55  ;;  %v4780_v63 = vpack.c.bf16 %v778_v56, %v777_v44  ;;  %v3778_v0 = vpack.c.bf16 %v778_v56, %v778_v56  ;;  %v744_v1 = vmul.f32 %v4750_v28, %v707_v57  ;;  %v596_v2 = vadd.f32 %v4744_v25, %v595_v61 }
 0x106   : > { %v4788_v5 = vadd.f32 %v4756_v32, %v746_v59  ;;  %v710_v6 = vmax.f32 %v604_v60, 0.0  ;;  %v3934_v7 = vpop.f32.mrf.mxu0  ;;  %v1098_v57 = vmax.f32 %v1092_v34, 0.0  ;;  %1146 = vst.msk [vmem:[#allocation2 + $0x88] sm:$0xf] %vm938_vm0, %v3811_v51  ;;  %v3809_v61 = vpack.c.bf16 %v1122_v52, %v1122_v52 }
 0x107   : > { %940 = vst.msk [vmem:[#allocation2 + $0xc] sm:$0xf] %vm938_vm0, %v3778_v0  ;;  %v4793_v10 = vadd.f32 %v4756_v32, %v744_v1  ;;  %v708_v11 = vmax.f32 %v596_v2, 0.0  ;;  %3633 = vmatmul.mubr.msk.bf16.vlgmr.msra.gmra.mxu1 %vm1276_vm1, %v4780_v63  ;;  %3649 = vmatmul.mubr.msk.bf16.vlgmr.msra.gmra.mxu0 %vm1276_vm1, %v4780_v63  ;;  %v617_v12 = vadd.f32 %v3934_v7, %v4744_v25  ;;  %v4209_v0 = vld [vmem:[%s6152_s4] sm:$0xff]  }
 0x108   : > { %v3783_v14 = vpack.c.bf16 %v4788_v5, %v4788_v5  ;;  %v747_v15 = vmul.f32 %v4750_v28, %v710_v6  ;;  %3977 = vmatpush3.bf16.msra.mxu1 %v4732_v23  ;;  %1367 = vmatprep.mubr.bf16.mxu1 %v4325_v22  ;;  %v608_v16 = vpop.f32.mrf.mxu0  ;;  %v4205_v23 = vld [vmem:[%s6153_s5 + $0x38] ss:$20 sps:$4 sm:$0xff]   ;;  %v1084_v62 = vadd.f32 %v4744_v25, %v1083_v38 }
 0x109   : > { %v3781_v19 = vpack.c.bf16 %v4793_v10, %v4793_v10  ;;  %v745_v20 = vmul.f32 %v4750_v28, %v708_v11  ;;  %1560 = vmatprep.mubr.bf16.mxu0 %v4325_v22  ;;  %v713_v21 = vmax.f32 %v617_v12, 0.0  ;;  %v609_v26 = vadd.f32 %v4744_v25, %v608_v16  ;;  %3978 = vmatprep.subr.bf16.mxu1 %v4203_v3  ;;  %v4881_v6 = vld [vmem:[%s6152_s4 + $0x38] sm:$0xff]  }
 0x10a   : > { %945 = vst.msk [vmem:[#allocation2 + $0x20] sm:$0xf] %vm938_vm0, %v3783_v14  ;;  %v4819_v29 = vadd.f32 %v4756_v32, %v747_v15  ;;  %v3935_v30 = vpop.f32.mrf.mxu0  ;;  %4017 = vmatpush3.bf16.msra.mxu0 %v4738_v24  ;;  %v1107_v4 = vmul.f32 %v4750_v28, %v1098_v57  ;;  %1132 = vst.msk [vmem:[#allocation2] sm:$0xf] %vm938_vm0, %v3809_v61  ;;  %v1096_v11 = vmax.f32 %v1084_v62, 0.0 }
 0x10b   : > { %943 = vst.msk [vmem:[#allocation2 + $0x18] sm:$0xf] %vm938_vm0, %v3781_v19  ;;  %v4827_v35 = vadd.f32 %v4756_v32, %v745_v20  ;;  %v750_v36 = vmul.f32 %v4750_v28, %v713_v21  ;;  %v711_v37 = vmax.f32 %v609_v26, 0.0  ;;  %v620_v39 = vadd.f32 %v3935_v30, %v4744_v25  ;;  %4018 = vmatprep.subr.bf16.mxu0 %v4206_v13 }
 0x10c   : > { %v3784_v24 = vpack.c.bf16 %v4819_v29, %v4819_v29  ;;  %v611_v41 = vpop.f32.mrf.mxu0  ;;  %3979 = vmatpush3.bf16.msra.mxu1 %v4203_v3  ;;  %v1116_v18 = vadd.f32 %v4756_v32, %v1107_v4  ;;  %v1105_v19 = vmul.f32 %v4750_v28, %v1096_v11  ;;  %v4943_v57 = vpack.c.bf16 %v4819_v29, %v4788_v5 }
 0x10d   : > { %v3782_v44 = vpack.c.bf16 %v4827_v35, %v4827_v35  ;;  %v4840_v45 = vadd.f32 %v4756_v32, %v750_v36  ;;  %v748_v46 = vmul.f32 %v4750_v28, %v711_v37  ;;  %v714_v47 = vmax.f32 %v620_v39, 0.0  ;;  %3980 = vmatprep.subr.bf16.mxu1 %v4205_v23 }
 0x10e   : > { %946 = vst.msk [vmem:[#allocation2 + $0x24] sm:$0xf] %vm938_vm0, %v3784_v24  ;;  %v612_v48 = vadd.f32 %v4744_v25, %v611_v41  ;;  %v3938_v49 = vpop.f32.mrf.mxu0  ;;  %4019 = vmatpush3.bf16.msra.mxu0 %v4206_v13  ;;  %v4898_v20 = vpack.c.bf16 %v4827_v35, %v4793_v10  ;;  %v1136_v33 = vmul.f32 0.0, %v1116_v18  ;;  %v1114_v41 = vadd.f32 %v4756_v32, %v1105_v19 }
 0x10f   : > { %944 = vst.msk [vmem:[#allocation2 + $0x1c] sm:$0xf] %vm938_vm0, %v3782_v44  ;;  %3634 = vmatmul.mubr.msk.bf16.gmra.mxu1 %vm1276_vm1, %v4832_v40  ;;  %3650 = vmatmul.mubr.msk.bf16.gmra.mxu0 %vm1276_vm1, %v4832_v40  ;;  %v3787_v54 = vpack.c.bf16 %v4840_v45, %v4840_v45  ;;  %v4859_v55 = vadd.f32 %v4756_v32, %v748_v46 }
 0x110   : > { %v751_v56 = vmul.f32 %v4750_v28, %v714_v47  ;;  %v712_v58 = vmax.f32 %v612_v48, 0.0  ;;  %1377 = vmatprep.mubr.bf16.mxu1 %v4325_v22  ;;  %1570 = vmatprep.mubr.bf16.mxu0 %v4325_v22  ;;  %v633_v59 = vadd.f32 %v3938_v49, %v4744_v25  ;;  %v624_v60 = vpop.f32.mrf.mxu0  ;;  %v3812_v24 = vpack.c.bf16 %v1136_v33, %v1136_v33 }
 0x111   : > { %949 = vst.msk [vmem:[#allocation2 + $0x30] sm:$0xf] %vm938_vm0, %v3787_v54  ;;  %v3785_v1 = vpack.c.bf16 %v4859_v55, %v4859_v55  ;;  %v625_v3 = vadd.f32 %v4744_v25, %v624_v60  ;;  %3981 = vmatpush3.bf16.msra.mxu1 %v4205_v23  ;;  %4020 = vmatprep.subr.bf16.mxu0 %v4208_v53  ;;  %v1123_v48 = vmul.f32 0.0, %v1114_v41 }
 0x112   : > { %v4874_v2 = vadd.f32 %v4756_v32, %v751_v56  ;;  %v749_v7 = vmul.f32 %v4750_v28, %v712_v58  ;;  %v717_v8 = vmax.f32 %v633_v59, 0.0  ;;  %v3939_v9 = vpop.f32.mrf.mxu0  ;;  %3982 = vmatprep.subr.bf16.mxu1 %v4207_v50  ;;  %4021 = vmatpush3.bf16.msra.mxu0 %v4208_v53  ;;  %1147 = vst.msk [vmem:[#allocation2 + $0x8c] sm:$0xf] %vm938_vm0, %v3812_v24 }
 0x113   : > { %947 = vst.msk [vmem:[#allocation2 + $0x28] sm:$0xf] %vm938_vm0, %v3785_v1  ;;  %v715_v13 = vmax.f32 %v625_v3, 0.0  ;;  %v636_v14 = vadd.f32 %v3939_v9, %v4744_v25  ;;  %4022 = vmatprep.subr.bf16.mxu0 %v4209_v0  ;;  %v3810_v56 = vpack.c.bf16 %v1123_v48, %v1123_v48 }
 0x114   : > { %v3788_v12 = vpack.c.bf16 %v4874_v2, %v4874_v2  ;;  %v4890_v15 = vadd.f32 %v4756_v32, %v749_v7  ;;  %v754_v16 = vmul.f32 %v4750_v28, %v717_v8  ;;  %v627_v17 = vpop.f32.mrf.mxu0 }
 0x115   : > { %v752_v21 = vmul.f32 %v4750_v28, %v715_v13  ;;  %v718_v26 = vmax.f32 %v636_v14, 0.0  ;;  %v628_v23 = vadd.f32 %v4744_v25, %v627_v17  ;;  %3983 = vmatpush3.bf16.msra.mxu1 %v4207_v50  ;;  %1133 = vst.msk [vmem:[#allocation2 + $0x4] sm:$0xf] %vm938_vm0, %v3810_v56 }
 0x116   : > { %950 = vst.msk [vmem:[#allocation2 + $0x34] sm:$0xf] %vm938_vm0, %v3788_v12  ;;  %v3786_v27 = vpack.c.bf16 %v4890_v15, %v4890_v15  ;;  %v4905_v30 = vadd.f32 %v4756_v32, %v754_v16  ;;  %v3942_v31 = vpop.f32.mrf.mxu0  ;;  %4096 = vmatprep.subr.bf16.mxu1 %v4881_v6  ;;  %4023 = vmatpush3.bf16.msra.mxu0 %v4209_v0 }
 0x117   : > { %3635 = vmatmul.mubr.msk.bf16.gmra.mxu1 %vm1276_vm1, %v4898_v20  ;;  %3651 = vmatmul.mubr.msk.bf16.gmra.mxu0 %vm1276_vm1, %v4898_v20  ;;  %v4913_v10 = vadd.f32 %v4756_v32, %v752_v21  ;;  %v755_v34 = vmul.f32 %v4750_v28, %v718_v26  ;;  %v716_v35 = vmax.f32 %v628_v23, 0.0  ;;  %v649_v36 = vadd.f32 %v3942_v31, %v4744_v25 }
 0x118   : > { %948 = vst.msk [vmem:[#allocation2 + $0x2c] sm:$0xf] %vm938_vm0, %v3786_v27  ;;  %1387 = vmatprep.mubr.bf16.mxu1 %v4325_v22  ;;  %1580 = vmatprep.mubr.bf16.mxu0 %v4325_v22  ;;  %v3791_v37 = vpack.c.bf16 %v4905_v30, %v4905_v30  ;;  %v640_v39 = vpop.f32.mrf.mxu0  ;;  %v4983_v21 = vpack.c.bf16 %v4890_v15, %v4859_v55 }
 0x119   : > { %v3789_v42 = vpack.c.bf16 %v4913_v10, %v4913_v10  ;;  %v4926_v43 = vadd.f32 %v4756_v32, %v755_v34  ;;  %v753_v44 = vmul.f32 %v4750_v28, %v716_v35  ;;  %v721_v46 = vmax.f32 %v649_v36, 0.0  ;;  %4056 = vmatprep.subr.bf16.mxu0 %v4881_v6 }
 0x11a   : > { %953 = vst.msk [vmem:[#allocation2 + $0x40] sm:$0xf] %vm938_vm0, %v3791_v37  ;;  %v641_v47 = vadd.f32 %v4744_v25, %v640_v39  ;;  %v3943_v38 = vpop.f32.mrf.mxu0 }
 0x11b   : > { %951 = vst.msk [vmem:[#allocation2 + $0x38] sm:$0xf] %vm938_vm0, %v3789_v42  ;;  %v3792_v49 = vpack.c.bf16 %v4926_v43, %v4926_v43  ;;  %v4937_v50 = vadd.f32 %v4756_v32, %v753_v44  ;;  %v758_v51 = vmul.f32 %v4750_v28, %v721_v46  ;;  %v652_v53 = vadd.f32 %v3943_v38, %v4744_v25 }
 0x11c   : > { %v719_v52 = vmax.f32 %v641_v47, 0.0  ;;  %v643_v54 = vpop.f32.mrf.mxu0 }
 0x11d   : > { %954 = vst.msk [vmem:[#allocation2 + $0x44] sm:$0xf] %vm938_vm0, %v3792_v49  ;;  %v3790_v58 = vpack.c.bf16 %v4937_v50, %v4937_v50  ;;  %v4949_v59 = vadd.f32 %v4756_v32, %v758_v51  ;;  %v644_v60 = vadd.f32 %v4744_v25, %v643_v54  ;;  %v722_v62 = vmax.f32 %v652_v53, 0.0 }
 0x11e   : > { %v756_v61 = vmul.f32 %v4750_v28, %v719_v52  ;;  %v3946_v0 = vpop.f32.mrf.mxu0 }
 0x11f   : > { %3636 = vmatmul.mubr.msk.bf16.gmra.mxu1 %vm1276_vm1, %v4943_v57  ;;  %3652 = vmatmul.mubr.msk.bf16.gmra.mxu0 %vm1276_vm1, %v4943_v57  ;;  %952 = vst.msk [vmem:[#allocation2 + $0x3c] sm:$0xf] %vm938_vm0, %v3790_v58  ;;  %v3795_v5 = vpack.c.bf16 %v4949_v59, %v4949_v59  ;;  %v720_v29 = vmax.f32 %v644_v60, 0.0  ;;  %v665_v1 = vadd.f32 %v3946_v0, %v4744_v25 }
 0x120   : > { %1397 = vmatprep.mubr.bf16.mxu1 %v4325_v22  ;;  %1590 = vmatprep.mubr.bf16.mxu0 %v4325_v22  ;;  %v4965_v3 = vadd.f32 %v4756_v32, %v756_v61  ;;  %v759_v4 = vmul.f32 %v4750_v28, %v722_v62  ;;  %v656_v7 = vpop.f32.mrf.mxu0  ;;  %v5028_v58 = vpack.c.bf16 %v4874_v2, %v4840_v45 }
 0x121   : > { %957 = vst.msk [vmem:[#allocation2 + $0x50] sm:$0xf] %vm938_vm0, %v3795_v5  ;;  %v757_v8 = vmul.f32 %v4750_v28, %v720_v29  ;;  %v725_v9 = vmax.f32 %v665_v1, 0.0  ;;  %v657_v11 = vadd.f32 %v4744_v25, %v656_v7 }
 0x122   : > { %v3793_v12 = vpack.c.bf16 %v4965_v3, %v4965_v3  ;;  %v4974_v13 = vadd.f32 %v4756_v32, %v759_v4  ;;  %v3947_v14 = vpop.f32.mrf.mxu0 }
 0x123   : > { %v4977_v16 = vadd.f32 %v4756_v32, %v757_v8  ;;  %v762_v17 = vmul.f32 %v4750_v28, %v725_v9  ;;  %v723_v18 = vmax.f32 %v657_v11, 0.0  ;;  %v668_v19 = vadd.f32 %v3947_v14, %v4744_v25 }
 0x124   : > { %955 = vst.msk [vmem:[#allocation2 + $0x48] sm:$0xf] %vm938_vm0, %v3793_v12  ;;  %v3796_v26 = vpack.c.bf16 %v4974_v13, %v4974_v13  ;;  %v659_v23 = vpop.f32.mrf.mxu0 }
 0x125   : > { %v3794_v27 = vpack.c.bf16 %v4977_v16, %v4977_v16  ;;  %v4991_v31 = vadd.f32 %v4756_v32, %v762_v17  ;;  %v760_v33 = vmul.f32 %v4750_v28, %v723_v18  ;;  %v726_v34 = vmax.f32 %v668_v19, 0.0 }
 0x126   : > { %958 = vst.msk [vmem:[#allocation2 + $0x54] sm:$0xf] %vm938_vm0, %v3796_v26  ;;  %v660_v55 = vadd.f32 %v4744_v25, %v659_v23  ;;  %v3950_v15 = vpop.f32.mrf.mxu0 }
 0x127   : > { %3637 = vmatmul.mubr.msk.bf16.gmra.mxu1 %vm1276_vm1, %v4983_v21  ;;  %3653 = vmatmul.mubr.msk.bf16.gmra.mxu0 %vm1276_vm1, %v4983_v21  ;;  %956 = vst.msk [vmem:[#allocation2 + $0x4c] sm:$0xf] %vm938_vm0, %v3794_v27  ;;  %v3799_v35 = vpack.c.bf16 %v4991_v31, %v4991_v31  ;;  %v5004_v36 = vadd.f32 %v4756_v32, %v760_v33 }
 0x128   : > { %v763_v37 = vmul.f32 %v4750_v28, %v726_v34  ;;  %1407 = vmatprep.mubr.bf16.mxu1 %v4325_v22  ;;  %1600 = vmatprep.mubr.bf16.mxu0 %v4325_v22  ;;  %v724_v39 = vmax.f32 %v660_v55, 0.0  ;;  %v681_v24 = vadd.f32 %v3950_v15, %v4744_v25  ;;  %v672_v41 = vpop.f32.mrf.mxu0  ;;  %v5068_v55 = vpack.c.bf16 %v4937_v50, %v4913_v10 }
 0x129   : > { %961 = vst.msk [vmem:[#allocation2 + $0x60] sm:$0xf] %vm938_vm0, %v3799_v35  ;;  %v3797_v42 = vpack.c.bf16 %v5004_v36, %v5004_v36  ;;  %v673_v46 = vadd.f32 %v4744_v25, %v672_v41 }
 0x12a   : > { %v5014_v44 = vadd.f32 %v4756_v32, %v763_v37  ;;  %v761_v47 = vmul.f32 %v4750_v28, %v724_v39  ;;  %v729_v38 = vmax.f32 %v681_v24, 0.0  ;;  %v3951_v48 = vpop.f32.mrf.mxu0 }
 0x12b   : > { %959 = vst.msk [vmem:[#allocation2 + $0x58] sm:$0xf] %vm938_vm0, %v3797_v42  ;;  %v727_v51 = vmax.f32 %v673_v46, 0.0  ;;  %v684_v52 = vadd.f32 %v3951_v48, %v4744_v25 }
 0x12c   : > { %v3800_v49 = vpack.c.bf16 %v5014_v44, %v5014_v44  ;;  %v5023_v53 = vadd.f32 %v4756_v32, %v761_v47  ;;  %v766_v54 = vmul.f32 %v4750_v28, %v729_v38  ;;  %v675_v56 = vpop.f32.mrf.mxu0 }
 0x12d   : > { %v764_v60 = vmul.f32 %v4750_v28, %v727_v51  ;;  %v730_v61 = vmax.f32 %v684_v52, 0.0  ;;  %v676_v62 = vadd.f32 %v4744_v25, %v675_v56  ;;  %v5092_v51 = vpack.c.bf16 %v4926_v43, %v4905_v30  ;;  %v4223_v56 = vld [vmem:[#allocation2 + $0x50] sm:$0xff]  }
 0x12e   : > { %962 = vst.msk [vmem:[#allocation2 + $0x64] sm:$0xf] %vm938_vm0, %v3800_v49  ;;  %v3798_v0 = vpack.c.bf16 %v5023_v53, %v5023_v53  ;;  %v5036_v5 = vadd.f32 %v4756_v32, %v766_v54  ;;  %v3954_v29 = vpop.f32.mrf.mxu0  ;;  %v5124_v30 = vpack.c.bf16 %v5023_v53, %v5004_v36  ;;  %v5134_v43 = vpack.c.bf16 %v5014_v44, %v4991_v31  ;;  %v4212_v31 = vld [vmem:[#allocation2 + $0x8] sm:$0xff]   ;;  %v4216_v36 = vld [vmem:[%s6152_s4 + $0x30] sm:$0xff]   ;;  %v4215_v44 = vld [vmem:[#allocation2 + $0x20] sm:$0xff]  }
 0x12f   : > { %3638 = vmatmul.mubr.msk.bf16.gmra.mxu1 %vm1276_vm1, %v5028_v58  ;;  %3654 = vmatmul.mubr.msk.bf16.gmra.mxu0 %vm1276_vm1, %v5028_v58  ;;  %v5043_v45 = vadd.f32 %v4756_v32, %v764_v60  ;;  %v767_v2 = vmul.f32 %v4750_v28, %v730_v61  ;;  %v728_v1 = vmax.f32 %v676_v62, 0.0  ;;  %v697_v4 = vadd.f32 %v3954_v29, %v4744_v25  ;;  %v4226_v53 = vld [vmem:[%s6152_s4 + $0x20] sm:$0xff]   ;;  %v4222_v54 = vld [vmem:[#allocation2 + $0x48] sm:$0xff]  }
 0x130   : > { %1417 = vmatprep.mubr.bf16.mxu1 %v4325_v22  ;;  %1610 = vmatprep.mubr.bf16.mxu0 %v4325_v22  ;;  %960 = vst.msk [vmem:[#allocation2 + $0x5c] sm:$0xf] %vm938_vm0, %v3798_v0  ;;  %v3803_v7 = vpack.c.bf16 %v5036_v5, %v5036_v5  ;;  %v688_v8 = vpop.f32.mrf.mxu0  ;;  %v4231_v29 = vld [vmem:[#allocation2 + $0x20] sm:$0xff]  }
 0x131   : > { %v3801_v9 = vpack.c.bf16 %v5043_v45, %v5043_v45  ;;  %v5055_v11 = vadd.f32 %v4756_v32, %v767_v2  ;;  %v765_v12 = vmul.f32 %v4750_v28, %v728_v1  ;;  %v733_v14 = vmax.f32 %v697_v4, 0.0  ;;  %v4233_v2 = vld [vmem:[#allocation2 + $0x28] sm:$0xff]   ;;  %v4234_v4 = vld [vmem:[#allocation2 + $0x30] sm:$0xff]  }
 0x132   : > { %965 = vst.msk [vmem:[#allocation2 + $0x70] sm:$0xf] %vm938_vm0, %v3803_v7  ;;  %v689_v17 = vadd.f32 %v4744_v25, %v688_v8  ;;  %v3955_v18 = vpop.f32.mrf.mxu0  ;;  %v2644_v1 = vlaneseq }
 0x133   : > { %963 = vst.msk [vmem:[#allocation2 + $0x68] sm:$0xf] %vm938_vm0, %v3801_v9  ;;  %v3804_v19 = vpack.c.bf16 %v5055_v11, %v5055_v11  ;;  %v802_v26 = vadd.f32 %v4756_v32, %v765_v12  ;;  %v770_v23 = vmul.f32 %v4750_v28, %v733_v14  ;;  %v700_v33 = vadd.f32 %v3955_v18, %v4744_v25 }
 0x134   : > { %v731_v27 = vmax.f32 %v689_v17, 0.0  ;;  %v691_v34 = vpop.f32.mrf.mxu0  ;;  %v5245_v12 = vshrl.u32 %v2644_v1, 7 }
 0x135   : > { %966 = vst.msk [vmem:[#allocation2 + $0x74] sm:$0xf] %vm938_vm0, %v3804_v19  ;;  %v3802_v15 = vpack.c.bf16 %v802_v26, %v802_v26  ;;  %v807_v35 = vadd.f32 %v4756_v32, %v770_v23  ;;  %v692_v37 = vadd.f32 %v4744_v25, %v691_v34  ;;  %v734_v24 = vmax.f32 %v700_v33, 0.0  ;;  %v4225_v60 = vld [vmem:[#allocation2 + $0x60] sm:$0xff]  }
 0x136   : > { %v768_v39 = vmul.f32 %v4750_v28, %v731_v27  ;;  %vm2681_vm2 = vcmp.lt.s32.totalorder %v5245_v12, 1  ;;  %vm2780_vm3 = vcmp.lt.s32.totalorder %v5245_v12, 7  ;;  %v4236_v34 = vld [vmem:[#allocation2 + $0x40] sm:$0xff]   ;;  %vm2647_vm4 = vcmp.eq.s32.totalorder %v5245_v12, 0 }
 0x137   : > { %3639 = vmatmul.mubr.msk.bf16.gmra.mxu1 %vm1276_vm1, %v5068_v55  ;;  %3655 = vmatmul.mubr.msk.bf16.gmra.mxu0 %vm1276_vm1, %v5068_v55  ;;  %964 = vst.msk [vmem:[#allocation2 + $0x6c] sm:$0xf] %vm938_vm0, %v3802_v15  ;;  %v3807_v10 = vpack.c.bf16 %v807_v35, %v807_v35  ;;  %v732_v50 = vmax.f32 %v692_v37, 0.0  ;;  %v771_v25 = vmul.f32 %v4750_v28, %v734_v24 }
 0x138   : > { %1427 = vmatprep.mubr.bf16.mxu1 %v4325_v22  ;;  %1620 = vmatprep.mubr.bf16.mxu0 %v4325_v22  ;;  %v805_v41 = vadd.f32 %v4756_v32, %v768_v39 }
 0x139   : > { %969 = vst.msk [vmem:[#allocation2 + $0x80] sm:$0xf] %vm938_vm0, %v3807_v10  ;;  %v769_v42 = vmul.f32 %v4750_v28, %v732_v50  ;;  %v808_v47 = vadd.f32 %v4756_v32, %v771_v25  ;;  %v5104_v28 = vpack.c.bf16 %v4977_v16, %v4965_v3  ;;  %v5153_v3 = vpack.c.bf16 %v5055_v11, %v5036_v5  ;;  %v4210_v16 = vld [vmem:[#allocation2] sm:$0xff]   ;;  %v4230_v5 = vld [vmem:[#allocation2 + $0x10] sm:$0xff]  }
 0x13a   : > { %v3805_v46 = vpack.c.bf16 %v805_v41, %v805_v41 }
 0x13b   : > { %v806_v38 = vadd.f32 %v4756_v32, %v769_v42  ;;  %v5088_v48 = vpack.c.bf16 %v808_v47, %v807_v35  ;;  %v3808_v49 = vpack.c.bf16 %v808_v47, %v808_v47  ;;  %v5114_v32 = vpack.c.bf16 %v4974_v13, %v4949_v59 }
 0x13c   : > { %967 = vst.msk [vmem:[#allocation2 + $0x78] sm:$0xf] %vm938_vm0, %v3805_v46  ;;  %v5143_v59 = vpack.c.bf16 %v802_v26, %v5043_v45  ;;  %v4228_v62 = vld [vmem:[#allocation2 + $0x70] sm:$0xff]   ;;  %v4232_v45 = vld [vmem:[#allocation2 + $0x18] sm:$0xff]  }
 0x13d   : > { %v3806_v52 = vpack.c.bf16 %v806_v38, %v806_v38  ;;  %970 = vst.msk [vmem:[#allocation2 + $0x84] sm:$0xf] %vm938_vm0, %v3808_v49  ;;  %v5161_v13 = vpack.c.bf16 %v806_v38, %v805_v41  ;;  %v4235_v26 = vld [vmem:[#allocation2 + $0x38] sm:$0xff]  }
 0x13e   : > { %v4227_v61 = vld [vmem:[#allocation2 + $0x68] sm:$0xff]  }
 0x13f   : > { %3640 = vmatmul.mubr.msk.bf16.gmra.mxu1 %vm1276_vm1, %v5092_v51  ;;  %3656 = vmatmul.mubr.msk.bf16.gmra.mxu0 %vm1276_vm1, %v5092_v51  ;;  %968 = vst.msk [vmem:[#allocation2 + $0x7c] sm:$0xf] %vm938_vm0, %v3806_v52  ;;  %v5285_v52 = vld [vmem:[%s6155_s7] ss:$0 sm:$0xff] }
 0x140   : > { %1437 = vmatprep.mubr.bf16.mxu1 %v4325_v22  ;;  %1630 = vmatprep.mubr.bf16.mxu0 %v4325_v22 }
 0x146   : > { %v4229_v0 = vld [vmem:[#allocation2 + $0x78] sm:$0xff]  }
 0x147   : > { %3641 = vmatmul.mubr.msk.bf16.gmra.mxu1 %vm1276_vm1, %v5104_v28  ;;  %3657 = vmatmul.mubr.msk.bf16.gmra.mxu0 %vm1276_vm1, %v5104_v28 }
 0x148   : > { %1447 = vmatprep.mubr.bf16.mxu1 %v4325_v22  ;;  %1640 = vmatprep.mubr.bf16.mxu0 %v4325_v22 }
 0x14f   : > { %3642 = vmatmul.mubr.msk.bf16.gmra.mxu1 %vm1276_vm1, %v5114_v32  ;;  %3658 = vmatmul.mubr.msk.bf16.gmra.mxu0 %vm1276_vm1, %v5114_v32 }
 0x150   : > { %1457 = vmatprep.mubr.bf16.mxu1 %v4325_v22  ;;  %1650 = vmatprep.mubr.bf16.mxu0 %v4325_v22 }
 0x157   : > { %3643 = vmatmul.mubr.msk.bf16.gmra.mxu1 %vm1276_vm1, %v5124_v30  ;;  %3659 = vmatmul.mubr.msk.bf16.gmra.mxu0 %vm1276_vm1, %v5124_v30 }
 0x158   : > { %1467 = vmatprep.mubr.bf16.mxu1 %v4325_v22  ;;  %1660 = vmatprep.mubr.bf16.mxu0 %v4325_v22 }
 0x15f   : > { %3644 = vmatmul.mubr.msk.bf16.gmra.mxu1 %vm1276_vm1, %v5134_v43  ;;  %3660 = vmatmul.mubr.msk.bf16.gmra.mxu0 %vm1276_vm1, %v5134_v43 }
 0x160   : > { %1477 = vmatprep.mubr.bf16.mxu1 %v4325_v22  ;;  %1670 = vmatprep.mubr.bf16.mxu0 %v4325_v22 }
 0x167   : > { %3645 = vmatmul.mubr.msk.bf16.gmra.mxu1 %vm1276_vm1, %v5143_v59  ;;  %3661 = vmatmul.mubr.msk.bf16.gmra.mxu0 %vm1276_vm1, %v5143_v59 }
 0x168   : > { %1487 = vmatprep.mubr.bf16.mxu1 %v4325_v22  ;;  %1680 = vmatprep.mubr.bf16.mxu0 %v4325_v22 }
 0x16f   : > { %3646 = vmatmul.mubr.msk.bf16.gmra.mxu1 %vm1276_vm1, %v5153_v3  ;;  %3662 = vmatmul.mubr.msk.bf16.gmra.mxu0 %vm1276_vm1, %v5153_v3 }
 0x170   : > { %1497 = vmatprep.mubr.bf16.mxu1 %v4325_v22  ;;  %1690 = vmatprep.mubr.bf16.mxu0 %v4325_v22 }
 0x177   : > { %3647 = vmatmul.mubr.msk.bf16.gmra.mxu1 %vm1276_vm1, %v5161_v13  ;;  %3663 = vmatmul.mubr.msk.bf16.gmra.mxu0 %vm1276_vm1, %v5161_v13 }
 0x178   : > { %1507 = vmatprep.mubr.bf16.mxu1 %v4325_v22  ;;  %1700 = vmatprep.mubr.bf16.mxu0 %v4325_v22  ;;  %v4213_v22 = vld [vmem:[#allocation2 + $0x10] sm:$0xff]  }
 0x17f   : > { %3648 = vmatmul.mubr.msk.bf16.gmra.mxu1 %vm1276_vm1, %v5088_v48  ;;  %3664 = vmatmul.mubr.msk.bf16.gmra.mxu0 %vm1276_vm1, %v5088_v48 }
 0x180   : > { %3984 = vmatprep.mubr.msk.bf16.mxu1 %vm1276_vm1, %v4780_v63  ;;  %4024 = vmatprep.mubr.msk.bf16.mxu0 %vm1276_vm1, %v4210_v16  ;;  %v4221_v63 = vld [vmem:[%s6152_s4 + $0x28] sm:$0xff]   ;;  %v4238_v16 = vld [vmem:[#allocation2 + $0x50] sm:$0xff]  }
 0x187   : > { %3985 = vmatmul.mubr.msk.bf16.vlgmr.msra.gmra.mxu1 %vm1276_vm1, %v4832_v40  ;;  %4025 = vmatmul.mubr.msk.bf16.vlgmr.msra.gmra.mxu0 %vm1276_vm1, %v4212_v31  ;;  %v4214_v40 = vld [vmem:[#allocation2 + $0x18] sm:$0xff]  }
 0x188   : > { %4100 = vmatpush3.bf16.msra.mxu1 %v4881_v6  ;;  %3988 = vmatprep.mubr.msk.bf16.mxu1 %vm1276_vm1, %v4898_v20  ;;  %v4218_v20 = vld [vmem:[#allocation2 + $0x30] sm:$0xff]  }
 0x189   : > { %4028 = vmatprep.mubr.msk.bf16.mxu0 %vm1276_vm1, %v4213_v22  ;;  %4097 = vmatprep.subr.bf16.mxu1 %v4216_v36 }
 0x18a   : > { %4057 = vmatpush3.bf16.msra.mxu0 %v4881_v6  ;;  %v4217_v6 = vld [vmem:[#allocation2 + $0x28] sm:$0xff]  }
 0x18b   : > { %4058 = vmatprep.subr.bf16.mxu0 %v4216_v36 }
 0x18c   : > { %4101 = vmatpush3.bf16.msra.mxu1 %v4216_v36 }
 0x18d   : > { %4098 = vmatprep.subr.bf16.mxu1 %v4221_v63 }
 0x18e   : > { %4059 = vmatpush3.bf16.msra.mxu0 %v4216_v36 }
 0x18f   : > { %3989 = vmatmul.mubr.msk.bf16.gmra.mxu1 %vm1276_vm1, %v4943_v57  ;;  %4029 = vmatmul.mubr.msk.bf16.gmra.mxu0 %vm1276_vm1, %v4214_v40  ;;  %v4219_v57 = vld [vmem:[#allocation2 + $0x38] sm:$0xff]   ;;  %v5297_v40 = vld [vmem:[%s6155_s7 + $0x1] ss:$0 sm:$0xff] }
 0x190   : > { %3992 = vmatprep.mubr.msk.bf16.mxu1 %vm1276_vm1, %v4983_v21  ;;  %4032 = vmatprep.mubr.msk.bf16.mxu0 %vm1276_vm1, %v4215_v44  ;;  %v4220_v21 = vld [vmem:[#allocation2 + $0x40] sm:$0xff]  }
 0x191   : > { %4102 = vmatpush3.bf16.msra.mxu1 %v4221_v63  ;;  %4060 = vmatprep.subr.bf16.mxu0 %v4221_v63 }
 0x192   : > { %4099 = vmatprep.subr.bf16.mxu1 %v4226_v53  ;;  %4061 = vmatpush3.bf16.msra.mxu0 %v4221_v63 }
 0x193   : > { %4062 = vmatprep.subr.bf16.mxu0 %v4226_v53 }
 0x195   : > { %4103 = vmatpush3.bf16.msra.mxu1 %v4226_v53 }
 0x196   : > { %4063 = vmatpush3.bf16.msra.mxu0 %v4226_v53 }
 0x197   : > { %3993 = vmatmul.mubr.msk.bf16.gmra.mxu1 %vm1276_vm1, %v5028_v58  ;;  %4033 = vmatmul.mubr.msk.bf16.gmra.mxu0 %vm1276_vm1, %v4217_v6  ;;  %v4224_v58 = vld [vmem:[#allocation2 + $0x58] sm:$0xff]  }
 0x198   : > { %3996 = vmatprep.mubr.msk.bf16.mxu1 %vm1276_vm1, %v5068_v55  ;;  %4036 = vmatprep.mubr.msk.bf16.mxu0 %vm1276_vm1, %v4218_v20  ;;  %v5253_v55 = vadd.s32 8, %v5245_v12 }
 0x19a   : > { %vm2747_vm5 = vcmp.eq.s32.totalorder %v5253_v55, 15 }
 0x19f   : > { %3997 = vmatmul.mubr.msk.bf16.gmra.mxu1 %vm1276_vm1, %v5092_v51  ;;  %4037 = vmatmul.mubr.msk.bf16.gmra.mxu0 %vm1276_vm1, %v4219_v57 }
 0x1a0   : > { %4000 = vmatprep.mubr.msk.bf16.mxu1 %vm1276_vm1, %v5104_v28  ;;  %4040 = vmatprep.mubr.msk.bf16.mxu0 %vm1276_vm1, %v4220_v21 }
 0x1a7   : > { %4001 = vmatmul.mubr.msk.bf16.gmra.mxu1 %vm1276_vm1, %v5114_v32  ;;  %4041 = vmatmul.mubr.msk.bf16.gmra.mxu0 %vm1276_vm1, %v4222_v54 }
 0x1a8   : > { %4004 = vmatprep.mubr.msk.bf16.mxu1 %vm1276_vm1, %v5124_v30  ;;  %4044 = vmatprep.mubr.msk.bf16.mxu0 %vm1276_vm1, %v4223_v56  ;;  %v4237_v30 = vld [vmem:[#allocation2 + $0x48] sm:$0xff]   ;;  %v5304_v56 = vld [vmem:[%s6155_s7 + $0x2] ss:$0 sm:$0xff] }
 0x1af   : > { %4005 = vmatmul.mubr.msk.bf16.gmra.mxu1 %vm1276_vm1, %v5134_v43  ;;  %4045 = vmatmul.mubr.msk.bf16.gmra.mxu0 %vm1276_vm1, %v4224_v58 }
 0x1b0   : > { %4008 = vmatprep.mubr.msk.bf16.mxu1 %vm1276_vm1, %v5143_v59  ;;  %4048 = vmatprep.mubr.msk.bf16.mxu0 %vm1276_vm1, %v4225_v60 }
 0x1b7   : > { %4009 = vmatmul.mubr.msk.bf16.gmra.mxu1 %vm1276_vm1, %v5153_v3  ;;  %4049 = vmatmul.mubr.msk.bf16.gmra.mxu0 %vm1276_vm1, %v4227_v61 }
 0x1b8   : > { %4012 = vmatprep.mubr.msk.bf16.mxu1 %vm1276_vm1, %v5161_v13  ;;  %4052 = vmatprep.mubr.msk.bf16.mxu0 %vm1276_vm1, %v4228_v62 }
 0x1bf   : > { %4013 = vmatmul.mubr.msk.bf16.gmra.mxu1 %vm1276_vm1, %v5088_v48  ;;  %4053 = vmatmul.mubr.msk.bf16.gmra.mxu0 %vm1276_vm1, %v4229_v0 }
 0x1c0   : > { %4064 = vmatprep.mubr.msk.bf16.mxu0 %vm1276_vm1, %v4230_v5  ;;  %4068 = vmatprep.mubr.msk.bf16.mxu1 %vm1276_vm1, %v4231_v29 }
 0x1c7   : > { %v5234_v7 = vpop.f32.mrf.mxu1  ;;  %v5236_v8 = vpop.f32.mrf.mxu0  ;;  %4065 = vmatmul.mubr.msk.bf16.vlgmr.msra.gmra.mxu0 %vm1276_vm1, %v4232_v45  ;;  %4069 = vmatmul.mubr.msk.bf16.vlgmr.msra.gmra.mxu1 %vm1276_vm1, %v4233_v2 }
 0x1c8   : > { %4072 = vmatprep.mubr.msk.bf16.mxu1 %vm1276_vm1, %v4234_v4 }
 0x1c9   : > { %v5241_v9 = vpop.f32.mrf.mxu1  ;;  %v5243_v11 = vpop.f32.mrf.mxu0 }
 0x1ca   : > { %v6160_v23 = vrot.slane %v5243_v11, 1  ;;  %v2649_v15 = vrot.slane %v5241_v9, 7 }
 0x1cb   : > { %v5247_v14 = vpop.f32.mrf.mxu1  ;;  %v1556_v17 = vpop.f32.mrf.mxu0 }
 0x1cd   : > { %v1365_v18 = vpop.f32.mrf.mxu1  ;;  %v1558_v19 = vpop.f32.mrf.mxu0 }
 0x1ce   : > { %v2650_v27 = vrot.slane %v1365_v18, 7  ;;  %v2749_v33 = vrot.slane %v1558_v19, 1  ;;  %v4239_v18 = vld [vmem:[#allocation2 + $0x58] sm:$0xff]  }
 0x1cf   : > { %v5256_v35 = vpop.f32.mrf.mxu1  ;;  %v1562_v37 = vpop.f32.mrf.mxu0  ;;  %4073 = vmatmul.mubr.msk.bf16.gmra.mxu1 %vm1276_vm1, %v4235_v26 }
 0x1d0   : > { %v5263_v39 = vsel %vm2780_vm3, %v6160_v23, %v2749_v33  ;;  %4076 = vmatprep.mubr.msk.bf16.mxu1 %vm1276_vm1, %v4236_v34  ;;  %v2712_v24 = vsel %vm2681_vm2, %v2649_v15, %v2650_v27  ;;  %v4240_v34 = vld [vmem:[#allocation2 + $0x60] sm:$0xff]  }
 0x1d1   : > { %v1371_v10 = vpop.f32.mrf.mxu1  ;;  %v1564_v50 = vpop.f32.mrf.mxu0  ;;  %v2846_v47 = vadd.f32 %v2712_v24, %v1556_v17 }
 0x1d2   : > { %v2651_v41 = vrot.slane %v1371_v10, 7  ;;  %v2750_v25 = vrot.slane %v1564_v50, 1 }
 0x1d3   : > { %v5272_v42 = vpop.f32.mrf.mxu1  ;;  %v1566_v46 = vpop.f32.mrf.mxu0 }
 0x1d4   : > { %v2711_v38 = vsel %vm2681_vm2, %v2650_v27, %v2651_v41  ;;  %v2810_v48 = vsel %vm2780_vm3, %v2749_v33, %v2750_v25 }
 0x1d5   : > { %v2716_v49 = vsel %vm2647_vm4, 0.0, %v2711_v38  ;;  %v2814_v51 = vsel %vm2747_vm5, 0.0, %v2810_v48  ;;  %v1375_v28 = vpop.f32.mrf.mxu1  ;;  %v1568_v32 = vpop.f32.mrf.mxu0 }
 0x1d6   : > { %v2847_v43 = vadd.f32 %v2716_v49, %v1562_v37  ;;  %v2878_v59 = vadd.f32 %v2846_v47, %v2814_v51  ;;  %v2652_v3 = vrot.slane %v1375_v28, 7  ;;  %v2751_v13 = vrot.slane %v1568_v32, 1 }
 0x1d7   : > { %v5287_v31 = vpop.f32.mrf.mxu1  ;;  %v1572_v36 = vpop.f32.mrf.mxu0  ;;  %4077 = vmatmul.mubr.msk.bf16.gmra.mxu1 %vm1276_vm1, %v4237_v30 }
 0x1d8   : > { %v3090_v22 = vadd.f32 %v5285_v52, %v2878_v59  ;;  %v2809_v63 = vsel %vm2780_vm3, %v2750_v25, %v2751_v13  ;;  %4080 = vmatprep.mubr.msk.bf16.mxu1 %vm1276_vm1, %v4238_v16  ;;  %v2710_v44 = vsel %vm2681_vm2, %v2651_v41, %v2652_v3 }
 0x1d9   : > { %v2879_v53 = vadd.f32 %v2847_v43, %v2809_v63  ;;  %v1381_v6 = vpop.f32.mrf.mxu1  ;;  %v1574_v20 = vpop.f32.mrf.mxu0  ;;  %v2848_v0 = vadd.f32 %v2710_v44, %v1566_v46 }
 0x1da   : > { %v3122_v57 = vmax.f32 %v3090_v22, 0.0  ;;  %v2653_v21 = vrot.slane %v1381_v6, 7  ;;  %v2752_v54 = vrot.slane %v1574_v20, 1  ;;  %v4241_v6 = vld [vmem:[#allocation2 + $0x68] sm:$0xff]  }
 0x1db   : > { %v3091_v58 = vadd.f32 %v5285_v52, %v2879_v53  ;;  %v5307_v60 = vpop.f32.mrf.mxu1  ;;  %v1576_v61 = vpop.f32.mrf.mxu0 }
 0x1dc   : > { %v3159_v62 = vmul.f32 %v5297_v40, %v3122_v57  ;;  %v2709_v5 = vsel %vm2681_vm2, %v2652_v3, %v2653_v21  ;;  %v2808_v29 = vsel %vm2780_vm3, %v2751_v13, %v2752_v54 }
 0x1dd   : > { %v3123_v45 = vmax.f32 %v3091_v58, 0.0  ;;  %v2718_v2 = vsel %vm2647_vm4, 0.0, %v2709_v5  ;;  %v2816_v1 = vsel %vm2747_vm5, 0.0, %v2808_v29  ;;  %v1385_v4 = vpop.f32.mrf.mxu1  ;;  %v1578_v17 = vpop.f32.mrf.mxu0  ;;  %v4242_v58 = vld [vmem:[#allocation2 + $0x70] sm:$0xff]  }
 0x1de   : > { %v3196_v19 = vadd.f32 %v5304_v56, %v3159_v62  ;;  %v2849_v26 = vadd.f32 %v2718_v2, %v1572_v36  ;;  %v2880_v27 = vadd.f32 %v2848_v0, %v2816_v1  ;;  %v2654_v33 = vrot.slane %v1385_v4, 7 }
 0x1df   : > { %v3160_v37 = vmul.f32 %v5297_v40, %v3123_v45  ;;  %v2753_v24 = vrot.slane %v1578_v17, 1  ;;  %v5320_v10 = vpop.f32.mrf.mxu1  ;;  %v1582_v50 = vpop.f32.mrf.mxu0  ;;  %4081 = vmatmul.mubr.msk.bf16.gmra.mxu1 %vm1276_vm1, %v4239_v18 }
 0x1e0   : > { %3228 = vst [vmem:[%s4470_s20 + $0x30] sm:$0xff] %v3196_v19  ;;  %v3092_v41 = vadd.f32 %v5285_v52, %v2880_v27  ;;  %v2708_v25 = vsel %vm2681_vm2, %v2653_v21, %v2654_v33  ;;  %4084 = vmatprep.mubr.msk.bf16.mxu1 %vm1276_vm1, %v4240_v34 }
 0x1e1   : > { %v3197_v46 = vadd.f32 %v5304_v56, %v3160_v37  ;;  %v2807_v47 = vsel %vm2780_vm3, %v2752_v54, %v2753_v24  ;;  %v1391_v38 = vpop.f32.mrf.mxu1  ;;  %v1584_v48 = vpop.f32.mrf.mxu0  ;;  %v2850_v30 = vadd.f32 %v2708_v25, %v1576_v61 }
 0x1e2   : > { %v3124_v49 = vmax.f32 %v3092_v41, 0.0  ;;  %v2881_v51 = vadd.f32 %v2849_v26, %v2807_v47  ;;  %v2655_v28 = vrot.slane %v1391_v38, 7  ;;  %v2754_v32 = vrot.slane %v1584_v48, 1  ;;  %v4243_v48 = vld [vmem:[#allocation2 + $0x78] sm:$0xff]  }
 0x1e3   : > { %3229 = vst [vmem:[%s4470_s20 + $0x50] sm:$0xff] %v3197_v46  ;;  %v5332_v43 = vpop.f32.mrf.mxu1  ;;  %v1586_v59 = vpop.f32.mrf.mxu0 }
 0x1e4   : > { %v3161_v3 = vmul.f32 %v5297_v40, %v3124_v49  ;;  %v3093_v13 = vadd.f32 %v5285_v52, %v2881_v51  ;;  %v2707_v16 = vsel %vm2681_vm2, %v2654_v33, %v2655_v28  ;;  %v2806_v36 = vsel %vm2780_vm3, %v2753_v24, %v2754_v32 }
 0x1e5   : > { %v2720_v22 = vsel %vm2647_vm4, 0.0, %v2707_v16  ;;  %v2818_v63 = vsel %vm2747_vm5, 0.0, %v2806_v36  ;;  %v1395_v44 = vpop.f32.mrf.mxu1  ;;  %v1588_v53 = vpop.f32.mrf.mxu0 }
 0x1e6   : > { %v3198_v20 = vadd.f32 %v5304_v56, %v3161_v3  ;;  %v3125_v57 = vmax.f32 %v3093_v13, 0.0  ;;  %v2851_v21 = vadd.f32 %v2720_v22, %v1582_v50  ;;  %v2882_v54 = vadd.f32 %v2850_v30, %v2818_v63  ;;  %v4244_v30 = vld [vmem:[#allocation2 + $0x80] sm:$0xff]  }
 0x1e7   : > { %v2656_v61 = vrot.slane %v1395_v44, 7  ;;  %v2755_v62 = vrot.slane %v1588_v53, 1  ;;  %v5345_v0 = vpop.f32.mrf.mxu1  ;;  %v1592_v5 = vpop.f32.mrf.mxu0  ;;  %4085 = vmatmul.mubr.msk.bf16.gmra.mxu1 %vm1276_vm1, %v4241_v6 }
 0x1e8   : > { %3230 = vst [vmem:[%s4470_s20 + $0x70] sm:$0xff] %v3198_v20  ;;  %v3162_v29 = vmul.f32 %v5297_v40, %v3125_v57  ;;  %v3094_v45 = vadd.f32 %v5285_v52, %v2882_v54  ;;  %4088 = vmatprep.mubr.msk.bf16.mxu1 %vm1276_vm1, %v4242_v58 }
 0x1e9   : > { %v2805_v2 = vsel %vm2780_vm3, %v2754_v32, %v2755_v62  ;;  %v1401_v1 = vpop.f32.mrf.mxu1  ;;  %v1594_v4 = vpop.f32.mrf.mxu0  ;;  %v2706_v19 = vsel %vm2681_vm2, %v2655_v28, %v2656_v61 }
 0x1ea   : > { %v3199_v17 = vadd.f32 %v5304_v56, %v3162_v29  ;;  %v3126_v18 = vmax.f32 %v3094_v45, 0.0  ;;  %v2883_v26 = vadd.f32 %v2851_v21, %v2805_v2  ;;  %v2657_v27 = vrot.slane %v1401_v1, 7 }
 0x1eb   : > { %v2756_v33 = vrot.slane %v1594_v4, 1  ;;  %v5357_v34 = vpop.f32.mrf.mxu1  ;;  %v1596_v37 = vpop.f32.mrf.mxu0  ;;  %v2852_v41 = vadd.f32 %v2706_v19, %v1586_v59 }
 0x1ec   : > { %3231 = vst [vmem:[%s4470_s20 + $0x90] sm:$0xff] %v3199_v17  ;;  %v3163_v24 = vmul.f32 %v5297_v40, %v3126_v18  ;;  %v3095_v50 = vadd.f32 %v5285_v52, %v2883_v26  ;;  %v2705_v25 = vsel %vm2681_vm2, %v2656_v61, %v2657_v27 }
 0x1ed   : > { %v2804_v46 = vsel %vm2780_vm3, %v2755_v62, %v2756_v33  ;;  %v1405_v47 = vpop.f32.mrf.mxu1  ;;  %v1598_v38 = vpop.f32.mrf.mxu0  ;;  %v2722_v28 = vsel %vm2647_vm4, 0.0, %v2705_v25 }
 0x1ee   : > { %v3200_v49 = vadd.f32 %v5304_v56, %v3163_v24  ;;  %v3127_v51 = vmax.f32 %v3095_v50, 0.0  ;;  %v2820_v32 = vsel %vm2747_vm5, 0.0, %v2804_v46  ;;  %v2853_v59 = vadd.f32 %v2722_v28, %v1592_v5 }
 0x1ef   : > { %v2884_v3 = vadd.f32 %v2852_v41, %v2820_v32  ;;  %v2658_v13 = vrot.slane %v1405_v47, 7  ;;  %v2757_v16 = vrot.slane %v1598_v38, 1  ;;  %v5371_v36 = vpop.f32.mrf.mxu1  ;;  %v1602_v22 = vpop.f32.mrf.mxu0  ;;  %4089 = vmatmul.mubr.msk.bf16.gmra.mxu1 %vm1276_vm1, %v4243_v48 }
 0x1f0   : > { %3232 = vst [vmem:[%s4470_s20 + $0xb0] sm:$0xff] %v3200_v49  ;;  %v3164_v63 = vmul.f32 %v5297_v40, %v3127_v51  ;;  %4092 = vmatprep.mubr.msk.bf16.mxu1 %vm1276_vm1, %v4244_v30 }
 0x1f1   : > { %v3096_v44 = vadd.f32 %v5285_v52, %v2884_v3  ;;  %v2803_v53 = vsel %vm2780_vm3, %v2756_v33, %v2757_v16  ;;  %v1411_v6 = vpop.f32.mrf.mxu1  ;;  %v1604_v20 = vpop.f32.mrf.mxu0  ;;  %v2704_v21 = vsel %vm2681_vm2, %v2657_v27, %v2658_v13  ;;  %v4245_v27 = vld [vmem:[#allocation2 + $0x88] sm:$0xff]  }
 0x1f2   : > { %v3201_v57 = vadd.f32 %v5304_v56, %v3164_v63  ;;  %v2885_v54 = vadd.f32 %v2853_v59, %v2803_v53  ;;  %v2659_v58 = vrot.slane %v1411_v6, 7  ;;  %v2758_v62 = vrot.slane %v1604_v20, 1 }
 0x1f3   : > { %v3128_v61 = vmax.f32 %v3096_v44, 0.0  ;;  %v5383_v5 = vpop.f32.mrf.mxu1  ;;  %v1606_v29 = vpop.f32.mrf.mxu0  ;;  %v2854_v4 = vadd.f32 %v2704_v21, %v1596_v37 }
 0x1f4   : > { %3233 = vst [vmem:[%s4470_s20 + $0xd0] sm:$0xff] %v3201_v57  ;;  %v3097_v45 = vadd.f32 %v5285_v52, %v2885_v54  ;;  %v2703_v2 = vsel %vm2681_vm2, %v2658_v13, %v2659_v58  ;;  %v2802_v18 = vsel %vm2780_vm3, %v2757_v16, %v2758_v62 }
 0x1f5   : > { %v3165_v1 = vmul.f32 %v5297_v40, %v3128_v61  ;;  %v2724_v17 = vsel %vm2647_vm4, 0.0, %v2703_v2  ;;  %v1415_v19 = vpop.f32.mrf.mxu1  ;;  %v1608_v26 = vpop.f32.mrf.mxu0  ;;  %v2822_v50 = vsel %vm2747_vm5, 0.0, %v2802_v18 }
 0x1f6   : > { %v3129_v33 = vmax.f32 %v3097_v45, 0.0  ;;  %v2855_v24 = vadd.f32 %v2724_v17, %v1602_v22  ;;  %v2660_v41 = vrot.slane %v1415_v19, 7  ;;  %v2886_v46 = vadd.f32 %v2854_v4, %v2822_v50 }
 0x1f7   : > { %v3202_v25 = vadd.f32 %v5304_v56, %v3165_v1  ;;  %v2759_v37 = vrot.slane %v1608_v26, 1  ;;  %v5397_v47 = vpop.f32.mrf.mxu1  ;;  %v1612_v38 = vpop.f32.mrf.mxu0  ;;  %4093 = vmatmul.mubr.msk.bf16.gmra.mxu1 %vm1276_vm1, %v4245_v27 }
 0x1f8   : > { %v3166_v48 = vmul.f32 %v5297_v40, %v3129_v33  ;;  %v3098_v49 = vadd.f32 %v5285_v52, %v2886_v46  ;;  %v2702_v51 = vsel %vm2681_vm2, %v2659_v58, %v2660_v41 }
 0x1f9   : > { %3234 = vst [vmem:[%s4470_s20 + $0xf0] sm:$0xff] %v3202_v25  ;;  %v2801_v28 = vsel %vm2780_vm3, %v2758_v62, %v2759_v37  ;;  %v1421_v32 = vpop.f32.mrf.mxu1  ;;  %v1614_v30 = vpop.f32.mrf.mxu0  ;;  %v2856_v53 = vadd.f32 %v2702_v51, %v1606_v29 }
 0x1fa   : > { %v3203_v59 = vadd.f32 %v5304_v56, %v3166_v48  ;;  %v2887_v3 = vadd.f32 %v2855_v24, %v2801_v28  ;;  %v2661_v13 = vrot.slane %v1421_v32, 7  ;;  %v2760_v16 = vrot.slane %v1614_v30, 1 }
 0x1fb   : > { %v3130_v22 = vmax.f32 %v3098_v49, 0.0  ;;  %v5408_v63 = vpop.f32.mrf.mxu1  ;;  %v1616_v44 = vpop.f32.mrf.mxu0 }
 0x1fc   : > { %3235 = vst [vmem:[%s4470_s20 + $0x110] sm:$0xff] %v3203_v59  ;;  %v3099_v6 = vadd.f32 %v5285_v52, %v2887_v3  ;;  %v2701_v20 = vsel %vm2681_vm2, %v2660_v41, %v2661_v13  ;;  %v2800_v57 = vsel %vm2780_vm3, %v2759_v37, %v2760_v16 }
 0x1fd   : > { %v3167_v21 = vmul.f32 %v5297_v40, %v3130_v22  ;;  %v2726_v54 = vsel %vm2647_vm4, 0.0, %v2701_v20  ;;  %v2824_v58 = vsel %vm2747_vm5, 0.0, %v2800_v57  ;;  %v1425_v61 = vpop.f32.mrf.mxu1  ;;  %v1618_v62 = vpop.f32.mrf.mxu0 }
 0x1fe   : > { %v3131_v29 = vmax.f32 %v3099_v6, 0.0  ;;  %v2857_v45 = vadd.f32 %v2726_v54, %v1612_v38  ;;  %v2888_v2 = vadd.f32 %v2856_v53, %v2824_v58  ;;  %v2662_v1 = vrot.slane %v1425_v61, 7 }
 0x1ff   : > { %v3204_v4 = vadd.f32 %v5304_v56, %v3167_v21  ;;  %v2761_v17 = vrot.slane %v1618_v62, 1  ;;  %v5422_v18 = vpop.f32.mrf.mxu1  ;;  %v1622_v19 = vpop.f32.mrf.mxu0 }
 0x200   : > { %v3168_v26 = vmul.f32 %v5297_v40, %v3131_v29  ;;  %v3100_v27 = vadd.f32 %v5285_v52, %v2888_v2  ;;  %v2700_v33 = vsel %vm2681_vm2, %v2661_v13, %v2662_v1 }
 0x201   : > { %3236 = vst [vmem:[%s4470_s20 + $0x130] sm:$0xff] %v3204_v4  ;;  %v2799_v24 = vsel %vm2780_vm3, %v2760_v16, %v2761_v17  ;;  %v1431_v50 = vpop.f32.mrf.mxu1  ;;  %v1624_v41 = vpop.f32.mrf.mxu0  ;;  %v2858_v59 = vadd.f32 %v2700_v33, %v1616_v44 }
 0x202   : > { %v3205_v25 = vadd.f32 %v5304_v56, %v3168_v26  ;;  %v3132_v46 = vmax.f32 %v3100_v27, 0.0  ;;  %v2889_v37 = vadd.f32 %v2857_v45, %v2799_v24  ;;  %v2663_v38 = vrot.slane %v1431_v50, 7 }
 0x203   : > { %v2762_v48 = vrot.slane %v1624_v41, 1  ;;  %v5432_v49 = vpop.f32.mrf.mxu1  ;;  %v1626_v51 = vpop.f32.mrf.mxu0 }
 0x204   : > { %3237 = vst [vmem:[%s4470_s20 + $0x150] sm:$0xff] %v3205_v25  ;;  %v3169_v28 = vmul.f32 %v5297_v40, %v3132_v46  ;;  %v3101_v32 = vadd.f32 %v5285_v52, %v2889_v37  ;;  %v2699_v30 = vsel %vm2681_vm2, %v2662_v1, %v2663_v38 }
 0x205   : > { %v2728_v3 = vsel %vm2647_vm4, 0.0, %v2699_v30  ;;  %v2798_v13 = vsel %vm2780_vm3, %v2761_v17, %v2762_v48  ;;  %v1435_v16 = vpop.f32.mrf.mxu1  ;;  %v1628_v22 = vpop.f32.mrf.mxu0 }
 0x206   : > { %v3206_v53 = vadd.f32 %v5304_v56, %v3169_v28  ;;  %v3133_v6 = vmax.f32 %v3101_v32, 0.0  ;;  %v2859_v20 = vadd.f32 %v2728_v3, %v1622_v19  ;;  %v2826_v57 = vsel %vm2747_vm5, 0.0, %v2798_v13 }
 0x207   : > { %v2890_v21 = vadd.f32 %v2858_v59, %v2826_v57  ;;  %v2664_v54 = vrot.slane %v1435_v16, 7  ;;  %v2763_v58 = vrot.slane %v1628_v22, 1  ;;  %v5446_v61 = vpop.f32.mrf.mxu1  ;;  %v1632_v44 = vpop.f32.mrf.mxu0 }
 0x208   : > { %3238 = vst [vmem:[%s4470_s20 + $0x170] sm:$0xff] %v3206_v53  ;;  %v3170_v62 = vmul.f32 %v5297_v40, %v3133_v6 }
 0x209   : > { %v3102_v29 = vadd.f32 %v5285_v52, %v2890_v21  ;;  %v2797_v45 = vsel %vm2780_vm3, %v2762_v48, %v2763_v58  ;;  %v1441_v2 = vpop.f32.mrf.mxu1  ;;  %v1634_v1 = vpop.f32.mrf.mxu0  ;;  %v2698_v17 = vsel %vm2681_vm2, %v2663_v38, %v2664_v54 }
 0x20a   : > { %v3207_v4 = vadd.f32 %v5304_v56, %v3170_v62  ;;  %v2891_v19 = vadd.f32 %v2859_v20, %v2797_v45  ;;  %v2665_v26 = vrot.slane %v1441_v2, 7  ;;  %v2764_v33 = vrot.slane %v1634_v1, 1 }
 0x20b   : > { %v3134_v27 = vmax.f32 %v3102_v29, 0.0  ;;  %v5456_v24 = vpop.f32.mrf.mxu1  ;;  %v1636_v50 = vpop.f32.mrf.mxu0  ;;  %v2860_v37 = vadd.f32 %v2698_v17, %v1626_v51 }
 0x20c   : > { %3239 = vst [vmem:[%s4470_s20 + $0x190] sm:$0xff] %v3207_v4  ;;  %v3103_v41 = vadd.f32 %v5285_v52, %v2891_v19  ;;  %v2697_v25 = vsel %vm2681_vm2, %v2664_v54, %v2665_v26  ;;  %v2796_v48 = vsel %vm2780_vm3, %v2763_v58, %v2764_v33 }
 0x20d   : > { %v3171_v46 = vmul.f32 %v5297_v40, %v3134_v27  ;;  %v2730_v38 = vsel %vm2647_vm4, 0.0, %v2697_v25  ;;  %v1445_v28 = vpop.f32.mrf.mxu1  ;;  %v1638_v32 = vpop.f32.mrf.mxu0  ;;  %v2828_v3 = vsel %vm2747_vm5, 0.0, %v2796_v48 }
 0x20e   : > { %v3135_v30 = vmax.f32 %v3103_v41, 0.0  ;;  %v2861_v59 = vadd.f32 %v2730_v38, %v1632_v44  ;;  %v2666_v13 = vrot.slane %v1445_v28, 7  ;;  %v2892_v22 = vadd.f32 %v2860_v37, %v2828_v3 }
 0x20f   : > { %v3208_v16 = vadd.f32 %v5304_v56, %v3171_v46  ;;  %v2765_v53 = vrot.slane %v1638_v32, 1  ;;  %v5470_v6 = vpop.f32.mrf.mxu1  ;;  %v1642_v51 = vpop.f32.mrf.mxu0 }
 0x210   : > { %v3172_v20 = vmul.f32 %v5297_v40, %v3135_v30  ;;  %v3104_v57 = vadd.f32 %v5285_v52, %v2892_v22  ;;  %v2696_v21 = vsel %vm2681_vm2, %v2665_v26, %v2666_v13 }
 0x211   : > { %3240 = vst [vmem:[%s4470_s20 + $0x1b0] sm:$0xff] %v3208_v16  ;;  %v2795_v54 = vsel %vm2780_vm3, %v2764_v33, %v2765_v53  ;;  %v1451_v58 = vpop.f32.mrf.mxu1  ;;  %v1644_v44 = vpop.f32.mrf.mxu0  ;;  %v2862_v19 = vadd.f32 %v2696_v21, %v1636_v50 }
 0x212   : > { %v3209_v62 = vadd.f32 %v5304_v56, %v3172_v20  ;;  %v2893_v29 = vadd.f32 %v2861_v59, %v2795_v54  ;;  %v2667_v45 = vrot.slane %v1451_v58, 7  ;;  %v2766_v2 = vrot.slane %v1644_v44, 1 }
 0x213   : > { %v3136_v1 = vmax.f32 %v3104_v57, 0.0  ;;  %v5480_v4 = vpop.f32.mrf.mxu1  ;;  %v1646_v17 = vpop.f32.mrf.mxu0 }
 0x214   : > { %3241 = vst [vmem:[%s4470_s20 + $0x1d0] sm:$0xff] %v3209_v62  ;;  %v3105_v27 = vadd.f32 %v5285_v52, %v2893_v29  ;;  %v2695_v26 = vsel %vm2681_vm2, %v2666_v13, %v2667_v45  ;;  %v2794_v33 = vsel %vm2780_vm3, %v2765_v53, %v2766_v2 }
 0x215   : > { %v3173_v41 = vmul.f32 %v5297_v40, %v3136_v1  ;;  %v2732_v25 = vsel %vm2647_vm4, 0.0, %v2695_v26  ;;  %v2830_v46 = vsel %vm2747_vm5, 0.0, %v2794_v33  ;;  %v1455_v37 = vpop.f32.mrf.mxu1  ;;  %v1648_v38 = vpop.f32.mrf.mxu0 }
 0x216   : > { %v3137_v50 = vmax.f32 %v3105_v27, 0.0  ;;  %v2863_v48 = vadd.f32 %v2732_v25, %v1642_v51  ;;  %v2894_v28 = vadd.f32 %v2862_v19, %v2830_v46  ;;  %v2668_v32 = vrot.slane %v1455_v37, 7 }
 0x217   : > { %v3210_v30 = vadd.f32 %v5304_v56, %v3173_v41  ;;  %v2767_v59 = vrot.slane %v1648_v38, 1  ;;  %v5494_v3 = vpop.f32.mrf.mxu1  ;;  %v1652_v13 = vpop.f32.mrf.mxu0 }
 0x218   : > { %v3174_v16 = vmul.f32 %v5297_v40, %v3137_v50  ;;  %v3106_v22 = vadd.f32 %v5285_v52, %v2894_v28  ;;  %v2694_v53 = vsel %vm2681_vm2, %v2667_v45, %v2668_v32 }
 0x219   : > { %3242 = vst [vmem:[%s4470_s20 + $0x1f0] sm:$0xff] %v3210_v30  ;;  %v2793_v51 = vsel %vm2780_vm3, %v2766_v2, %v2767_v59  ;;  %v1461_v20 = vpop.f32.mrf.mxu1  ;;  %v1654_v57 = vpop.f32.mrf.mxu0  ;;  %v2864_v2 = vadd.f32 %v2694_v53, %v1646_v17 }
 0x21a   : > { %v3211_v21 = vadd.f32 %v5304_v56, %v3174_v16  ;;  %v3138_v54 = vmax.f32 %v3106_v22, 0.0  ;;  %v2895_v58 = vadd.f32 %v2863_v48, %v2793_v51  ;;  %v2669_v44 = vrot.slane %v1461_v20, 7 }
 0x21b   : > { %v2768_v62 = vrot.slane %v1654_v57, 1  ;;  %v5504_v29 = vpop.f32.mrf.mxu1  ;;  %v1656_v1 = vpop.f32.mrf.mxu0 }
 0x21c   : > { %6164 = vst [vmem:[#allocation7_spill] sm:$0xff] %v5504_v29  ;;  %3243 = vst [vmem:[%s4470_s20 + $0x210] sm:$0xff] %v3211_v21  ;;  %v3175_v19 = vmul.f32 %v5297_v40, %v3138_v54  ;;  %v3107_v27 = vadd.f32 %v5285_v52, %v2895_v58  ;;  %v2693_v45 = vsel %vm2681_vm2, %v2668_v32, %v2669_v44 }
 0x21d   : > { %v2734_v26 = vsel %vm2647_vm4, 0.0, %v2693_v45  ;;  %v2792_v33 = vsel %vm2780_vm3, %v2767_v59, %v2768_v62  ;;  %v1465_v41 = vpop.f32.mrf.mxu1  ;;  %v1658_v25 = vpop.f32.mrf.mxu0 }
 0x21e   : > { %v3212_v46 = vadd.f32 %v5304_v56, %v3175_v19  ;;  %v3139_v37 = vmax.f32 %v3107_v27, 0.0  ;;  %v2865_v38 = vadd.f32 %v2734_v26, %v1652_v13  ;;  %v2832_v50 = vsel %vm2747_vm5, 0.0, %v2792_v33 }
 0x21f   : > { %v2896_v48 = vadd.f32 %v2864_v2, %v2832_v50  ;;  %v2670_v28 = vrot.slane %v1465_v41, 7  ;;  %v2769_v30 = vrot.slane %v1658_v25, 1  ;;  %v5518_v32 = vpop.f32.mrf.mxu1  ;;  %v1662_v17 = vpop.f32.mrf.mxu0 }
 0x220   : > { %3244 = vst [vmem:[%s4470_s20 + $0x230] sm:$0xff] %v3212_v46  ;;  %v3176_v16 = vmul.f32 %v5297_v40, %v3139_v37 }
 0x221   : > { %v3108_v59 = vadd.f32 %v5285_v52, %v2896_v48  ;;  %v2791_v22 = vsel %vm2780_vm3, %v2768_v62, %v2769_v30  ;;  %v1471_v53 = vpop.f32.mrf.mxu1  ;;  %v1664_v13 = vpop.f32.mrf.mxu0  ;;  %v2692_v20 = vsel %vm2681_vm2, %v2669_v44, %v2670_v28 }
 0x222   : > { %v3213_v51 = vadd.f32 %v5304_v56, %v3176_v16  ;;  %v2897_v57 = vadd.f32 %v2865_v38, %v2791_v22  ;;  %v2671_v21 = vrot.slane %v1471_v53, 7  ;;  %v2770_v58 = vrot.slane %v1664_v13, 1 }
 0x223   : > { %v3140_v54 = vmax.f32 %v3108_v59, 0.0  ;;  %v5528_v19 = vpop.f32.mrf.mxu1  ;;  %v1666_v27 = vpop.f32.mrf.mxu0  ;;  %v2866_v26 = vadd.f32 %v2692_v20, %v1656_v1 }
 0x224   : > { %3245 = vst [vmem:[%s4470_s20 + $0x250] sm:$0xff] %v3213_v51  ;;  %v3109_v45 = vadd.f32 %v5285_v52, %v2897_v57  ;;  %v2691_v62 = vsel %vm2681_vm2, %v2670_v28, %v2671_v21  ;;  %v2790_v33 = vsel %vm2780_vm3, %v2769_v30, %v2770_v58 }
 0x225   : > { %v3177_v2 = vmul.f32 %v5297_v40, %v3140_v54  ;;  %v2736_v44 = vsel %vm2647_vm4, 0.0, %v2691_v62  ;;  %v1475_v41 = vpop.f32.mrf.mxu1  ;;  %v1668_v25 = vpop.f32.mrf.mxu0  ;;  %v2834_v38 = vsel %vm2747_vm5, 0.0, %v2790_v33 }
 0x226   : > { %v3141_v46 = vmax.f32 %v3109_v45, 0.0  ;;  %v2867_v37 = vadd.f32 %v2736_v44, %v1662_v17  ;;  %v2672_v50 = vrot.slane %v1475_v41, 7  ;;  %v2898_v28 = vadd.f32 %v2866_v26, %v2834_v38 }
 0x227   : > { %v3214_v48 = vadd.f32 %v5304_v56, %v3177_v2  ;;  %v2771_v16 = vrot.slane %v1668_v25, 1  ;;  %v5542_v59 = vpop.f32.mrf.mxu1  ;;  %v1672_v1 = vpop.f32.mrf.mxu0 }
 0x228   : > { %6165 = vst [vmem:[#allocation8_spill] sm:$0xff] %v5542_v59  ;;  %v3178_v22 = vmul.f32 %v5297_v40, %v3141_v46  ;;  %v3110_v30 = vadd.f32 %v5285_v52, %v2898_v28  ;;  %v2690_v17 = vsel %vm2681_vm2, %v2671_v21, %v2672_v50 }
 0x229   : > { %3246 = vst [vmem:[%s4470_s20 + $0x270] sm:$0xff] %v3214_v48  ;;  %v2789_v53 = vsel %vm2780_vm3, %v2770_v58, %v2771_v16  ;;  %v1481_v13 = vpop.f32.mrf.mxu1  ;;  %v1674_v51 = vpop.f32.mrf.mxu0  ;;  %v2868_v44 = vadd.f32 %v2690_v17, %v1666_v27 }
 0x22a   : > { %v3215_v20 = vadd.f32 %v5304_v56, %v3178_v22  ;;  %v2899_v57 = vadd.f32 %v2867_v37, %v2789_v53  ;;  %v2673_v54 = vrot.slane %v1481_v13, 7  ;;  %v2772_v45 = vrot.slane %v1674_v51, 1 }
 0x22b   : > { %v3142_v62 = vmax.f32 %v3110_v30, 0.0  ;;  %v5552_v2 = vpop.f32.mrf.mxu1  ;;  %v1676_v26 = vpop.f32.mrf.mxu0 }
 0x22c   : > { %6166 = vst [vmem:[#allocation9_spill] sm:$0xff] %v5552_v2  ;;  %3247 = vst [vmem:[%s4470_s20 + $0x290] sm:$0xff] %v3215_v20  ;;  %v3111_v33 = vadd.f32 %v5285_v52, %v2899_v57  ;;  %v2689_v21 = vsel %vm2681_vm2, %v2672_v50, %v2673_v54  ;;  %v2788_v58 = vsel %vm2780_vm3, %v2771_v16, %v2772_v45 }
 0x22d   : > { %v3179_v41 = vmul.f32 %v5297_v40, %v3142_v62  ;;  %v2738_v25 = vsel %vm2647_vm4, 0.0, %v2689_v21  ;;  %v2836_v46 = vsel %vm2747_vm5, 0.0, %v2788_v58  ;;  %v1485_v37 = vpop.f32.mrf.mxu1  ;;  %v1678_v38 = vpop.f32.mrf.mxu0 }
 0x22e   : > { %v3143_v27 = vmax.f32 %v3111_v33, 0.0  ;;  %v2869_v48 = vadd.f32 %v2738_v25, %v1672_v1  ;;  %v2900_v28 = vadd.f32 %v2868_v44, %v2836_v46  ;;  %v2674_v22 = vrot.slane %v1485_v37, 7 }
 0x22f   : > { %v3216_v50 = vadd.f32 %v5304_v56, %v3179_v41  ;;  %v2773_v30 = vrot.slane %v1678_v38, 1  ;;  %v5566_v17 = vpop.f32.mrf.mxu1  ;;  %v1682_v16 = vpop.f32.mrf.mxu0 }
 0x230   : > { %6167 = vst [vmem:[#allocation10_spill] sm:$0xff] %v5566_v17  ;;  %v3180_v53 = vmul.f32 %v5297_v40, %v3143_v27  ;;  %v3112_v13 = vadd.f32 %v5285_v52, %v2900_v28  ;;  %v2688_v51 = vsel %vm2681_vm2, %v2673_v54, %v2674_v22 }
 0x231   : > { %3248 = vst [vmem:[%s4470_s20 + $0x2b0] sm:$0xff] %v3216_v50  ;;  %v2787_v1 = vsel %vm2780_vm3, %v2772_v45, %v2773_v30  ;;  %v1491_v20 = vpop.f32.mrf.mxu1  ;;  %v1684_v57 = vpop.f32.mrf.mxu0  ;;  %v2870_v45 = vadd.f32 %v2688_v51, %v1676_v26 }
 0x232   : > { %v3217_v62 = vadd.f32 %v5304_v56, %v3180_v53  ;;  %v3144_v44 = vmax.f32 %v3112_v13, 0.0  ;;  %v2901_v33 = vadd.f32 %v2869_v48, %v2787_v1  ;;  %v2675_v21 = vrot.slane %v1491_v20, 7 }
 0x233   : > { %v2774_v58 = vrot.slane %v1684_v57, 1  ;;  %v5576_v41 = vpop.f32.mrf.mxu1  ;;  %v1686_v25 = vpop.f32.mrf.mxu0 }
 0x234   : > { %6168 = vst [vmem:[#allocation11_spill] sm:$0xff] %v5576_v41  ;;  %3249 = vst [vmem:[%s4470_s20 + $0x2d0] sm:$0xff] %v3217_v62  ;;  %v3181_v46 = vmul.f32 %v5297_v40, %v3144_v44  ;;  %v3113_v37 = vadd.f32 %v5285_v52, %v2901_v33  ;;  %v2687_v54 = vsel %vm2681_vm2, %v2674_v22, %v2675_v21 }
 0x235   : > { %v2740_v38 = vsel %vm2647_vm4, 0.0, %v2687_v54  ;;  %v2786_v27 = vsel %vm2780_vm3, %v2773_v30, %v2774_v58  ;;  %v1495_v48 = vpop.f32.mrf.mxu1  ;;  %v1688_v28 = vpop.f32.mrf.mxu0 }
 0x236   : > { %v3218_v50 = vadd.f32 %v5304_v56, %v3181_v46  ;;  %v3145_v53 = vmax.f32 %v3113_v37, 0.0  ;;  %v2871_v13 = vadd.f32 %v2740_v38, %v1682_v16  ;;  %v2838_v1 = vsel %vm2747_vm5, 0.0, %v2786_v27 }
 0x237   : > { %v2902_v20 = vadd.f32 %v2870_v45, %v2838_v1  ;;  %v2676_v57 = vrot.slane %v1495_v48, 7  ;;  %v2775_v62 = vrot.slane %v1688_v28, 1  ;;  %v5590_v22 = vpop.f32.mrf.mxu1  ;;  %v1692_v26 = vpop.f32.mrf.mxu0 }
 0x238   : > { %6169 = vst [vmem:[#allocation12_spill] sm:$0xff] %v5590_v22  ;;  %3250 = vst [vmem:[%s4470_s20 + $0x2f0] sm:$0xff] %v3218_v50  ;;  %v3182_v51 = vmul.f32 %v5297_v40, %v3145_v53 }
 0x239   : > { %v3114_v30 = vadd.f32 %v5285_v52, %v2902_v20  ;;  %v2785_v44 = vsel %vm2780_vm3, %v2774_v58, %v2775_v62  ;;  %v1501_v33 = vpop.f32.mrf.mxu1  ;;  %v1694_v16 = vpop.f32.mrf.mxu0  ;;  %v2686_v37 = vsel %vm2681_vm2, %v2675_v21, %v2676_v57 }
 0x23a   : > { %v3219_v46 = vadd.f32 %v5304_v56, %v3182_v51  ;;  %v2903_v54 = vadd.f32 %v2871_v13, %v2785_v44  ;;  %v2677_v45 = vrot.slane %v1501_v33, 7  ;;  %v2776_v27 = vrot.slane %v1694_v16, 1 }
 0x23b   : > { %v3146_v38 = vmax.f32 %v3114_v30, 0.0  ;;  %v5600_v48 = vpop.f32.mrf.mxu1  ;;  %v1696_v28 = vpop.f32.mrf.mxu0  ;;  %v2872_v1 = vadd.f32 %v2686_v37, %v1686_v25 }
 0x23c   : > { %6170 = vst [vmem:[#allocation13_spill] sm:$0xff] %v5600_v48  ;;  %3251 = vst [vmem:[%s4470_s20 + $0x310] sm:$0xff] %v3219_v46  ;;  %v3115_v50 = vadd.f32 %v5285_v52, %v2903_v54  ;;  %v2685_v58 = vsel %vm2681_vm2, %v2676_v57, %v2677_v45  ;;  %v2784_v13 = vsel %vm2780_vm3, %v2775_v62, %v2776_v27 }
 0x23d   : > { %v3183_v53 = vmul.f32 %v5297_v40, %v3146_v38  ;;  %v2742_v21 = vsel %vm2647_vm4, 0.0, %v2685_v58  ;;  %v1505_v20 = vpop.f32.mrf.mxu1  ;;  %v1698_v51 = vpop.f32.mrf.mxu0  ;;  %v2840_v33 = vsel %vm2747_vm5, 0.0, %v2784_v13 }
 0x23e   : > { %v3147_v30 = vmax.f32 %v3115_v50, 0.0  ;;  %v2873_v44 = vadd.f32 %v2742_v21, %v1692_v26  ;;  %v2678_v16 = vrot.slane %v1505_v20, 7  ;;  %v2904_v46 = vadd.f32 %v2872_v1, %v2840_v33 }
 0x23f   : > { %v3220_v57 = vadd.f32 %v5304_v56, %v3183_v53  ;;  %v2777_v54 = vrot.slane %v1698_v51, 1  ;;  %v5614_v38 = vpop.f32.mrf.mxu1  ;;  %v1702_v25 = vpop.f32.mrf.mxu0 }
 0x240   : > { %6171 = vst [vmem:[#allocation14_spill] sm:$0xff] %v5614_v38  ;;  %v3184_v37 = vmul.f32 %v5297_v40, %v3147_v30  ;;  %v3116_v62 = vadd.f32 %v5285_v52, %v2904_v46  ;;  %v2684_v26 = vsel %vm2681_vm2, %v2677_v45, %v2678_v16 }
 0x241   : > { %3252 = vst [vmem:[%s4470_s20 + $0x330] sm:$0xff] %v3220_v57  ;;  %v2783_v50 = vsel %vm2780_vm3, %v2776_v27, %v2777_v54  ;;  %v1511_v58 = vpop.f32.mrf.mxu1  ;;  %v1704_v21 = vpop.f32.mrf.mxu0  ;;  %v2874_v57 = vadd.f32 %v2684_v26, %v1696_v28 }
 0x242   : > { %v3221_v53 = vadd.f32 %v5304_v56, %v3184_v37  ;;  %v2905_v1 = vadd.f32 %v2873_v44, %v2783_v50  ;;  %v2679_v13 = vrot.slane %v1511_v58, 7  ;;  %v2778_v20 = vrot.slane %v1704_v21, 1 }
 0x243   : > { %v3148_v51 = vmax.f32 %v3116_v62, 0.0  ;;  %v5624_v33 = vpop.f32.mrf.mxu1  ;;  %v1706_v30 = vpop.f32.mrf.mxu0 }
 0x244   : > { %6172 = vst [vmem:[#allocation15_spill] sm:$0xff] %v5624_v33  ;;  %3253 = vst [vmem:[%s4470_s20 + $0x350] sm:$0xff] %v3221_v53  ;;  %v3117_v46 = vadd.f32 %v5285_v52, %v2905_v1  ;;  %v2683_v45 = vsel %vm2681_vm2, %v2678_v16, %v2679_v13  ;;  %v2782_v27 = vsel %vm2780_vm3, %v2777_v54, %v2778_v20 }
 0x245   : > { %v3185_v23 = vmul.f32 %v5297_v40, %v3148_v51  ;;  %v2744_v44 = vsel %vm2647_vm4, 0.0, %v2683_v45  ;;  %v2842_v37 = vsel %vm2747_vm5, 0.0, %v2782_v27  ;;  %v1515_v62 = vpop.f32.mrf.mxu1  ;;  %v1708_v50 = vpop.f32.mrf.mxu0 }
 0x246   : > { %v3149_v28 = vmax.f32 %v3117_v46, 0.0  ;;  %v2906_v26 = vadd.f32 %v2874_v57, %v2842_v37  ;;  %v2680_v58 = vrot.slane %v1515_v62, 7  ;;  %v2875_v16 = vadd.f32 %v2744_v44, %v1702_v25 }
 0x247   : > { %v3222_v21 = vadd.f32 %v5304_v56, %v3185_v23  ;;  %v2779_v53 = vrot.slane %v1708_v50, 1  ;;  %v3986_v1 = vpop.f32.mrf.mxu1  ;;  %v5638_v54 = vpop.f32.mrf.mxu0  ;;  %v5651_v23 = vld [vmem:[%s6156_s8] ss:$0 sm:$0xff] }
 0x248   : > { %v3186_v51 = vmul.f32 %v5297_v40, %v3149_v28  ;;  %v3118_v45 = vadd.f32 %v5285_v52, %v2906_v26  ;;  %v2682_v27 = vsel %vm2681_vm2, %v2679_v13, %v2680_v58  ;;  %v2713_v57 = vsel %vm2681_vm2, %v2680_v58, %v2649_v15 }
 0x249   : > { %3254 = vst [vmem:[%s4470_s20 + $0x370] sm:$0xff] %v3222_v21  ;;  %v2714_v25 = vsel %vm2647_vm4, 0.0, %v2713_v57  ;;  %v2876_v46 = vadd.f32 %v2682_v27, %v1706_v30  ;;  %v2781_v44 = vsel %vm2780_vm3, %v2778_v20, %v2779_v53  ;;  %v6173_v13 = vrot.slane %v5243_v11, 1  ;;  %v1745_v15 = vpop.f32.mrf.mxu1  ;;  %v5662_v37 = vpop.f32.mrf.mxu0 }
 0x24a   : > { %v3223_v62 = vadd.f32 %v5304_v56, %v3186_v51  ;;  %v3150_v50 = vmax.f32 %v3118_v45, 0.0  ;;  %v2845_v28 = vadd.f32 %v2714_v25, %v5236_v8  ;;  %v2907_v30 = vadd.f32 %v2875_v16, %v2781_v44  ;;  %v5677_v51 = vld [vmem:[%s6156_s8 + $0x1] ss:$0 sm:$0xff] }
 0x24b   : > { %v2812_v9 = vsel %vm2780_vm3, %v2779_v53, %v6173_v13  ;;  %v3266_v20 = vadd.f32 %v3986_v1, %v5651_v23  ;;  %v3987_v21 = vpop.f32.mrf.mxu1  ;;  %v5669_v11 = vpop.f32.mrf.mxu0  ;;  %v3264_v8 = vadd.f32 %v5651_v23, %v1745_v15 }
 0x24c   : > { %v2844_v26 = vsel %vm2747_vm5, 0.0, %v2812_v9  ;;  %3255 = vst [vmem:[%s4470_s20 + $0x390] sm:$0xff] %v3223_v62  ;;  %v3187_v12 = vmul.f32 %v5297_v40, %v3150_v50  ;;  %v2877_v53 = vadd.f32 %v2845_v28, %v5263_v39  ;;  %v3119_v55 = vadd.f32 %v5285_v52, %v2907_v30 }
 0x24d   : > { %v2908_v58 = vadd.f32 %v2876_v46, %v2844_v26  ;;  %v3298_v1 = vmax.f32 %v3266_v20, 0.0  ;;  %v3267_v45 = vadd.f32 %v3987_v21, %v5651_v23  ;;  %v1748_v27 = vpop.f32.mrf.mxu1  ;;  %v5683_v57 = vpop.f32.mrf.mxu0  ;;  %v5690_v46 = vld [vmem:[%s6156_s8 + $0x2] ss:$0 sm:$0xff]  ;;  %v3296_v44 = vmax.f32 %v3264_v8, 0.0 }
 0x24e   : > { %v3224_v39 = vadd.f32 %v5304_v56, %v3187_v12  ;;  %v3089_v25 = vadd.f32 %v5285_v52, %v2877_v53  ;;  %v3151_v13 = vmax.f32 %v3119_v55, 0.0 }
 0x24f   : > { %v3120_v16 = vadd.f32 %v5285_v52, %v2908_v58  ;;  %v3335_v15 = vmul.f32 %v5677_v51, %v3298_v1  ;;  %v3299_v62 = vmax.f32 %v3267_v45, 0.0  ;;  %v3990_v50 = vpop.f32.mrf.mxu1  ;;  %v5693_v28 = vpop.f32.mrf.mxu0  ;;  %v3333_v30 = vmul.f32 %v5677_v51, %v3296_v44 }
 0x250   : > { %3256 = vst [vmem:[%s4470_s20 + $0x3b0] sm:$0xff] %v3224_v39  ;;  %v3121_v26 = vmax.f32 %v3089_v25, 0.0  ;;  %v3265_v52 = vadd.f32 %v5651_v23, %v1748_v27  ;;  %v3188_v58 = vmul.f32 %v5297_v40, %v3151_v13  ;;  %v3270_v45 = vadd.f32 %v3990_v50, %v5651_v23 }
 0x251   : > { %v3152_v9 = vmax.f32 %v3120_v16, 0.0  ;;  %v3372_v21 = vadd.f32 %v5690_v46, %v3335_v15  ;;  %v3336_v12 = vmul.f32 %v5677_v51, %v3299_v62  ;;  %v1761_v53 = vpop.f32.mrf.mxu1  ;;  %v5702_v8 = vpop.f32.mrf.mxu0  ;;  %v3370_v16 = vadd.f32 %v5690_v46, %v3333_v30 }
 0x252   : > { %v3158_v55 = vmul.f32 %v5297_v40, %v3121_v26  ;;  %v3297_v1 = vmax.f32 %v3265_v52, 0.0  ;;  %v3225_v27 = vadd.f32 %v5304_v56, %v3188_v58  ;;  %v3302_v62 = vmax.f32 %v3270_v45, 0.0 }
 0x253   : > { %v3189_v20 = vmul.f32 %v5297_v40, %v3152_v9  ;;  %3404 = vst [vmem:[%s4470_s20 + $0x58] sm:$0xff] %v3372_v21  ;;  %v3373_v25 = vadd.f32 %v5690_v46, %v3336_v12  ;;  %v3991_v44 = vpop.f32.mrf.mxu1  ;;  %v5711_v13 = vpop.f32.mrf.mxu0  ;;  %v4246_v40 = vld [vmem:[%s6155_s7 + $0x2] ss:$0 sm:$0xff]  ;;  %3402 = vst [vmem:[%s4470_s20 + $0x18] sm:$0xff] %v3370_v16  ;;  %v3268_v50 = vadd.f32 %v5651_v23, %v1761_v53 }
 0x254   : > { %v3195_v9 = vadd.f32 %v4246_v40, %v3158_v55  ;;  %v3334_v15 = vmul.f32 %v5677_v51, %v3297_v1  ;;  %3257 = vst [vmem:[%s4470_s20 + $0x3d0] sm:$0xff] %v3225_v27  ;;  %v3339_v58 = vmul.f32 %v5677_v51, %v3302_v62 }
 0x255   : > { %v3226_v39 = vadd.f32 %v5304_v56, %v3189_v20  ;;  %3405 = vst [vmem:[%s4470_s20 + $0x78] sm:$0xff] %v3373_v25  ;;  %v3271_v56 = vadd.f32 %v3991_v44, %v5651_v23  ;;  %v1764_v26 = vpop.f32.mrf.mxu1  ;;  %v5723_v30 = vpop.f32.mrf.mxu0  ;;  %v3300_v20 = vmax.f32 %v3268_v50, 0.0 }
 0x256   : > { %3227 = vst [vmem:[%s4470_s20 + $0x10] sm:$0xff] %v3195_v9  ;;  %v3371_v52 = vadd.f32 %v5690_v46, %v3334_v15  ;;  %v3269_v21 = vadd.f32 %v5651_v23, %v1764_v26  ;;  %v3376_v16 = vadd.f32 %v5690_v46, %v3339_v58 }
 0x257   : > { %3258 = vst [vmem:[%s4470_s20 + $0x3f0] sm:$0xff] %v3226_v39  ;;  %v3303_v12 = vmax.f32 %v3271_v56, 0.0  ;;  %v3994_v55 = vpop.f32.mrf.mxu1  ;;  %v5729_v53 = vpop.f32.mrf.mxu0  ;;  %v3337_v1 = vmul.f32 %v5677_v51, %v3300_v20 }
 0x258   : > { %3403 = vst [vmem:[%s4470_s20 + $0x38] sm:$0xff] %v3371_v52  ;;  %v3301_v45 = vmax.f32 %v3269_v21, 0.0  ;;  %v3274_v27 = vadd.f32 %v3994_v55, %v5651_v23  ;;  %3408 = vst [vmem:[%s4470_s20 + $0xd8] sm:$0xff] %v3376_v16 }
 0x259   : > { %v3340_v39 = vmul.f32 %v5677_v51, %v3303_v12  ;;  %v1777_v25 = vpop.f32.mrf.mxu1  ;;  %v5736_v44 = vpop.f32.mrf.mxu0  ;;  %v3374_v40 = vadd.f32 %v5690_v46, %v3337_v1 }
 0x25a   : > { %v3338_v9 = vmul.f32 %v5677_v51, %v3301_v45  ;;  %v3306_v15 = vmax.f32 %v3274_v27, 0.0  ;;  %v3272_v62 = vadd.f32 %v5651_v23, %v1777_v25 }
 0x25b   : > { %v3377_v50 = vadd.f32 %v5690_v46, %v3340_v39  ;;  %v3995_v56 = vpop.f32.mrf.mxu1  ;;  %v5743_v26 = vpop.f32.mrf.mxu0  ;;  %3406 = vst [vmem:[%s4470_s20 + $0x98] sm:$0xff] %v3374_v40 }
 0x25c   : > { %v3375_v52 = vadd.f32 %v5690_v46, %v3338_v9  ;;  %v3343_v58 = vmul.f32 %v5677_v51, %v3306_v15  ;;  %v3304_v20 = vmax.f32 %v3272_v62, 0.0  ;;  %v3275_v21 = vadd.f32 %v3995_v56, %v5651_v23 }
 0x25d   : > { %3409 = vst [vmem:[%s4470_s20 + $0xf8] sm:$0xff] %v3377_v50  ;;  %v1780_v12 = vpop.f32.mrf.mxu1  ;;  %v5750_v55 = vpop.f32.mrf.mxu0 }
 0x25e   : > { %3407 = vst [vmem:[%s4470_s20 + $0xb8] sm:$0xff] %v3375_v52  ;;  %v3380_v16 = vadd.f32 %v5690_v46, %v3343_v58  ;;  %v3341_v1 = vmul.f32 %v5677_v51, %v3304_v20  ;;  %v3307_v45 = vmax.f32 %v3275_v21, 0.0  ;;  %v3273_v27 = vadd.f32 %v5651_v23, %v1780_v12 }
 0x25f   : > { %v3998_v39 = vpop.f32.mrf.mxu1  ;;  %v5756_v25 = vpop.f32.mrf.mxu0 }
 0x260   : > { %3412 = vst [vmem:[%s4470_s20 + $0x158] sm:$0xff] %v3380_v16  ;;  %v3378_v40 = vadd.f32 %v5690_v46, %v3341_v1  ;;  %v3344_v9 = vmul.f32 %v5677_v51, %v3307_v45  ;;  %v3305_v15 = vmax.f32 %v3273_v27, 0.0  ;;  %v3278_v62 = vadd.f32 %v3998_v39, %v5651_v23 }
 0x261   : > { %v1793_v50 = vpop.f32.mrf.mxu1  ;;  %v5762_v56 = vpop.f32.mrf.mxu0 }
 0x262   : > { %3410 = vst [vmem:[%s4470_s20 + $0x118] sm:$0xff] %v3378_v40  ;;  %v3381_v52 = vadd.f32 %v5690_v46, %v3344_v9  ;;  %v3342_v58 = vmul.f32 %v5677_v51, %v3305_v15  ;;  %v3310_v20 = vmax.f32 %v3278_v62, 0.0  ;;  %v3276_v21 = vadd.f32 %v5651_v23, %v1793_v50 }
 0x263   : > { %v3999_v12 = vpop.f32.mrf.mxu1  ;;  %v5768_v16 = vpop.f32.mrf.mxu0 }
 0x264   : > { %3413 = vst [vmem:[%s4470_s20 + $0x178] sm:$0xff] %v3381_v52  ;;  %v3379_v1 = vadd.f32 %v5690_v46, %v3342_v58  ;;  %v3347_v45 = vmul.f32 %v5677_v51, %v3310_v20  ;;  %v3308_v27 = vmax.f32 %v3276_v21, 0.0  ;;  %v3279_v39 = vadd.f32 %v3999_v12, %v5651_v23 }
 0x265   : > { %v1796_v40 = vpop.f32.mrf.mxu1  ;;  %v5774_v9 = vpop.f32.mrf.mxu0 }
 0x266   : > { %3411 = vst [vmem:[%s4470_s20 + $0x138] sm:$0xff] %v3379_v1  ;;  %v3384_v15 = vadd.f32 %v5690_v46, %v3347_v45  ;;  %v3345_v62 = vmul.f32 %v5677_v51, %v3308_v27  ;;  %v3311_v50 = vmax.f32 %v3279_v39, 0.0  ;;  %v3277_v48 = vadd.f32 %v5651_v23, %v1796_v40 }
 0x267   : > { %v4002_v52 = vpop.f32.mrf.mxu1  ;;  %v5780_v58 = vpop.f32.mrf.mxu0 }
 0x268   : > { %3416 = vst [vmem:[%s4470_s20 + $0x1d8] sm:$0xff] %v3384_v15  ;;  %v3382_v20 = vadd.f32 %v5690_v46, %v3345_v62  ;;  %v3348_v21 = vmul.f32 %v5677_v51, %v3311_v50  ;;  %v3309_v12 = vmax.f32 %v3277_v48, 0.0  ;;  %v3282_v33 = vadd.f32 %v4002_v52, %v5651_v23 }
 0x269   : > { %v1809_v1 = vpop.f32.mrf.mxu1  ;;  %v5786_v45 = vpop.f32.mrf.mxu0 }
 0x26a   : > { %3414 = vst [vmem:[%s4470_s20 + $0x198] sm:$0xff] %v3382_v20  ;;  %v3385_v27 = vadd.f32 %v5690_v46, %v3348_v21  ;;  %v3346_v39 = vmul.f32 %v5677_v51, %v3309_v12  ;;  %v3314_v40 = vmax.f32 %v3282_v33, 0.0  ;;  %v3280_v22 = vadd.f32 %v5651_v23, %v1809_v1 }
 0x26b   : > { %v4003_v15 = vpop.f32.mrf.mxu1  ;;  %v5792_v62 = vpop.f32.mrf.mxu0 }
 0x26c   : > { %3417 = vst [vmem:[%s4470_s20 + $0x1f8] sm:$0xff] %v3385_v27  ;;  %v3383_v48 = vadd.f32 %v5690_v46, %v3346_v39  ;;  %v3351_v50 = vmul.f32 %v5677_v51, %v3314_v40  ;;  %v3312_v52 = vmax.f32 %v3280_v22, 0.0  ;;  %v3283_v38 = vadd.f32 %v4003_v15, %v5651_v23 }
 0x26d   : > { %v1812_v20 = vpop.f32.mrf.mxu1  ;;  %v5798_v21 = vpop.f32.mrf.mxu0 }
 0x26e   : > { %3415 = vst [vmem:[%s4470_s20 + $0x1b8] sm:$0xff] %v3383_v48  ;;  %v3388_v33 = vadd.f32 %v5690_v46, %v3351_v50  ;;  %v3349_v12 = vmul.f32 %v5677_v51, %v3312_v52  ;;  %v3315_v1 = vmax.f32 %v3283_v38, 0.0  ;;  %v3281_v2 = vadd.f32 %v5651_v23, %v1812_v20 }
 0x26f   : > { %v4006_v27 = vpop.f32.mrf.mxu1  ;;  %v5804_v39 = vpop.f32.mrf.mxu0 }
 0x270   : > { %3420 = vst [vmem:[%s4470_s20 + $0x258] sm:$0xff] %v3388_v33  ;;  %v3386_v22 = vadd.f32 %v5690_v46, %v3349_v12  ;;  %v3352_v40 = vmul.f32 %v5677_v51, %v3315_v1  ;;  %v3313_v15 = vmax.f32 %v3281_v2, 0.0  ;;  %v3286_v41 = vadd.f32 %v4006_v27, %v5651_v23 }
 0x271   : > { %v1825_v48 = vpop.f32.mrf.mxu1  ;;  %v5810_v50 = vpop.f32.mrf.mxu0 }
 0x272   : > { %3418 = vst [vmem:[%s4470_s20 + $0x218] sm:$0xff] %v3386_v22  ;;  %v3389_v38 = vadd.f32 %v5690_v46, %v3352_v40  ;;  %v3350_v52 = vmul.f32 %v5677_v51, %v3313_v15  ;;  %v3318_v20 = vmax.f32 %v3286_v41, 0.0  ;;  %v3284_v59 = vadd.f32 %v5651_v23, %v1825_v48 }
 0x273   : > { %v4007_v33 = vpop.f32.mrf.mxu1  ;;  %v5816_v12 = vpop.f32.mrf.mxu0 }
 0x274   : > { %6174 = vst [vmem:[#allocation16_spill] sm:$0xff] %v5816_v12  ;;  %3421 = vst [vmem:[%s4470_s20 + $0x278] sm:$0xff] %v3389_v38  ;;  %v3387_v2 = vadd.f32 %v5690_v46, %v3350_v52  ;;  %v3355_v1 = vmul.f32 %v5677_v51, %v3318_v20  ;;  %v3316_v27 = vmax.f32 %v3284_v59, 0.0  ;;  %v3287_v17 = vadd.f32 %v4007_v33, %v5651_v23 }
 0x275   : > { %v1828_v22 = vpop.f32.mrf.mxu1  ;;  %v5822_v40 = vpop.f32.mrf.mxu0 }
 0x276   : > { %6175 = vst [vmem:[#allocation17_spill] sm:$0xff] %v5822_v40  ;;  %3419 = vst [vmem:[%s4470_s20 + $0x238] sm:$0xff] %v3387_v2  ;;  %v3392_v41 = vadd.f32 %v5690_v46, %v3355_v1  ;;  %v3353_v15 = vmul.f32 %v5677_v51, %v3316_v27  ;;  %v3319_v48 = vmax.f32 %v3287_v17, 0.0  ;;  %v3285_v29 = vadd.f32 %v5651_v23, %v1828_v22 }
 0x277   : > { %v4010_v38 = vpop.f32.mrf.mxu1  ;;  %v5828_v52 = vpop.f32.mrf.mxu0 }
 0x278   : > { %6176 = vst [vmem:[#allocation18_spill] sm:$0xff] %v5828_v52  ;;  %3424 = vst [vmem:[%s4470_s20 + $0x2d8] sm:$0xff] %v3392_v41  ;;  %v3390_v59 = vadd.f32 %v5690_v46, %v3353_v15  ;;  %v3356_v20 = vmul.f32 %v5677_v51, %v3319_v48  ;;  %v3317_v33 = vmax.f32 %v3285_v29, 0.0  ;;  %v3290_v40 = vadd.f32 %v4010_v38, %v5651_v23 }
 0x279   : > { %v1841_v2 = vpop.f32.mrf.mxu1  ;;  %v5834_v1 = vpop.f32.mrf.mxu0 }
 0x27a   : > { %6177 = vst [vmem:[#allocation19_spill] sm:$0xff] %v5834_v1  ;;  %3422 = vst [vmem:[%s4470_s20 + $0x298] sm:$0xff] %v3390_v59  ;;  %v3393_v17 = vadd.f32 %v5690_v46, %v3356_v20  ;;  %v3354_v27 = vmul.f32 %v5677_v51, %v3317_v33  ;;  %v3322_v22 = vmax.f32 %v3290_v40, 0.0  ;;  %v3288_v52 = vadd.f32 %v5651_v23, %v1841_v2 }
 0x27b   : > { %v4011_v41 = vpop.f32.mrf.mxu1  ;;  %v5840_v15 = vpop.f32.mrf.mxu0 }
 0x27c   : > { %6178 = vst [vmem:[#allocation20_spill] sm:$0xff] %v5840_v15  ;;  %3425 = vst [vmem:[%s4470_s20 + $0x2f8] sm:$0xff] %v3393_v17  ;;  %v3391_v29 = vadd.f32 %v5690_v46, %v3354_v27  ;;  %v3359_v48 = vmul.f32 %v5677_v51, %v3322_v22  ;;  %v3320_v38 = vmax.f32 %v3288_v52, 0.0  ;;  %v3291_v1 = vadd.f32 %v4011_v41, %v5651_v23 }
 0x27d   : > { %v1844_v59 = vpop.f32.mrf.mxu1  ;;  %v5846_v20 = vpop.f32.mrf.mxu0 }
 0x27e   : > { %6179 = vst [vmem:[#allocation21_spill] sm:$0xff] %v5846_v20  ;;  %3423 = vst [vmem:[%s4470_s20 + $0x2b8] sm:$0xff] %v3391_v29  ;;  %v3396_v40 = vadd.f32 %v5690_v46, %v3359_v48  ;;  %v3357_v33 = vmul.f32 %v5677_v51, %v3320_v38  ;;  %v3323_v2 = vmax.f32 %v3291_v1, 0.0  ;;  %v3289_v15 = vadd.f32 %v5651_v23, %v1844_v59 }
 0x27f   : > { %v4014_v17 = vpop.f32.mrf.mxu1  ;;  %v5852_v27 = vpop.f32.mrf.mxu0 }
 0x280   : > { %6180 = vst [vmem:[#allocation22_spill] sm:$0xff] %v5852_v27  ;;  %3428 = vst [vmem:[%s4470_s20 + $0x358] sm:$0xff] %v3396_v40  ;;  %v3394_v52 = vadd.f32 %v5690_v46, %v3357_v33  ;;  %v3360_v22 = vmul.f32 %v5677_v51, %v3323_v2  ;;  %v3321_v41 = vmax.f32 %v3289_v15, 0.0  ;;  %v3294_v20 = vadd.f32 %v4014_v17, %v5651_v23 }
 0x281   : > { %v1857_v29 = vpop.f32.mrf.mxu1  ;;  %v5858_v12 = vpop.f32.mrf.mxu0 }
 0x282   : > { %3426 = vst [vmem:[%s4470_s20 + $0x318] sm:$0xff] %v3394_v52  ;;  %v3397_v1 = vadd.f32 %v5690_v46, %v3360_v22  ;;  %v3358_v48 = vmul.f32 %v5677_v51, %v3321_v41  ;;  %v3326_v38 = vmax.f32 %v3294_v20, 0.0  ;;  %v3292_v59 = vadd.f32 %v5651_v23, %v1857_v29 }
 0x283   : > { %v4015_v40 = vpop.f32.mrf.mxu1  ;;  %v5864_v27 = vpop.f32.mrf.mxu0  ;;  %v2227_v52 = vadd.f32 %v5638_v54, %v5256_v35  ;;  %v2225_v20 = vadd.f32 %v5662_v37, %v5234_v7  ;;  %v2226_v35 = vadd.f32 %v5683_v57, %v5247_v14  ;;  %v2231_v7 = vadd.f32 %v5693_v28, %v5320_v10 }
 0x284   : > { %3429 = vst [vmem:[%s4470_s20 + $0x378] sm:$0xff] %v3397_v1  ;;  %v3395_v15 = vadd.f32 %v5690_v46, %v3358_v48  ;;  %v3363_v33 = vmul.f32 %v5677_v51, %v3326_v38  ;;  %v3324_v2 = vmax.f32 %v3292_v59, 0.0  ;;  %v3295_v17 = vadd.f32 %v4015_v40, %v5651_v23  ;;  %v5891_v40 = vld [vmem:[%s6154_s6] ss:$0 sm:$0xff] }
 0x285   : > { %v1860_v22 = vpop.f32.mrf.mxu1  ;;  %v5874_v41 = vpop.f32.mrf.mxu0  ;;  %v2228_v59 = vadd.f32 %v5669_v11, %v5272_v42  ;;  %v2229_v54 = vadd.f32 %v5702_v8, %v5287_v31  ;;  %v2232_v10 = vadd.f32 %v5711_v13, %v5332_v43  ;;  %v2230_v31 = vadd.f32 %v5723_v30, %v5307_v60 }
 0x286   : > { %3427 = vst [vmem:[%s4470_s20 + $0x338] sm:$0xff] %v3395_v15  ;;  %v3400_v29 = vadd.f32 %v5690_v46, %v3363_v33  ;;  %v3361_v1 = vmul.f32 %v5677_v51, %v3324_v2  ;;  %v3327_v48 = vmax.f32 %v3295_v17, 0.0  ;;  %v3293_v38 = vadd.f32 %v5651_v23, %v1860_v22 }
 0x287   : > { %v4066_v37 = vpop.f32.mrf.mxu0  ;;  %v4070_v23 = vpop.f32.mrf.mxu1  ;;  %v2235_v28 = vadd.f32 %v5729_v53, %v5371_v36  ;;  %v2233_v43 = vadd.f32 %v5736_v44, %v5345_v0  ;;  %v2236_v60 = vadd.f32 %v5743_v26, %v5383_v5  ;;  %v5913_v36 = vld [vmem:[%s6154_s6 + $0x1] ss:$0 sm:$0xff]  ;;  %v2234_v5 = vadd.f32 %v5750_v55, %v5357_v34  ;;  %v5924_v26 = vld [vmem:[%s6154_s6 + $0x2] ss:$0 sm:$0xff] }
 0x288   : > { %3432 = vst [vmem:[%s4470_s20 + $0x3d8] sm:$0xff] %v3400_v29  ;;  %v3398_v42 = vadd.f32 %v5690_v46, %v3361_v1  ;;  %v3364_v11 = vmul.f32 %v5677_v51, %v3327_v48  ;;  %v3325_v14 = vmax.f32 %v3293_v38, 0.0  ;;  %v2614_v57 = vadd.f32 %v4066_v37, %v2227_v52 }
 0x289   : > { %v2618_v8 = vadd.f32 %v4070_v23, %v2231_v7  ;;  %v2485_v15 = vpop.f32.mrf.mxu0  ;;  %v2501_v33 = vpop.f32.mrf.mxu1 }
 0x28a   : > { %3430 = vst [vmem:[%s4470_s20 + $0x398] sm:$0xff] %v3398_v42  ;;  %v3401_v2 = vadd.f32 %v5690_v46, %v3364_v11  ;;  %v3362_v17 = vmul.f32 %v5677_v51, %v3325_v14  ;;  %v2916_v52 = vadd.f32 %v5891_v40, %v2614_v57  ;;  %v2612_v22 = vadd.f32 %v2485_v15, %v2225_v20 }
 0x28b   : > { %v2920_v13 = vadd.f32 %v5891_v40, %v2618_v8  ;;  %v2616_v30 = vadd.f32 %v2501_v33, %v2229_v54  ;;  %v4067_v53 = vpop.f32.mrf.mxu0  ;;  %v4071_v51 = vpop.f32.mrf.mxu1 }
 0x28c   : > { %3433 = vst [vmem:[%s4470_s20 + $0x3f8] sm:$0xff] %v3401_v2  ;;  %v3399_v20 = vadd.f32 %v5690_v46, %v3362_v17  ;;  %v2948_v29 = vmax.f32 %v2916_v52, 0.0  ;;  %v2914_v0 = vadd.f32 %v5891_v40, %v2612_v22  ;;  %v2615_v44 = vadd.f32 %v4067_v53, %v2228_v59 }
 0x28d   : > { %v2952_v1 = vmax.f32 %v2920_v13, 0.0  ;;  %v2918_v48 = vadd.f32 %v5891_v40, %v2616_v30  ;;  %v2619_v38 = vadd.f32 %v4071_v51, %v2232_v10  ;;  %v2488_v7 = vpop.f32.mrf.mxu0  ;;  %v2504_v54 = vpop.f32.mrf.mxu1 }
 0x28e   : > { %3431 = vst [vmem:[%s4470_s20 + $0x3b8] sm:$0xff] %v3399_v20  ;;  %v2985_v46 = vmul.f32 %v5913_v36, %v2948_v29  ;;  %v2946_v37 = vmax.f32 %v2914_v0, 0.0  ;;  %v2917_v59 = vadd.f32 %v5891_v40, %v2615_v44  ;;  %v2613_v23 = vadd.f32 %v2488_v7, %v2226_v35 }
 0x28f   : > { %v2989_v34 = vmul.f32 %v5913_v36, %v2952_v1  ;;  %v2950_v55 = vmax.f32 %v2918_v48, 0.0  ;;  %v2921_v42 = vadd.f32 %v5891_v40, %v2619_v38  ;;  %v2617_v11 = vadd.f32 %v2504_v54, %v2230_v31  ;;  %v4074_v14 = vpop.f32.mrf.mxu1 }
 0x290   : > { %v3022_v57 = vadd.f32 %v5924_v26, %v2985_v46  ;;  %v2983_v10 = vmul.f32 %v5913_v36, %v2946_v37  ;;  %v2949_v8 = vmax.f32 %v2917_v59, 0.0  ;;  %v2915_v15 = vadd.f32 %v5891_v40, %v2613_v23 }
 0x291   : > { %v3026_v33 = vadd.f32 %v5924_v26, %v2989_v34  ;;  %v2987_v35 = vmul.f32 %v5913_v36, %v2950_v55  ;;  %v2953_v2 = vmax.f32 %v2921_v42, 0.0  ;;  %v2919_v17 = vadd.f32 %v5891_v40, %v2617_v11  ;;  %v2517_v52 = vpop.f32.mrf.mxu1 }
 0x292   : > { %3054 = vst [vmem:[%s4470_s20 + $0x48] sm:$0xff] %v3022_v57  ;;  %v3020_v31 = vadd.f32 %v5924_v26, %v2983_v10  ;;  %v2986_v22 = vmul.f32 %v5913_v36, %v2949_v8  ;;  %v2947_v13 = vmax.f32 %v2915_v15, 0.0  ;;  %v2622_v30 = vadd.f32 %v4074_v14, %v2235_v28 }
 0x293   : > { %3058 = vst [vmem:[%s4470_s20 + $0xc8] sm:$0xff] %v3026_v33  ;;  %v3024_v53 = vadd.f32 %v5924_v26, %v2987_v35  ;;  %v2990_v51 = vmul.f32 %v5913_v36, %v2953_v2  ;;  %v2951_v20 = vmax.f32 %v2919_v17, 0.0  ;;  %v2620_v29 = vadd.f32 %v2517_v52, %v2233_v43  ;;  %v4075_v0 = vpop.f32.mrf.mxu1 }
 0x294   : > { %3052 = vst [vmem:[%s4470_s20 + $0x8] sm:$0xff] %v3020_v31  ;;  %v3023_v44 = vadd.f32 %v5924_v26, %v2986_v22  ;;  %v2984_v1 = vmul.f32 %v5913_v36, %v2947_v13  ;;  %v2924_v48 = vadd.f32 %v5891_v40, %v2622_v30  ;;  %v2623_v38 = vadd.f32 %v4075_v0, %v2236_v60 }
 0x295   : > { %v2239_v28 = vadd.f32 %v5756_v25, %v5422_v18  ;;  %3056 = vst [vmem:[%s4470_s20 + $0x88] sm:$0xff] %v3024_v53  ;;  %v3027_v7 = vadd.f32 %v5924_v26, %v2990_v51  ;;  %v2988_v54 = vmul.f32 %v5913_v36, %v2951_v20  ;;  %v2922_v43 = vadd.f32 %v5891_v40, %v2620_v29  ;;  %v2520_v46 = vpop.f32.mrf.mxu1 }
 0x296   : > { %3055 = vst [vmem:[%s4470_s20 + $0x68] sm:$0xff] %v3023_v44  ;;  %v3021_v37 = vadd.f32 %v5924_v26, %v2984_v1  ;;  %v2956_v59 = vmax.f32 %v2924_v48, 0.0  ;;  %v2925_v23 = vadd.f32 %v5891_v40, %v2623_v38  ;;  %v2621_v60 = vadd.f32 %v2520_v46, %v2234_v5 }
 0x297   : > { %3059 = vst [vmem:[%s4470_s20 + $0xe8] sm:$0xff] %v3027_v7  ;;  %v3025_v34 = vadd.f32 %v5924_v26, %v2988_v54  ;;  %v2954_v18 = vmax.f32 %v2922_v43, 0.0  ;;  %v4078_v25 = vpop.f32.mrf.mxu1  ;;  %v2237_v57 = vadd.f32 %v5762_v56, %v5397_v47  ;;  %v2240_v10 = vadd.f32 %v5768_v16, %v5432_v49 }
 0x298   : > { %3053 = vst [vmem:[%s4470_s20 + $0x28] sm:$0xff] %v3021_v37  ;;  %v2993_v55 = vmul.f32 %v5913_v36, %v2956_v59  ;;  %v2957_v42 = vmax.f32 %v2925_v23, 0.0  ;;  %v2923_v11 = vadd.f32 %v5891_v40, %v2621_v60  ;;  %v2626_v14 = vadd.f32 %v4078_v25, %v2239_v28 }
 0x299   : > { %3057 = vst [vmem:[%s4470_s20 + $0xa8] sm:$0xff] %v3025_v34  ;;  %v2991_v5 = vmul.f32 %v5913_v36, %v2954_v18  ;;  %v2533_v8 = vpop.f32.mrf.mxu1  ;;  %v2238_v17 = vadd.f32 %v5774_v9, %v5408_v63  ;;  %v2243_v13 = vadd.f32 %v5780_v58, %v5470_v6  ;;  %v2241_v29 = vadd.f32 %v5786_v45, %v5446_v61 }
 0x29a   : > { %v3030_v15 = vadd.f32 %v5924_v26, %v2993_v55  ;;  %v2994_v33 = vmul.f32 %v5913_v36, %v2957_v42  ;;  %v2955_v35 = vmax.f32 %v2923_v11, 0.0  ;;  %v2928_v2 = vadd.f32 %v5891_v40, %v2626_v14 }
 0x29b   : > { %v3028_v47 = vadd.f32 %v5924_v26, %v2991_v5  ;;  %v2624_v56 = vadd.f32 %v2533_v8, %v2237_v57  ;;  %v4079_v49 = vpop.f32.mrf.mxu1  ;;  %v2244_v43 = vadd.f32 %v5792_v62, %v5480_v4  ;;  %v2242_v46 = vadd.f32 %v5798_v21, %v5456_v24  ;;  %v6181_v8 = vld [vmem:[#allocation16_spill] sm:$0xff] }
 0x29c   : > { %3062 = vst [vmem:[%s4470_s20 + $0x148] sm:$0xff] %v3030_v15  ;;  %v3031_v16 = vadd.f32 %v5924_v26, %v2994_v33  ;;  %v2992_v52 = vmul.f32 %v5913_v36, %v2955_v35  ;;  %v2960_v31 = vmax.f32 %v2928_v2, 0.0  ;;  %v2627_v22 = vadd.f32 %v4079_v49, %v2240_v10 }
 0x29d   : > { %3060 = vst [vmem:[%s4470_s20 + $0x108] sm:$0xff] %v3028_v47  ;;  %v2926_v30 = vadd.f32 %v5891_v40, %v2624_v56  ;;  %v2536_v53 = vpop.f32.mrf.mxu1  ;;  %v2247_v25 = vadd.f32 %v5804_v39, %v5518_v32  ;;  %v2245_v11 = vadd.f32 %v5810_v50, %v5494_v3  ;;  %v2248_v15 = vadd.f32 %v6181_v8, %v5528_v19 }
 0x29e   : > { %3063 = vst [vmem:[%s4470_s20 + $0x168] sm:$0xff] %v3031_v16  ;;  %v3029_v63 = vadd.f32 %v5924_v26, %v2992_v52  ;;  %v2997_v9 = vmul.f32 %v5913_v36, %v2960_v31  ;;  %v2929_v51 = vadd.f32 %v5891_v40, %v2627_v22  ;;  %v2625_v20 = vadd.f32 %v2536_v53, %v2238_v17  ;;  %v6182_v31 = vld [vmem:[#allocation7_spill] sm:$0xff]  ;;  %v6183_v22 = vld [vmem:[#allocation17_spill] sm:$0xff]  ;;  %v6185_v53 = vld [vmem:[#allocation18_spill] sm:$0xff] }
 0x29f   : > { %v2958_v0 = vmax.f32 %v2926_v30, 0.0  ;;  %v4082_v44 = vpop.f32.mrf.mxu1  ;;  %v6184_v30 = vld [vmem:[#allocation10_spill] sm:$0xff] }
 0x2a0   : > { %3061 = vst [vmem:[%s4470_s20 + $0x128] sm:$0xff] %v3029_v63  ;;  %v3034_v6 = vadd.f32 %v5924_v26, %v2997_v9  ;;  %v2961_v58 = vmax.f32 %v2929_v51, 0.0  ;;  %v2927_v1 = vadd.f32 %v5891_v40, %v2625_v20  ;;  %v2630_v48 = vadd.f32 %v4082_v44, %v2243_v13 }
 0x2a1   : > { %v2995_v38 = vmul.f32 %v5913_v36, %v2958_v0  ;;  %v2549_v28 = vpop.f32.mrf.mxu1  ;;  %v2246_v13 = vadd.f32 %v6183_v22, %v6182_v31  ;;  %v2251_v63 = vadd.f32 %v6185_v53, %v6184_v30 }
 0x2a2   : > { %3066 = vst [vmem:[%s4470_s20 + $0x1c8] sm:$0xff] %v3034_v6  ;;  %v2998_v7 = vmul.f32 %v5913_v36, %v2961_v58  ;;  %v2959_v54 = vmax.f32 %v2927_v1, 0.0  ;;  %v2932_v61 = vadd.f32 %v5891_v40, %v2630_v48  ;;  %v2628_v45 = vadd.f32 %v2549_v28, %v2241_v29  ;;  %v6186_v6 = vld [vmem:[#allocation8_spill] sm:$0xff]  ;;  %v6187_v58 = vld [vmem:[#allocation19_spill] sm:$0xff] }
 0x2a3   : > { %v3032_v37 = vadd.f32 %v5924_v26, %v2995_v38  ;;  %v4083_v59 = vpop.f32.mrf.mxu1  ;;  %v2249_v1 = vadd.f32 %v6187_v58, %v6186_v6 }
 0x2a4   : > { %v3035_v23 = vadd.f32 %v5924_v26, %v2998_v7  ;;  %v2996_v60 = vmul.f32 %v5913_v36, %v2959_v54  ;;  %v2964_v34 = vmax.f32 %v2932_v61, 0.0  ;;  %v2930_v18 = vadd.f32 %v5891_v40, %v2628_v45  ;;  %v6188_v45 = vld [vmem:[#allocation11_spill] sm:$0xff] }
 0x2a5   : > { %3064 = vst [vmem:[%s4470_s20 + $0x188] sm:$0xff] %v3032_v37  ;;  %v2631_v55 = vadd.f32 %v4083_v59, %v2244_v43  ;;  %v2552_v4 = vpop.f32.mrf.mxu1  ;;  %v6189_v43 = vld [vmem:[#allocation20_spill] sm:$0xff] }
 0x2a6   : > { %3067 = vst [vmem:[%s4470_s20 + $0x1e8] sm:$0xff] %v3035_v23  ;;  %v3033_v24 = vadd.f32 %v5924_v26, %v2996_v60  ;;  %v3001_v62 = vmul.f32 %v5913_v36, %v2964_v34  ;;  %v2962_v21 = vmax.f32 %v2930_v18, 0.0  ;;  %v2629_v42 = vadd.f32 %v2552_v4, %v2242_v46 }
 0x2a7   : > { %v2933_v14 = vadd.f32 %v5891_v40, %v2631_v55  ;;  %v4086_v57 = vpop.f32.mrf.mxu1  ;;  %v2252_v46 = vadd.f32 %v6189_v43, %v6188_v45  ;;  %v6191_v55 = vld [vmem:[#allocation21_spill] sm:$0xff] }
 0x2a8   : > { %3065 = vst [vmem:[%s4470_s20 + $0x1a8] sm:$0xff] %v3033_v24  ;;  %v3038_v32 = vadd.f32 %v5924_v26, %v3001_v62  ;;  %v2999_v39 = vmul.f32 %v5913_v36, %v2962_v21  ;;  %v2931_v10 = vadd.f32 %v5891_v40, %v2629_v42  ;;  %v2634_v5 = vadd.f32 %v4086_v57, %v2247_v25  ;;  %v6190_v25 = vld [vmem:[#allocation9_spill] sm:$0xff] }
 0x2a9   : > { %v2965_v33 = vmax.f32 %v2933_v14, 0.0  ;;  %v2565_v35 = vpop.f32.mrf.mxu1  ;;  %v2250_v4 = vadd.f32 %v6191_v55, %v6190_v25 }
 0x2aa   : > { %3070 = vst [vmem:[%s4470_s20 + $0x248] sm:$0xff] %v3038_v32  ;;  %v3036_v3 = vadd.f32 %v5924_v26, %v2999_v39  ;;  %v2963_v50 = vmax.f32 %v2931_v10, 0.0  ;;  %v2936_v2 = vadd.f32 %v5891_v40, %v2634_v5  ;;  %v2632_v17 = vadd.f32 %v2565_v35, %v2245_v11 }
 0x2ab   : > { %v3002_v47 = vmul.f32 %v5913_v36, %v2965_v33  ;;  %v4087_v56 = vpop.f32.mrf.mxu1  ;;  %v6193_v33 = vld [vmem:[#allocation22_spill] sm:$0xff] }
 0x2ac   : > { %3068 = vst [vmem:[%s4470_s20 + $0x208] sm:$0xff] %v3036_v3  ;;  %v3000_v49 = vmul.f32 %v5913_v36, %v2963_v50  ;;  %v2968_v16 = vmax.f32 %v2936_v2, 0.0  ;;  %v2934_v19 = vadd.f32 %v5891_v40, %v2632_v17  ;;  %v2635_v52 = vadd.f32 %v4087_v56, %v2248_v15  ;;  %v6192_v15 = vld [vmem:[#allocation14_spill] sm:$0xff]  ;;  %v6194_v3 = vld [vmem:[#allocation12_spill] sm:$0xff] }
 0x2ad   : > { %v3039_v9 = vadd.f32 %v5924_v26, %v3002_v47  ;;  %v2568_v51 = vpop.f32.mrf.mxu1  ;;  %v2255_v35 = vadd.f32 %v6193_v33, %v6192_v15  ;;  %v2253_v50 = vadd.f32 %v5858_v12, %v6194_v3 }
 0x2ae   : > { %v3037_v20 = vadd.f32 %v5924_v26, %v3000_v49  ;;  %v3005_v29 = vmul.f32 %v5913_v36, %v2968_v16  ;;  %v2966_v0 = vmax.f32 %v2934_v19, 0.0  ;;  %v2937_v44 = vadd.f32 %v5891_v40, %v2635_v52  ;;  %v6195_v19 = vld [vmem:[#allocation15_spill] sm:$0xff] }
 0x2af   : > { %3071 = vst [vmem:[%s4470_s20 + $0x268] sm:$0xff] %v3039_v9  ;;  %v2633_v48 = vadd.f32 %v2568_v51, %v2246_v13  ;;  %v4090_v38 = vpop.f32.mrf.mxu1  ;;  %v2256_v52 = vadd.f32 %v5864_v27, %v6195_v19 }
 0x2b0   : > { %3069 = vst [vmem:[%s4470_s20 + $0x228] sm:$0xff] %v3037_v20  ;;  %v3042_v28 = vadd.f32 %v5924_v26, %v3005_v29  ;;  %v3003_v7 = vmul.f32 %v5913_v36, %v2966_v0  ;;  %v2969_v54 = vmax.f32 %v2937_v44, 0.0  ;;  %v2638_v61 = vadd.f32 %v4090_v38, %v2251_v63  ;;  %v6196_v63 = vld [vmem:[#allocation13_spill] sm:$0xff] }
 0x2b1   : > { %v2935_v37 = vadd.f32 %v5891_v40, %v2633_v48  ;;  %v2581_v59 = vpop.f32.mrf.mxu1  ;;  %v2254_v9 = vadd.f32 %v5874_v41, %v6196_v63 }
 0x2b2   : > { %3074 = vst [vmem:[%s4470_s20 + $0x2c8] sm:$0xff] %v3042_v28  ;;  %v3040_v23 = vadd.f32 %v5924_v26, %v3003_v7  ;;  %v3006_v60 = vmul.f32 %v5913_v36, %v2969_v54  ;;  %v2940_v34 = vadd.f32 %v5891_v40, %v2638_v61  ;;  %v2636_v18 = vadd.f32 %v2581_v59, %v2249_v1 }
 0x2b3   : > { %v2967_v24 = vmax.f32 %v2935_v37, 0.0  ;;  %v4091_v62 = vpop.f32.mrf.mxu1 }
 0x2b4   : > { %3072 = vst [vmem:[%s4470_s20 + $0x288] sm:$0xff] %v3040_v23  ;;  %v3043_v21 = vadd.f32 %v5924_v26, %v3006_v60  ;;  %v2972_v42 = vmax.f32 %v2940_v34, 0.0  ;;  %v2938_v11 = vadd.f32 %v5891_v40, %v2636_v18  ;;  %v2639_v14 = vadd.f32 %v4091_v62, %v2252_v46 }
 0x2b5   : > { %v3004_v57 = vmul.f32 %v5913_v36, %v2967_v24  ;;  %v2584_v32 = vpop.f32.mrf.mxu1 }
 0x2b6   : > { %3075 = vst [vmem:[%s4470_s20 + $0x2e8] sm:$0xff] %v3043_v21  ;;  %v3009_v39 = vmul.f32 %v5913_v36, %v2972_v42  ;;  %v2970_v10 = vmax.f32 %v2938_v11, 0.0  ;;  %v2941_v5 = vadd.f32 %v5891_v40, %v2639_v14  ;;  %v2637_v8 = vadd.f32 %v2584_v32, %v2250_v4 }
 0x2b7   : > { %v3041_v2 = vadd.f32 %v5924_v26, %v3004_v57  ;;  %v4094_v17 = vpop.f32.mrf.mxu1 }
 0x2b8   : > { %v3046_v47 = vadd.f32 %v5924_v26, %v3009_v39  ;;  %v3007_v56 = vmul.f32 %v5913_v36, %v2970_v10  ;;  %v2973_v49 = vmax.f32 %v2941_v5, 0.0  ;;  %v2939_v16 = vadd.f32 %v5891_v40, %v2637_v8 }
 0x2b9   : > { %3073 = vst [vmem:[%s4470_s20 + $0x2a8] sm:$0xff] %v3041_v2  ;;  %v2642_v31 = vadd.f32 %v4094_v17, %v2255_v35  ;;  %v2597_v22 = vpop.f32.mrf.mxu1 }
 0x2ba   : > { %3078 = vst [vmem:[%s4470_s20 + $0x348] sm:$0xff] %v3046_v47  ;;  %v3044_v12 = vadd.f32 %v5924_v26, %v3007_v56  ;;  %v3010_v13 = vmul.f32 %v5913_v36, %v2973_v49  ;;  %v2971_v30 = vmax.f32 %v2939_v16, 0.0  ;;  %v2640_v53 = vadd.f32 %v2597_v22, %v2253_v50 }
 0x2bb   : > { %v2944_v51 = vadd.f32 %v5891_v40, %v2642_v31  ;;  %v4095_v20 = vpop.f32.mrf.mxu1 }
 0x2bc   : > { %3076 = vst [vmem:[%s4470_s20 + $0x308] sm:$0xff] %v3044_v12  ;;  %v3047_v27 = vadd.f32 %v5924_v26, %v3010_v13  ;;  %v3008_v29 = vmul.f32 %v5913_v36, %v2971_v30  ;;  %v2942_v0 = vadd.f32 %v5891_v40, %v2640_v53  ;;  %v2643_v44 = vadd.f32 %v4095_v20, %v2256_v52 }
 0x2bd   : > { %v2976_v6 = vmax.f32 %v2944_v51, 0.0  ;;  %v2600_v58 = vpop.f32.mrf.mxu1 }
 0x2be   : > { %3079 = vst [vmem:[%s4470_s20 + $0x368] sm:$0xff] %v3047_v27  ;;  %v3045_v41 = vadd.f32 %v5924_v26, %v3008_v29  ;;  %v2974_v1 = vmax.f32 %v2942_v0, 0.0  ;;  %v2945_v48 = vadd.f32 %v5891_v40, %v2643_v44  ;;  %v2641_v38 = vadd.f32 %v2600_v58, %v2254_v9 }
 0x2bf   : > { %v3013_v28 = vmul.f32 %v5913_v36, %v2976_v6 }
 0x2c0   : > { %3077 = vst [vmem:[%s4470_s20 + $0x328] sm:$0xff] %v3045_v41  ;;  %v3011_v7 = vmul.f32 %v5913_v36, %v2974_v1  ;;  %v2977_v54 = vmax.f32 %v2945_v48, 0.0  ;;  %v2943_v61 = vadd.f32 %v5891_v40, %v2641_v38 }
 0x2c1   : > { %v3050_v45 = vadd.f32 %v5924_v26, %v3013_v28 }
 0x2c2   : > { %v3048_v43 = vadd.f32 %v5924_v26, %v3011_v7  ;;  %v3014_v46 = vmul.f32 %v5913_v36, %v2977_v54  ;;  %v2975_v37 = vmax.f32 %v2943_v61, 0.0 }
 0x2c3   : > { %3082 = vst [vmem:[%s4470_s20 + $0x3c8] sm:$0xff] %v3050_v45 }
 0x2c4   : > { %3080 = vst [vmem:[%s4470_s20 + $0x388] sm:$0xff] %v3048_v43  ;;  %v3051_v59 = vadd.f32 %v5924_v26, %v3014_v46  ;;  %v3012_v23 = vmul.f32 %v5913_v36, %v2975_v37 }
 0x2c6   : > { %3083 = vst [vmem:[%s4470_s20 + $0x3e8] sm:$0xff] %v3051_v59  ;;  %v3049_v40 = vadd.f32 %v5924_v26, %v3012_v23 }
 0x2c8   : > { %3081 = vst [vmem:[%s4470_s20 + $0x3a8] sm:$0xff] %v3049_v40 }
 0x2c9   : > { %4260 = shalt.err (!%p4257_p5)
}
 0x2ca   : > { %s4261_s20 = scalar_lea.hbm %s6094_s23, 16384  ;;  %s4265_s26 = scalar_lea.hbm %s6157_s9, 32768 }
 0x2cb   : > { %p4262_p6 = scmp.ne.s32.totalorder %s6094_s23, %s4261_s20  ;;  %p4266_p10 = scmp.lt.s32.totalorder %s6094_s23, %s6157_s9 }
 0x2cc   : > { %p4267_p11 = scmp.lt.s32.totalorder %s4265_s26, %s4261_s20 }
 0x2cd   : > { %p4263_p7 = pnand %p4262_p6, %p4419_p4 }
 0x2ce   : > { %p4268_p12 = por %p4267_p11, %p4266_p10 }
 0x2cf   : > { %p4264_p9 = pneg %p4263_p7 }
 0x2d1   : > { %p4269_p13 = pnand %p4268_p12, %p4264_p9 }
 0x2d3   : > { %4272 = shalt.err (!%p4269_p13)
}
 0x2d4   : > { %s4327_s25 = smov 512   ;;  %s4328_s28 = smov 32  }
 0x2d5   : > { %4104 = dma.vmem_to_hbm [thread:$0]  (%p4419_p4), %s6096_s17, 16384, %s6094_s23, %s6103_s24, %s4327_s25, %s4327_s25, %s4328_s28  }
 0x2d6 PF: > { %p4110_p0 = scmp.ge.s32.totalorder %s4323_s14, 2  ;;  %s3466_s29 = sand.u32 1, %s4303_s30  }
 0x2d7   : > { %s3467_s15 = scalar_lea.sflag [#allocation4], %s3466_s29 }
 0x2d8   : > { %p4107_p1 = pnand %p4110_p0, %p4426_p8 }
 0x2da   : > { %p4108_p2 = pneg %p4107_p1 }
 0x2dc   : > { %4298 = dma.done.wait (%p4108_p2), %s3467_s15, 16384  }
 0x2dd   : > { %4300 = vsyncadd (%p4108_p2), %s3467_s15, 4294950912  ;;  %s22_s14 = sadd.s32 1, %s4323_s14   ;;  %s6198_s19 = sld [smem:[#allocation6_spill]] }
 0x2de   : > { %p19_p3 = scmp.ge.s32.totalorder %s22_s14, 4   ;;  %s6199_s30 = smov %s4307_s10 }
 0x2df   : > { %s6200_s10 = smov %s4311_s11  ;;  %s6201_s11 = smov %s4432_s22 }
 0x2e0   : > { %s6202_s12 = smov %s4319_s13  ;;  %21 = sbr.rel (!%p19_p3) target bundleno = 4 (0x4), region = 98 }
 0x2e3   : > { %s6203_s13 = smov %s6198_s19 }
 0x2e5   :  { %3472 = vsyncpa [#allocation4], 1 }
 0x2e6   :  { %3474 = vsyncpa [#allocation4 + $0x1], 1 }

</bundles_post_ra>
